<compile_context>
chip_gen: v6e
topology: v6e:2x2x1
jax: 0.10.0
libtpu: 0.0.40
codegen_flags: <defaults>
</compile_context>

<pallas_src>
import math

import jax
import jax.numpy as jnp
from jax.experimental import pallas as pl
from jax.experimental.pallas import tpu as pltpu

# ---------------- configuration (small demo shapes) ----------------
NUM_LAYERS = 2
VOCAB = 32
D_IN = 16            # input_dim (embedding dim)
N_HEADS = 2
HEAD_DIM = 8
P_FACTOR = 2
KER = 4

P_DIM = P_FACTOR * D_IN          # "left" up-projection width
HID = N_HEADS * HEAD_DIM         # head_num * head_dim
EPS = 1e-5

F1 = P_DIM + HID                 # [wl | wr]
F2 = P_DIM + HID + HID           # [conv_toeplitz | wv | wo]
F3 = 3 * HID + 2 * N_HEADS       # [wq | wk*scale | skip | wi | wf]

# packed per-timestep activation layout (lane offsets), padded to 128 lanes
_Q0 = 0 * HID
_K0 = 1 * HID
_V0 = 2 * HID
_OG0 = 3 * HID
_SK0 = 4 * HID
_R0 = 5 * HID
_I0 = 6 * HID
_F0 = 6 * HID + N_HEADS
_ACT_USED = 6 * HID + 2 * N_HEADS
ACT_W = 128                      # pad to one full vreg row -> unmasked store


def _const_spec(shape):
    """Constant-index (resident) block covering the full array."""
    zeros = (0,) * len(shape)
    return pl.BlockSpec(shape, lambda i: zeros)


# ============================ Pallas kernels ============================

def _proj_kernel(x_ref, ln_w_ref, ln_b_ref, w1_ref, b1_ref, w2_ref, b2_ref,
                 w3_ref, b3_ref, act_ref):
    """Time-batched, state-independent projections for one layer.

    x_ref:   (rows, D_IN)   rows = (time, batch) flattened
    act_ref: (rows, ACT_W)  packed [q | k | v | og | skip | silu_r | i | f | 0]
    """
    f32, bf16 = jnp.float32, jnp.bfloat16
    x = x_ref[...]

    # LayerNorm(input_dim)
    mu = jnp.mean(x, axis=-1, keepdims=True)
    var = jnp.mean((x - mu) ** 2, axis=-1, keepdims=True)
    x_n = (x - mu) * jax.lax.rsqrt(var + EPS) * ln_w_ref[...] + ln_b_ref[...]

    # fused GEMM 1: x_n -> [x_t | r_t]
    y1 = jnp.dot(x_n.astype(bf16), w1_ref[...],
                 preferred_element_type=f32) + b1_ref[...]
    x_t = y1[:, :P_DIM]
    r_t = y1[:, P_DIM:]

    # fused GEMM 2 on x_t: [causal-conv (Toeplitz) | v | o_pre]
    y2 = jnp.dot(x_t.astype(bf16), w2_ref[...],
                 preferred_element_type=f32) + b2_ref[...]
    conv = y2[:, :P_DIM]
    v = y2[:, P_DIM:P_DIM + HID]
    og = jax.nn.sigmoid(y2[:, P_DIM + HID:])
    x_c = conv * jax.nn.sigmoid(conv)                    # SiLU

    # fused GEMM 3 on x_c: [q | k*1/sqrt(Dh) | skip | i_pre | f_pre]
    y3 = jnp.dot(x_c.astype(bf16), w3_ref[...],
                 preferred_element_type=f32) + b3_ref[...]
    q = y3[:, 0 * HID:1 * HID]
    k = y3[:, 1 * HID:2 * HID]
    skip = y3[:, 2 * HID:3 * HID]
    ig = y3[:, 3 * HID:3 * HID + N_HEADS]
    fg = y3[:, 3 * HID + N_HEADS:]

    silu_r = r_t * jax.nn.sigmoid(r_t)

    pad = jnp.zeros((x.shape[0], ACT_W - _ACT_USED), f32)
    act_ref[...] = jnp.concatenate(
        [q, k, v, og, skip, silu_r, ig, fg, pad], axis=-1)


def _recurrence_kernel(x_ref, act_ref, c0_ref, n0_ref, m0_ref,
                       gn_w_ref, gn_b_ref, wd_ref, bd_ref,
                       out_ref, c_ref, n_ref, m_ref):
    """Sequential (c, n, m) scan over one T_CHUNK-timestep chunk + epilogue.

    x_ref/out_ref: (T, B, D_IN); act_ref: (T, B, ACT_W)
    c/n/m:         (B, H, Dh, Dh) / (B, H, Dh) / (B, H)  -- per-head layout
    The state is carried in the constant-index output blocks c/n/m_ref.
    """
    f32, bf16 = jnp.float32, jnp.bfloat16
    t = pl.program_id(0)
    T, B = out_ref.shape[0], out_ref.shape[1]

    @pl.when(t == 0)
    def _init():
        c_ref[...] = c0_ref[...]
        n_ref[...] = n0_ref[...]
        m_ref[...] = m0_ref[...]

    c = c_ref[...]                                       # (B, H, Dh, Dh)
    n = n_ref[...]                                       # (B, H, Dh)
    m = m_ref[...]                                       # (B, H)

    acts = act_ref[...]                                  # (T, B, ACT_W)
    # hoist the head reshapes out of the serial loop
    q_all = acts[:, :, _Q0:_Q0 + HID].reshape(T, B, N_HEADS, HEAD_DIM)
    k_all = acts[:, :, _K0:_K0 + HID].reshape(T, B, N_HEADS, HEAD_DIM)
    v_all = acts[:, :, _V0:_V0 + HID].reshape(T, B, N_HEADS, HEAD_DIM)
    i_all = acts[:, :, _I0:_I0 + N_HEADS]                # (T, B, H)
    f_all = acts[:, :, _F0:_F0 + N_HEADS]                # (T, B, H)

    # ---- serial chain: only the state update + normalizer (no MXU ops) ----
    h_steps = []
    for ts in range(T):                                  # static unroll
        q, k, v = q_all[ts], k_all[ts], v_all[ts]
        ig, fg = i_all[ts], f_all[ts]

        m_new = jnp.maximum(fg + m, ig)                  # stabilizer
        i_e = jnp.exp(ig - m_new)
        f_e = jnp.exp(fg + m - m_new)

        c = (f_e[:, :, None, None] * c
             + i_e[:, :, None, None] * (v[:, :, :, None] * k[:, :, None, :]))
        n = f_e[:, :, None] * n + i_e[:, :, None] * k
        m = m_new

        num = jnp.sum(c * q[:, :, None, :], axis=-1)     # (B, H, Dh)
        den = jnp.maximum(jnp.abs(jnp.sum(n * q, axis=-1)), 1.0)   # (B, H)
        h_steps.append(num * pl.reciprocal(den, approx=True)[:, :, None])

    c_ref[...] = c
    n_ref[...] = n
    m_ref[...] = m

    # ---- batched per-chunk epilogue (state-independent) ----
    h = jnp.stack(h_steps, axis=0)                       # (T, B, H, Dh)
    og = acts[:, :, _OG0:_OG0 + HID].reshape(T, B, N_HEADS, HEAD_DIM)
    h = og * h

    gm = jnp.mean(h, axis=-1, keepdims=True)             # GroupNorm per head
    gv = jnp.mean((h - gm) ** 2, axis=-1, keepdims=True)
    h_n = ((h - gm) * jax.lax.rsqrt(gv + EPS)).reshape(T, B, HID)
    h_n = h_n * gn_w_ref[...] + gn_b_ref[...]

    skip = acts[:, :, _SK0:_SK0 + HID]
    silu_r = acts[:, :, _R0:_R0 + HID]
    u = (h_n + skip) * silu_r                            # (T, B, HID)

    y = jnp.dot(u.reshape(T * B, HID).astype(bf16), wd_ref[...],
                preferred_element_type=f32) + bd_ref[...]
    out_ref[...] = y.reshape(T, B, D_IN) + x_ref[...]    # residual


def _proj_softmax_kernel(x_ref, w_ref, b_ref, out_ref):
    """out_proj (Linear, bf16 weights) followed by exact softmax(dim=-1)."""
    logits = jnp.dot(x_ref[...].astype(jnp.bfloat16), w_ref[...],
                     preferred_element_type=jnp.float32) + b_ref[...]
    mx = jnp.max(logits, axis=-1, keepdims=True)
    e = jnp.exp(logits - mx)
    out_ref[...] = e / jnp.sum(e, axis=-1, keepdims=True)


# ============================ wrappers (glue) ============================

def _layer_projections(lp, x_flat):
    """x_flat: (S*B, D_IN) -> packed activations (S*B, ACT_W)."""
    rows = x_flat.shape[0]
    row_blk = min(rows, 512)
    assert rows % row_blk == 0
    grid = (rows // row_blk,)
    return pl.pallas_call(
        _proj_kernel,
        out_shape=jax.ShapeDtypeStruct((rows, ACT_W), jnp.float32),
        grid=grid,
        in_specs=[
            pl.BlockSpec((row_blk, D_IN), lambda i: (i, 0)),
            _const_spec((1, D_IN)), _const_spec((1, D_IN)),
            _const_spec((D_IN, F1)), _const_spec((1, F1)),
            _const_spec((P_DIM, F2)), _const_spec((1, F2)),
            _const_spec((P_DIM, F3)), _const_spec((1, F3)),
        ],
        out_specs=pl.BlockSpec((row_blk, ACT_W), lambda i: (i, 0)),
        compiler_params=pltpu.CompilerParams(
            dimension_semantics=("parallel",)),
    )(x_flat, lp["ln_w"], lp["ln_b"], lp["w1"], lp["b1"],
      lp["w2"], lp["b2"], lp["w3"], lp["b3"])


def _layer_recurrence(lp, x_seq, act_seq, c0, n0, m0):
    """Sequential scan over time for one layer (time chunked)."""
    S, B, _ = x_seq.shape
    # production sweet spot is 8-32 steps/chunk; demo S is small
    t_chunk = next(c for c in (8, 4, 2, 1) if S % c == 0)
    grid = (S // t_chunk,)

    # TODO(synk): for v7x add a batch/head-group grid axis marked "parallel"
    # ahead of the time axis (and re-derive vmem_limit_bytes for 64 MiB);
    # consider pipeline_mode=pl.Buffered(1) on the constant weight blocks if
    # VMEM becomes the limiter at production sizes.
    in_specs = [
        pl.BlockSpec((t_chunk, B, D_IN), lambda t: (t, 0, 0)),     # x chunk
        pl.BlockSpec((t_chunk, B, ACT_W), lambda t: (t, 0, 0)),    # act chunk
        _const_spec(c0.shape), _const_spec(n0.shape), _const_spec(m0.shape),
        _const_spec((1, HID)), _const_spec((1, HID)),              # gn_w, gn_b
        _const_spec((HID, D_IN)), _const_spec((1, D_IN)),          # wd, bd
    ]
    out_specs = (
        pl.BlockSpec((t_chunk, B, D_IN), lambda t: (t, 0, 0)),
        _const_spec(c0.shape), _const_spec(n0.shape), _const_spec(m0.shape),
    )
    out_shape = (
        jax.ShapeDtypeStruct((S, B, D_IN), jnp.float32),
        jax.ShapeDtypeStruct(c0.shape, jnp.float32),
        jax.ShapeDtypeStruct(n0.shape, jnp.float32),
        jax.ShapeDtypeStruct(m0.shape, jnp.float32),
    )
    return pl.pallas_call(
        _recurrence_kernel,
        out_shape=out_shape,
        grid=grid,
        in_specs=in_specs,
        out_specs=out_specs,
        compiler_params=pltpu.CompilerParams(
            dimension_semantics=("arbitrary",)),
    )(x_seq, act_seq, c0, n0, m0,
      lp["gn_w"], lp["gn_b"], lp["wd"], lp["bd"])


def out_proj_softmax(params, x):
    # TODO(synk): at production sizes fuse this into the last layer's chunk
    # epilogue (and lane-pad VOCAB) to avoid the extra HBM round trip.
    lead = x.shape[:-1]
    xf = x.reshape((-1, D_IN))
    rows = xf.shape[0]
    row_blk = min(rows, 512)
    assert rows % row_blk == 0
    probs = pl.pallas_call(
        _proj_softmax_kernel,
        out_shape=jax.ShapeDtypeStruct((rows, VOCAB), jnp.float32),
        grid=(rows // row_blk,),
        in_specs=[pl.BlockSpec((row_blk, D_IN), lambda i: (i, 0)),
                  _const_spec((D_IN, VOCAB)), _const_spec((1, VOCAB))],
        out_specs=pl.BlockSpec((row_blk, VOCAB), lambda i: (i, 0)),
        compiler_params=pltpu.CompilerParams(
            dimension_semantics=("parallel",)),
    )(xf, params["out_w"], params["out_b"])
    return probs.reshape(lead + (VOCAB,))


def init_hidden(batch_size):
    hid = []
    for _ in range(NUM_LAYERS):
        c0 = jnp.zeros((batch_size, N_HEADS, HEAD_DIM, HEAD_DIM), jnp.float32)
        n0 = jnp.ones((batch_size, N_HEADS, HEAD_DIM), jnp.float32)
        m0 = jnp.zeros((batch_size, N_HEADS), jnp.float32)
        hid.append((c0, n0, m0))
    return hid


def xlstm_forward(params, tokens, hid=None, batch_first=False):
    tokens = jnp.atleast_2d(tokens)
    # TODO(synk): embedding gather kept in plain JAX (glue); could become a
    # scalar-prefetch pl.Element gather kernel if it ever matters.
    x = jnp.take(params["embedding"], tokens, axis=0)        # (d0, d1, D_IN)
    if hid is None:
        hid = init_hidden(x.shape[0])   # matches PyTorch: dim-0 pre-rearrange
    if batch_first:
        x = jnp.transpose(x, (1, 0, 2))                      # 'b s i -> s b i'
    S, B, _ = x.shape

    inp = x
    new_hid = []
    for l in range(NUM_LAYERS):
        lp = params["layers"][l]
        c0, n0, m0 = hid[l]
        act = _layer_projections(lp, inp.reshape(S * B, D_IN))
        inp, c1, n1, m1 = _layer_recurrence(
            lp, inp, act.reshape(S, B, ACT_W), c0, n0, m0)
        new_hid.append((c1, n1, m1))

    out = jnp.transpose(inp, (1, 0, 2)) if batch_first else inp
    out = out_proj_softmax(params, out)
    return out, new_hid


# ============================ parameter init ============================

def _init_linear(key, fan_in, fan_out):
    k1, k2 = jax.random.split(key)
    bound = 1.0 / math.sqrt(fan_in)
    w = jax.random.uniform(k1, (fan_out, fan_in), jnp.float32, -bound, bound)
    b = jax.random.uniform(k2, (fan_out,), jnp.float32, -bound, bound)
    return w, b


def _causal_conv_toeplitz(w, length, ksize):
    """Banded (P,P) matrix M with x @ M == causal conv1d(x, w)."""
    m_idx = jnp.arange(length)[:, None]
    l_idx = jnp.arange(length)[None, :]
    j = m_idx - l_idx + ksize - 1
    valid = (j >= 0) & (j <= ksize - 1)
    return jnp.where(valid, w[jnp.clip(j, 0, ksize - 1)], 0.0).astype(jnp.float32)


def init_params(key):
    keys = jax.random.split(key, 2 + NUM_LAYERS)
    emb = jax.random.normal(keys[0], (VOCAB, D_IN), jnp.float32)
    op_w, op_b = _init_linear(keys[1], D_IN, VOCAB)

    inv_sqrt_dh = 1.0 / math.sqrt(HEAD_DIM)
    layers = []
    for i in range(NUM_LAYERS):
        lk = jax.random.split(keys[2 + i], 12)
        wl, bl = _init_linear(lk[0], D_IN, P_DIM)
        wr, br = _init_linear(lk[1], D_IN, HID)
        wd, bd = _init_linear(lk[2], HID, D_IN)
        wi, bi = _init_linear(lk[3], P_DIM, N_HEADS)
        wf, bf = _init_linear(lk[4], P_DIM, N_HEADS)
        wo, bo = _init_linear(lk[5], P_DIM, HID)
        wq, bq = _init_linear(lk[6], P_DIM, HID)
        wk_, bk = _init_linear(lk[7], P_DIM, HID)
        wv, bv = _init_linear(lk[8], P_DIM, HID)
        cb = 1.0 / math.sqrt(KER)
        conv_w = jax.random.uniform(lk[9], (KER,), jnp.float32, -cb, cb)
        conv_b = jax.random.uniform(lk[10], (), jnp.float32, -cb, cb)
        sb = 1.0 / math.sqrt(P_DIM)
        skip_w = jax.random.uniform(lk[11], (HID, P_DIM), jnp.float32, -sb, sb)
        conv_m = _causal_conv_toeplitz(conv_w, P_DIM, KER)

        # fused GEMM 1: x_n -> [x_t | r_t]
        w1 = jnp.concatenate([wl.T, wr.T], axis=1)
        b1 = jnp.concatenate([bl, br])[None, :]
        # fused GEMM 2: x_t -> [conv | v | o]
        w2 = jnp.concatenate([conv_m, wv.T, wo.T], axis=1)
        b2 = jnp.concatenate(
            [conv_b * jnp.ones((P_DIM,), jnp.float32), bv, bo])[None, :]
        # fused GEMM 3: x_c -> [q | k*scale | skip | i | f]
        w3 = jnp.concatenate(
            [wq.T, wk_.T * inv_sqrt_dh, skip_w.T, wi.T, wf.T], axis=1)
        b3 = jnp.concatenate(
            [bq, bk * inv_sqrt_dh, jnp.zeros((HID,), jnp.float32),
             bi, bf])[None, :]

        layers.append(dict(
            ln_w=jnp.ones((1, D_IN), jnp.float32),
            ln_b=jnp.zeros((1, D_IN), jnp.float32),
            gn_w=jnp.ones((1, HID), jnp.float32),
            gn_b=jnp.zeros((1, HID), jnp.float32),
            w1=w1.astype(jnp.bfloat16), b1=b1,
            w2=w2.astype(jnp.bfloat16), b2=b2,
            w3=w3.astype(jnp.bfloat16), b3=b3,
            wd=wd.T.astype(jnp.bfloat16), bd=bd[None, :],
        ))

    return dict(embedding=emb,
                out_w=op_w.T.astype(jnp.bfloat16), out_b=op_b[None, :],
                layers=layers)


# ================================ main ================================

if __name__ == "__main__":
    key = jax.random.PRNGKey(0)
    pkey, tkey = jax.random.split(key)
    params = init_params(pkey)

    B, S = 2, 16
    tokens = jax.random.randint(tkey, (B, S), 0, VOCAB, dtype=jnp.int32)

    fwd = jax.jit(xlstm_forward, static_argnames=("batch_first",))
    out, hid = fwd(params, tokens, None, batch_first=True)
    jax.block_until_ready((out, hid))

    assert out.shape == (B, S, VOCAB)
    assert hid[0][0].shape == (B, N_HEADS, HEAD_DIM, HEAD_DIM)
    assert hid[0][1].shape == (B, N_HEADS, HEAD_DIM)
    assert hid[0][2].shape == (B, N_HEADS)
    print("KERNEL_OK")
</pallas_src>

<mosaic_0001>
module attributes {stable_mosaic.version = 11 : i64} {
  func.func @_proj_kernel(%arg0: i32, %arg1: memref<32x16xf32, #tpu.memory_space<vmem>>, %arg2: memref<1x16xf32, #tpu.memory_space<vmem>>, %arg3: memref<1x16xf32, #tpu.memory_space<vmem>>, %arg4: memref<16x48xbf16, #tpu.memory_space<vmem>>, %arg5: memref<1x48xf32, #tpu.memory_space<vmem>>, %arg6: memref<32x64xbf16, #tpu.memory_space<vmem>>, %arg7: memref<1x64xf32, #tpu.memory_space<vmem>>, %arg8: memref<32x52xbf16, #tpu.memory_space<vmem>>, %arg9: memref<1x52xf32, #tpu.memory_space<vmem>>, %arg10: memref<32x128xf32, #tpu.memory_space<vmem>>) attributes {dimension_semantics = [#tpu.dimension_semantics<parallel>], iteration_bounds = array<i64: 1>, scalar_prefetch = 0 : i64, scratch_operands = 0 : i64, tpu.core_type = #tpu.core_type<tc>, window_params = [{transform_indices = @transform_0, window_bounds = array<i64: 32, 16>}, {pipeline_mode = #tpu.pipeline_mode<synchronous>, transform_indices = @transform_1, window_bounds = array<i64: 1, 16>}, {pipeline_mode = #tpu.pipeline_mode<synchronous>, transform_indices = @transform_2, window_bounds = array<i64: 1, 16>}, {pipeline_mode = #tpu.pipeline_mode<synchronous>, transform_indices = @transform_3, window_bounds = array<i64: 16, 48>}, {pipeline_mode = #tpu.pipeline_mode<synchronous>, transform_indices = @transform_4, window_bounds = array<i64: 1, 48>}, {pipeline_mode = #tpu.pipeline_mode<synchronous>, transform_indices = @transform_5, window_bounds = array<i64: 32, 64>}, {pipeline_mode = #tpu.pipeline_mode<synchronous>, transform_indices = @transform_6, window_bounds = array<i64: 1, 64>}, {pipeline_mode = #tpu.pipeline_mode<synchronous>, transform_indices = @transform_7, window_bounds = array<i64: 32, 52>}, {pipeline_mode = #tpu.pipeline_mode<synchronous>, transform_indices = @transform_8, window_bounds = array<i64: 1, 52>}, {transform_indices = @transform_9, window_bounds = array<i64: 32, 128>}]} {
    %c0 = arith.constant 0 : index
    %c0_0 = arith.constant 0 : index
    %0 = vector.load %arg1[%c0, %c0_0] : memref<32x16xf32, #tpu.memory_space<vmem>>, vector<32x16xf32>
    %cst = arith.constant dense<0.000000e+00> : vector<32xf32>
    %1 = vector.multi_reduction <add>, %0, %cst [1] : vector<32x16xf32> to vector<32xf32>
    %2 = vector.shape_cast %1 : vector<32xf32> to vector<32x1xf32>
    %cst_1 = arith.constant 1.600000e+01 : f32
    %3 = vector.broadcast %cst_1 : f32 to vector<32x1xf32>
    %4 = arith.divf %2, %3 : vector<32x1xf32>
    %5 = vector.broadcast %4 : vector<32x1xf32> to vector<32x16xf32>
    %6 = arith.subf %0, %5 : vector<32x16xf32>
    %7 = arith.mulf %6, %6 : vector<32x16xf32>
    %cst_2 = arith.constant dense<0.000000e+00> : vector<32xf32>
    %8 = vector.multi_reduction <add>, %7, %cst_2 [1] : vector<32x16xf32> to vector<32xf32>
    %9 = vector.shape_cast %8 : vector<32xf32> to vector<32x1xf32>
    %cst_3 = arith.constant 1.600000e+01 : f32
    %10 = vector.broadcast %cst_3 : f32 to vector<32x1xf32>
    %11 = arith.divf %9, %10 : vector<32x1xf32>
    %12 = vector.broadcast %4 : vector<32x1xf32> to vector<32x16xf32>
    %13 = arith.subf %0, %12 : vector<32x16xf32>
    %cst_4 = arith.constant 9.99999974E-6 : f32
    %14 = vector.broadcast %cst_4 : f32 to vector<32x1xf32>
    %15 = arith.addf %11, %14 : vector<32x1xf32>
    %16 = math.rsqrt %15 : vector<32x1xf32>
    %17 = vector.broadcast %16 : vector<32x1xf32> to vector<32x16xf32>
    %18 = arith.mulf %13, %17 : vector<32x16xf32>
    %c0_5 = arith.constant 0 : index
    %c0_6 = arith.constant 0 : index
    %19 = vector.load %arg2[%c0_5, %c0_6] : memref<1x16xf32, #tpu.memory_space<vmem>>, vector<1x16xf32>
    %20 = vector.broadcast %19 : vector<1x16xf32> to vector<32x16xf32>
    %21 = arith.mulf %18, %20 : vector<32x16xf32>
    %c0_7 = arith.constant 0 : index
    %c0_8 = arith.constant 0 : index
    %22 = vector.load %arg3[%c0_7, %c0_8] : memref<1x16xf32, #tpu.memory_space<vmem>>, vector<1x16xf32>
    %23 = vector.broadcast %22 : vector<1x16xf32> to vector<32x16xf32>
    %24 = arith.addf %21, %23 : vector<32x16xf32>
    %25 = arith.truncf %24 : vector<32x16xf32> to vector<32x16xbf16>
    %c0_9 = arith.constant 0 : index
    %c0_10 = arith.constant 0 : index
    %26 = vector.load %arg4[%c0_9, %c0_10] : memref<16x48xbf16, #tpu.memory_space<vmem>>, vector<16x48xbf16>
    %cst_11 = arith.constant dense<0.000000e+00> : vector<32x48xf32>
    %27 = tpu.matmul %25, %26, %cst_11 {dimension_numbers = #tpu.dot_dimension_numbers<[1], [0], [0], [1], [0, 0, 1, 1], [], []>} : vector<32x16xbf16>, vector<16x48xbf16>, vector<32x48xf32> -> vector<32x48xf32>
    %c0_12 = arith.constant 0 : index
    %c0_13 = arith.constant 0 : index
    %28 = vector.load %arg5[%c0_12, %c0_13] : memref<1x48xf32, #tpu.memory_space<vmem>>, vector<1x48xf32>
    %29 = vector.broadcast %28 : vector<1x48xf32> to vector<32x48xf32>
    %30 = arith.addf %27, %29 : vector<32x48xf32>
    %31 = vector.extract_strided_slice %30 {offsets = [0, 0], sizes = [32, 32], strides = [1, 1]} : vector<32x48xf32> to vector<32x32xf32>
    %32 = vector.extract_strided_slice %30 {offsets = [0, 32], sizes = [32, 16], strides = [1, 1]} : vector<32x48xf32> to vector<32x16xf32>
    %33 = arith.truncf %31 : vector<32x32xf32> to vector<32x32xbf16>
    %c0_14 = arith.constant 0 : index
    %c0_15 = arith.constant 0 : index
    %34 = vector.load %arg6[%c0_14, %c0_15] : memref<32x64xbf16, #tpu.memory_space<vmem>>, vector<32x64xbf16>
    %cst_16 = arith.constant dense<0.000000e+00> : vector<32x64xf32>
    %35 = tpu.matmul %33, %34, %cst_16 {dimension_numbers = #tpu.dot_dimension_numbers<[1], [0], [0], [1], [0, 0, 1, 1], [], []>} : vector<32x32xbf16>, vector<32x64xbf16>, vector<32x64xf32> -> vector<32x64xf32>
    %c0_17 = arith.constant 0 : index
    %c0_18 = arith.constant 0 : index
    %36 = vector.load %arg7[%c0_17, %c0_18] : memref<1x64xf32, #tpu.memory_space<vmem>>, vector<1x64xf32>
    %37 = vector.broadcast %36 : vector<1x64xf32> to vector<32x64xf32>
    %38 = arith.addf %35, %37 : vector<32x64xf32>
    %39 = vector.extract_strided_slice %38 {offsets = [0, 0], sizes = [32, 32], strides = [1, 1]} : vector<32x64xf32> to vector<32x32xf32>
    %40 = vector.extract_strided_slice %38 {offsets = [0, 32], sizes = [32, 16], strides = [1, 1]} : vector<32x64xf32> to vector<32x16xf32>
    %41 = vector.extract_strided_slice %38 {offsets = [0, 48], sizes = [32, 16], strides = [1, 1]} : vector<32x64xf32> to vector<32x16xf32>
    %42 = arith.negf %41 : vector<32x16xf32>
    %43 = math.exp %42 : vector<32x16xf32>
    %cst_19 = arith.constant 1.000000e+00 : f32
    %44 = vector.broadcast %cst_19 : f32 to vector<32x16xf32>
    %45 = arith.addf %44, %43 : vector<32x16xf32>
    %46 = arith.divf %44, %45 : vector<32x16xf32>
    %47 = arith.negf %39 : vector<32x32xf32>
    %48 = math.exp %47 : vector<32x32xf32>
    %cst_20 = arith.constant 1.000000e+00 : f32
    %49 = vector.broadcast %cst_20 : f32 to vector<32x32xf32>
    %50 = arith.addf %49, %48 : vector<32x32xf32>
    %51 = arith.divf %49, %50 : vector<32x32xf32>
    %52 = arith.mulf %39, %51 : vector<32x32xf32>
    %53 = arith.truncf %52 : vector<32x32xf32> to vector<32x32xbf16>
    %c0_21 = arith.constant 0 : index
    %c0_22 = arith.constant 0 : index
    %54 = vector.load %arg8[%c0_21, %c0_22] : memref<32x52xbf16, #tpu.memory_space<vmem>>, vector<32x52xbf16>
    %cst_23 = arith.constant dense<0.000000e+00> : vector<32x52xf32>
    %55 = tpu.matmul %53, %54, %cst_23 {dimension_numbers = #tpu.dot_dimension_numbers<[1], [0], [0], [1], [0, 0, 1, 1], [], []>} : vector<32x32xbf16>, vector<32x52xbf16>, vector<32x52xf32> -> vector<32x52xf32>
    %c0_24 = arith.constant 0 : index
    %c0_25 = arith.constant 0 : index
    %56 = vector.load %arg9[%c0_24, %c0_25] : memref<1x52xf32, #tpu.memory_space<vmem>>, vector<1x52xf32>
    %57 = vector.broadcast %56 : vector<1x52xf32> to vector<32x52xf32>
    %58 = arith.addf %55, %57 : vector<32x52xf32>
    %59 = vector.extract_strided_slice %58 {offsets = [0, 0], sizes = [32, 16], strides = [1, 1]} : vector<32x52xf32> to vector<32x16xf32>
    %60 = vector.extract_strided_slice %58 {offsets = [0, 16], sizes = [32, 16], strides = [1, 1]} : vector<32x52xf32> to vector<32x16xf32>
    %61 = vector.extract_strided_slice %58 {offsets = [0, 32], sizes = [32, 16], strides = [1, 1]} : vector<32x52xf32> to vector<32x16xf32>
    %62 = vector.extract_strided_slice %58 {offsets = [0, 48], sizes = [32, 2], strides = [1, 1]} : vector<32x52xf32> to vector<32x2xf32>
    %63 = vector.extract_strided_slice %58 {offsets = [0, 50], sizes = [32, 2], strides = [1, 1]} : vector<32x52xf32> to vector<32x2xf32>
    %64 = arith.negf %32 : vector<32x16xf32>
    %65 = math.exp %64 : vector<32x16xf32>
    %cst_26 = arith.constant 1.000000e+00 : f32
    %66 = vector.broadcast %cst_26 : f32 to vector<32x16xf32>
    %67 = arith.addf %66, %65 : vector<32x16xf32>
    %68 = arith.divf %66, %67 : vector<32x16xf32>
    %69 = arith.mulf %32, %68 : vector<32x16xf32>
    %cst_27 = arith.constant 0.000000e+00 : f32
    %70 = vector.broadcast %cst_27 : f32 to vector<32x28xf32>
    %71 = tpu.concatenate %59, %60, %40, %46, %61, %69, %62, %63, %70 in 1 : vector<32x16xf32>, vector<32x16xf32>, vector<32x16xf32>, vector<32x16xf32>, vector<32x16xf32>, vector<32x16xf32>, vector<32x2xf32>, vector<32x2xf32>, vector<32x28xf32> -> vector<32x128xf32>
    %c0_28 = arith.constant 0 : index
    %c0_29 = arith.constant 0 : index
    %72 = vector.load %arg10[%c0_28, %c0_29] : memref<32x128xf32, #tpu.memory_space<vmem>>, vector<32x128xf32>
    tpu.vector_store %arg10[%c0_28, %c0_29], %71 {strides = array<i32>} : memref<32x128xf32, #tpu.memory_space<vmem>>, vector<32x128xf32>,
    return
  }
  func.func @transform_0(%arg0: i32) -> (i32, i32) {
    %c0_i32 = arith.constant 0 : i32
    %c0_i32_0 = arith.constant 0 : i32
    return %arg0, %c0_i32 : i32, i32
  }
  func.func @transform_1(%arg0: i32) -> (i32, i32) {
    %c0_i32 = arith.constant 0 : i32
    %c0_i32_0 = arith.constant 0 : i32
    %c0_i32_1 = arith.constant 0 : i32
    return %c0_i32, %c0_i32_0 : i32, i32
  }
  func.func @transform_2(%arg0: i32) -> (i32, i32) {
    %c0_i32 = arith.constant 0 : i32
    %c0_i32_0 = arith.constant 0 : i32
    %c0_i32_1 = arith.constant 0 : i32
    return %c0_i32, %c0_i32_0 : i32, i32
  }
  func.func @transform_3(%arg0: i32) -> (i32, i32) {
    %c0_i32 = arith.constant 0 : i32
    %c0_i32_0 = arith.constant 0 : i32
    %c0_i32_1 = arith.constant 0 : i32
    return %c0_i32, %c0_i32_0 : i32, i32
  }
  func.func @transform_4(%arg0: i32) -> (i32, i32) {
    %c0_i32 = arith.constant 0 : i32
    %c0_i32_0 = arith.constant 0 : i32
    %c0_i32_1 = arith.constant 0 : i32
    return %c0_i32, %c0_i32_0 : i32, i32
  }
  func.func @transform_5(%arg0: i32) -> (i32, i32) {
    %c0_i32 = arith.constant 0 : i32
    %c0_i32_0 = arith.constant 0 : i32
    %c0_i32_1 = arith.constant 0 : i32
    return %c0_i32, %c0_i32_0 : i32, i32
  }
  func.func @transform_6(%arg0: i32) -> (i32, i32) {
    %c0_i32 = arith.constant 0 : i32
    %c0_i32_0 = arith.constant 0 : i32
    %c0_i32_1 = arith.constant 0 : i32
    return %c0_i32, %c0_i32_0 : i32, i32
  }
  func.func @transform_7(%arg0: i32) -> (i32, i32) {
    %c0_i32 = arith.constant 0 : i32
    %c0_i32_0 = arith.constant 0 : i32
    %c0_i32_1 = arith.constant 0 : i32
    return %c0_i32, %c0_i32_0 : i32, i32
  }
  func.func @transform_8(%arg0: i32) -> (i32, i32) {
    %c0_i32 = arith.constant 0 : i32
    %c0_i32_0 = arith.constant 0 : i32
    %c0_i32_1 = arith.constant 0 : i32
    return %c0_i32, %c0_i32_0 : i32, i32
  }
  func.func @transform_9(%arg0: i32) -> (i32, i32) {
    %c0_i32 = arith.constant 0 : i32
    %c0_i32_0 = arith.constant 0 : i32
    return %arg0, %c0_i32 : i32, i32
  }
}

module attributes {stable_mosaic.version = 11 : i64} {
  func.func @_proj_softmax_kernel(%arg0: i32, %arg1: memref<32x16xf32, #tpu.memory_space<vmem>>, %arg2: memref<16x32xbf16, #tpu.memory_space<vmem>>, %arg3: memref<1x32xf32, #tpu.memory_space<vmem>>, %arg4: memref<32x32xf32, #tpu.memory_space<vmem>>) attributes {dimension_semantics = [#tpu.dimension_semantics<parallel>], iteration_bounds = array<i64: 1>, scalar_prefetch = 0 : i64, scratch_operands = 0 : i64, tpu.core_type = #tpu.core_type<tc>, window_params = [{transform_indices = @transform_0, window_bounds = array<i64: 32, 16>}, {pipeline_mode = #tpu.pipeline_mode<synchronous>, transform_indices = @transform_1, window_bounds = array<i64: 16, 32>}, {pipeline_mode = #tpu.pipeline_mode<synchronous>, transform_indices = @transform_2, window_bounds = array<i64: 1, 32>}, {transform_indices = @transform_3, window_bounds = array<i64: 32, 32>}]} {
    %c0 = arith.constant 0 : index
    %c0_0 = arith.constant 0 : index
    %0 = vector.load %arg1[%c0, %c0_0] : memref<32x16xf32, #tpu.memory_space<vmem>>, vector<32x16xf32>
    %1 = arith.truncf %0 : vector<32x16xf32> to vector<32x16xbf16>
    %c0_1 = arith.constant 0 : index
    %c0_2 = arith.constant 0 : index
    %2 = vector.load %arg2[%c0_1, %c0_2] : memref<16x32xbf16, #tpu.memory_space<vmem>>, vector<16x32xbf16>
    %cst = arith.constant dense<0.000000e+00> : vector<32x32xf32>
    %3 = tpu.matmul %1, %2, %cst {dimension_numbers = #tpu.dot_dimension_numbers<[1], [0], [0], [1], [0, 0, 1, 1], [], []>} : vector<32x16xbf16>, vector<16x32xbf16>, vector<32x32xf32> -> vector<32x32xf32>
    %c0_3 = arith.constant 0 : index
    %c0_4 = arith.constant 0 : index
    %4 = vector.load %arg3[%c0_3, %c0_4] : memref<1x32xf32, #tpu.memory_space<vmem>>, vector<1x32xf32>
    %5 = vector.broadcast %4 : vector<1x32xf32> to vector<32x32xf32>
    %6 = arith.addf %3, %5 : vector<32x32xf32>
    %cst_5 = arith.constant dense<0xFF800000> : vector<32xf32>
    %7 = vector.multi_reduction <maximumf>, %6, %cst_5 [1] : vector<32x32xf32> to vector<32xf32>
    %8 = vector.shape_cast %7 : vector<32xf32> to vector<32x1xf32>
    %9 = vector.broadcast %8 : vector<32x1xf32> to vector<32x32xf32>
    %10 = arith.subf %6, %9 : vector<32x32xf32>
    %11 = math.exp %10 : vector<32x32xf32>
    %cst_6 = arith.constant dense<0.000000e+00> : vector<32xf32>
    %12 = vector.multi_reduction <add>, %11, %cst_6 [1] : vector<32x32xf32> to vector<32xf32>
    %13 = vector.shape_cast %12 : vector<32xf32> to vector<32x1xf32>
    %14 = vector.broadcast %13 : vector<32x1xf32> to vector<32x32xf32>
    %15 = arith.divf %11, %14 : vector<32x32xf32>
    %c0_7 = arith.constant 0 : index
    %c0_8 = arith.constant 0 : index
    %16 = vector.load %arg4[%c0_7, %c0_8] : memref<32x32xf32, #tpu.memory_space<vmem>>, vector<32x32xf32>
    tpu.vector_store %arg4[%c0_7, %c0_8], %15 {strides = array<i32>} : memref<32x32xf32, #tpu.memory_space<vmem>>, vector<32x32xf32>,
    return
  }
  func.func @transform_0(%arg0: i32) -> (i32, i32) {
    %c0_i32 = arith.constant 0 : i32
    %c0_i32_0 = arith.constant 0 : i32
    return %arg0, %c0_i32 : i32, i32
  }
  func.func @transform_1(%arg0: i32) -> (i32, i32) {
    %c0_i32 = arith.constant 0 : i32
    %c0_i32_0 = arith.constant 0 : i32
    %c0_i32_1 = arith.constant 0 : i32
    return %c0_i32, %c0_i32_0 : i32, i32
  }
  func.func @transform_2(%arg0: i32) -> (i32, i32) {
    %c0_i32 = arith.constant 0 : i32
    %c0_i32_0 = arith.constant 0 : i32
    %c0_i32_1 = arith.constant 0 : i32
    return %c0_i32, %c0_i32_0 : i32, i32
  }
  func.func @transform_3(%arg0: i32) -> (i32, i32) {
    %c0_i32 = arith.constant 0 : i32
    %c0_i32_0 = arith.constant 0 : i32
    return %arg0, %c0_i32 : i32, i32
  }
}

module attributes {stable_mosaic.version = 11 : i64} {
  func.func @_recurrence_kernel(%arg0: i32, %arg1: memref<8x2x16xf32, #tpu.memory_space<vmem>>, %arg2: memref<8x2x128xf32, #tpu.memory_space<vmem>>, %arg3: memref<2x2x8x8xf32, #tpu.memory_space<vmem>>, %arg4: memref<2x2x8xf32, #tpu.memory_space<vmem>>, %arg5: memref<2x2xf32, #tpu.memory_space<vmem>>, %arg6: memref<1x16xf32, #tpu.memory_space<vmem>>, %arg7: memref<1x16xf32, #tpu.memory_space<vmem>>, %arg8: memref<16x16xbf16, #tpu.memory_space<vmem>>, %arg9: memref<1x16xf32, #tpu.memory_space<vmem>>, %arg10: memref<8x2x16xf32, #tpu.memory_space<vmem>>, %arg11: memref<2x2x8x8xf32, #tpu.memory_space<vmem>>, %arg12: memref<2x2x8xf32, #tpu.memory_space<vmem>>, %arg13: memref<2x2xf32, #tpu.memory_space<vmem>>) attributes {dimension_semantics = [#tpu.dimension_semantics<arbitrary>], iteration_bounds = array<i64: 2>, scalar_prefetch = 0 : i64, scratch_operands = 0 : i64, tpu.core_type = #tpu.core_type<tc>, window_params = [{transform_indices = @transform_0, window_bounds = array<i64: 8, 2, 16>}, {transform_indices = @transform_1, window_bounds = array<i64: 8, 2, 128>}, {pipeline_mode = #tpu.pipeline_mode<synchronous>, transform_indices = @transform_2, window_bounds = array<i64: 2, 2, 8, 8>}, {pipeline_mode = #tpu.pipeline_mode<synchronous>, transform_indices = @transform_3, window_bounds = array<i64: 2, 2, 8>}, {pipeline_mode = #tpu.pipeline_mode<synchronous>, transform_indices = @transform_4, window_bounds = array<i64: 2, 2>}, {pipeline_mode = #tpu.pipeline_mode<synchronous>, transform_indices = @transform_5, window_bounds = array<i64: 1, 16>}, {pipeline_mode = #tpu.pipeline_mode<synchronous>, transform_indices = @transform_6, window_bounds = array<i64: 1, 16>}, {pipeline_mode = #tpu.pipeline_mode<synchronous>, transform_indices = @transform_7, window_bounds = array<i64: 16, 16>}, {pipeline_mode = #tpu.pipeline_mode<synchronous>, transform_indices = @transform_8, window_bounds = array<i64: 1, 16>}, {transform_indices = @transform_9, window_bounds = array<i64: 8, 2, 16>}, {pipeline_mode = #tpu.pipeline_mode<synchronous>, transform_indices = @transform_10, window_bounds = array<i64: 2, 2, 8, 8>}, {pipeline_mode = #tpu.pipeline_mode<synchronous>, transform_indices = @transform_11, window_bounds = array<i64: 2, 2, 8>}, {pipeline_mode = #tpu.pipeline_mode<synchronous>, transform_indices = @transform_12, window_bounds = array<i64: 2, 2>}]} {
    %c0_i32 = arith.constant 0 : i32
    %0 = arith.cmpi eq, %arg0, %c0_i32 : i32
    %1 = arith.extui %0 : i1 to i32
    %c0_i32_0 = arith.constant 0 : i32
    %2 = arith.cmpi ne, %1, %c0_i32_0 : i32
    scf.if %2 {
      %c0_64 = arith.constant 0 : index
      %c0_65 = arith.constant 0 : index
      %c0_66 = arith.constant 0 : index
      %c0_67 = arith.constant 0 : index
      %464 = vector.load %arg3[%c0_64, %c0_65, %c0_66, %c0_67] : memref<2x2x8x8xf32, #tpu.memory_space<vmem>>, vector<2x2x8x8xf32>
      %c0_68 = arith.constant 0 : index
      %c0_69 = arith.constant 0 : index
      %c0_70 = arith.constant 0 : index
      %c0_71 = arith.constant 0 : index
      %465 = vector.load %arg11[%c0_68, %c0_69, %c0_70, %c0_71] : memref<2x2x8x8xf32, #tpu.memory_space<vmem>>, vector<2x2x8x8xf32>
      tpu.vector_store %arg11[%c0_68, %c0_69, %c0_70, %c0_71], %464 {strides = array<i32>} : memref<2x2x8x8xf32, #tpu.memory_space<vmem>>, vector<2x2x8x8xf32>,
      %c0_72 = arith.constant 0 : index
      %c0_73 = arith.constant 0 : index
      %c0_74 = arith.constant 0 : index
      %466 = vector.load %arg4[%c0_72, %c0_73, %c0_74] : memref<2x2x8xf32, #tpu.memory_space<vmem>>, vector<2x2x8xf32>
      %c0_75 = arith.constant 0 : index
      %c0_76 = arith.constant 0 : index
      %c0_77 = arith.constant 0 : index
      %467 = vector.load %arg12[%c0_75, %c0_76, %c0_77] : memref<2x2x8xf32, #tpu.memory_space<vmem>>, vector<2x2x8xf32>
      tpu.vector_store %arg12[%c0_75, %c0_76, %c0_77], %466 {strides = array<i32>} : memref<2x2x8xf32, #tpu.memory_space<vmem>>, vector<2x2x8xf32>,
      %c0_78 = arith.constant 0 : index
      %c0_79 = arith.constant 0 : index
      %468 = vector.load %arg5[%c0_78, %c0_79] : memref<2x2xf32, #tpu.memory_space<vmem>>, vector<2x2xf32>
      %c0_80 = arith.constant 0 : index
      %c0_81 = arith.constant 0 : index
      %469 = vector.load %arg13[%c0_80, %c0_81] : memref<2x2xf32, #tpu.memory_space<vmem>>, vector<2x2xf32>
      tpu.vector_store %arg13[%c0_80, %c0_81], %468 {strides = array<i32>} : memref<2x2xf32, #tpu.memory_space<vmem>>, vector<2x2xf32>,
    } else {
    }
    %c0 = arith.constant 0 : index
    %c0_1 = arith.constant 0 : index
    %c0_2 = arith.constant 0 : index
    %c0_3 = arith.constant 0 : index
    %3 = vector.load %arg11[%c0, %c0_1, %c0_2, %c0_3] : memref<2x2x8x8xf32, #tpu.memory_space<vmem>>, vector<2x2x8x8xf32>
    %c0_4 = arith.constant 0 : index
    %c0_5 = arith.constant 0 : index
    %c0_6 = arith.constant 0 : index
    %4 = vector.load %arg12[%c0_4, %c0_5, %c0_6] : memref<2x2x8xf32, #tpu.memory_space<vmem>>, vector<2x2x8xf32>
    %c0_7 = arith.constant 0 : index
    %c0_8 = arith.constant 0 : index
    %5 = vector.load %arg13[%c0_7, %c0_8] : memref<2x2xf32, #tpu.memory_space<vmem>>, vector<2x2xf32>
    %c0_9 = arith.constant 0 : index
    %c0_10 = arith.constant 0 : index
    %c0_11 = arith.constant 0 : index
    %6 = vector.load %arg2[%c0_9, %c0_10, %c0_11] : memref<8x2x128xf32, #tpu.memory_space<vmem>>, vector<8x2x128xf32>
    %7 = vector.extract_strided_slice %6 {offsets = [0, 0, 0], sizes = [8, 2, 16], strides = [1, 1, 1]} : vector<8x2x128xf32> to vector<8x2x16xf32>
    %8 = vector.shape_cast %7 : vector<8x2x16xf32> to vector<8x2x2x8xf32>
    %9 = vector.extract_strided_slice %6 {offsets = [0, 0, 16], sizes = [8, 2, 16], strides = [1, 1, 1]} : vector<8x2x128xf32> to vector<8x2x16xf32>
    %10 = vector.shape_cast %9 : vector<8x2x16xf32> to vector<8x2x2x8xf32>
    %11 = vector.extract_strided_slice %6 {offsets = [0, 0, 32], sizes = [8, 2, 16], strides = [1, 1, 1]} : vector<8x2x128xf32> to vector<8x2x16xf32>
    %12 = vector.shape_cast %11 : vector<8x2x16xf32> to vector<8x2x2x8xf32>
    %13 = vector.extract_strided_slice %6 {offsets = [0, 0, 96], sizes = [8, 2, 2], strides = [1, 1, 1]} : vector<8x2x128xf32> to vector<8x2x2xf32>
    %14 = vector.extract_strided_slice %6 {offsets = [0, 0, 98], sizes = [8, 2, 2], strides = [1, 1, 1]} : vector<8x2x128xf32> to vector<8x2x2xf32>
    %15 = vector.extract_strided_slice %8 {offsets = [0, 0, 0, 0], sizes = [1, 2, 2, 8], strides = [1, 1, 1, 1]} : vector<8x2x2x8xf32> to vector<1x2x2x8xf32>
    %16 = vector.shape_cast %15 : vector<1x2x2x8xf32> to vector<2x2x8xf32>
    %17 = vector.extract_strided_slice %10 {offsets = [0, 0, 0, 0], sizes = [1, 2, 2, 8], strides = [1, 1, 1, 1]} : vector<8x2x2x8xf32> to vector<1x2x2x8xf32>
    %18 = vector.shape_cast %17 : vector<1x2x2x8xf32> to vector<2x2x8xf32>
    %19 = vector.extract_strided_slice %12 {offsets = [0, 0, 0, 0], sizes = [1, 2, 2, 8], strides = [1, 1, 1, 1]} : vector<8x2x2x8xf32> to vector<1x2x2x8xf32>
    %20 = vector.shape_cast %19 : vector<1x2x2x8xf32> to vector<2x2x8xf32>
    %21 = vector.extract_strided_slice %13 {offsets = [0, 0, 0], sizes = [1, 2, 2], strides = [1, 1, 1]} : vector<8x2x2xf32> to vector<1x2x2xf32>
    %22 = vector.shape_cast %21 : vector<1x2x2xf32> to vector<2x2xf32>
    %23 = vector.extract_strided_slice %14 {offsets = [0, 0, 0], sizes = [1, 2, 2], strides = [1, 1, 1]} : vector<8x2x2xf32> to vector<1x2x2xf32>
    %24 = vector.shape_cast %23 : vector<1x2x2xf32> to vector<2x2xf32>
    %25 = arith.addf %24, %5 : vector<2x2xf32>
    %26 = arith.maximumf %25, %22 : vector<2x2xf32>
    %27 = arith.subf %22, %26 : vector<2x2xf32>
    %28 = math.exp %27 : vector<2x2xf32>
    %29 = arith.addf %24, %5 : vector<2x2xf32>
    %30 = arith.subf %29, %26 : vector<2x2xf32>
    %31 = math.exp %30 : vector<2x2xf32>
    %32 = vector.shape_cast %31 : vector<2x2xf32> to vector<2x2x1x1xf32>
    %33 = vector.broadcast %32 : vector<2x2x1x1xf32> to vector<2x2x8x8xf32>
    %34 = arith.mulf %33, %3 : vector<2x2x8x8xf32>
    %35 = vector.shape_cast %28 : vector<2x2xf32> to vector<2x2x1x1xf32>
    %36 = vector.shape_cast %20 : vector<2x2x8xf32> to vector<2x2x8x1xf32>
    %37 = vector.shape_cast %18 : vector<2x2x8xf32> to vector<2x2x1x8xf32>
    %38 = vector.broadcast %36 : vector<2x2x8x1xf32> to vector<2x2x8x8xf32>
    %39 = vector.broadcast %37 : vector<2x2x1x8xf32> to vector<2x2x8x8xf32>
    %40 = arith.mulf %38, %39 : vector<2x2x8x8xf32>
    %41 = vector.broadcast %35 : vector<2x2x1x1xf32> to vector<2x2x8x8xf32>
    %42 = arith.mulf %41, %40 : vector<2x2x8x8xf32>
    %43 = arith.addf %34, %42 : vector<2x2x8x8xf32>
    %44 = vector.shape_cast %31 : vector<2x2xf32> to vector<2x2x1xf32>
    %45 = vector.broadcast %44 : vector<2x2x1xf32> to vector<2x2x8xf32>
    %46 = arith.mulf %45, %4 : vector<2x2x8xf32>
    %47 = vector.shape_cast %28 : vector<2x2xf32> to vector<2x2x1xf32>
    %48 = vector.broadcast %47 : vector<2x2x1xf32> to vector<2x2x8xf32>
    %49 = arith.mulf %48, %18 : vector<2x2x8xf32>
    %50 = arith.addf %46, %49 : vector<2x2x8xf32>
    %51 = vector.shape_cast %16 : vector<2x2x8xf32> to vector<2x2x1x8xf32>
    %52 = vector.broadcast %51 : vector<2x2x1x8xf32> to vector<2x2x8x8xf32>
    %53 = arith.mulf %43, %52 : vector<2x2x8x8xf32>
    %cst = arith.constant dense<0.000000e+00> : vector<2x2x8xf32>
    %54 = vector.multi_reduction <add>, %53, %cst [3] : vector<2x2x8x8xf32> to vector<2x2x8xf32>
    %55 = arith.mulf %50, %16 : vector<2x2x8xf32>
    %cst_12 = arith.constant dense<0.000000e+00> : vector<2x2xf32>
    %56 = vector.multi_reduction <add>, %55, %cst_12 [2] : vector<2x2x8xf32> to vector<2x2xf32>
    %57 = math.absf %56 : vector<2x2xf32>
    %cst_13 = arith.constant 1.000000e+00 : f32
    %58 = vector.broadcast %cst_13 : f32 to vector<2x2xf32>
    %59 = arith.maximumf %57, %58 : vector<2x2xf32>
    %60 = tpu.reciprocal %59 {approx = true} : vector<2x2xf32> -> vector<2x2xf32>
    %61 = vector.shape_cast %60 : vector<2x2xf32> to vector<2x2x1xf32>
    %62 = vector.broadcast %61 : vector<2x2x1xf32> to vector<2x2x8xf32>
    %63 = arith.mulf %54, %62 : vector<2x2x8xf32>
    %64 = vector.extract_strided_slice %8 {offsets = [1, 0, 0, 0], sizes = [1, 2, 2, 8], strides = [1, 1, 1, 1]} : vector<8x2x2x8xf32> to vector<1x2x2x8xf32>
    %65 = vector.shape_cast %64 : vector<1x2x2x8xf32> to vector<2x2x8xf32>
    %66 = vector.extract_strided_slice %10 {offsets = [1, 0, 0, 0], sizes = [1, 2, 2, 8], strides = [1, 1, 1, 1]} : vector<8x2x2x8xf32> to vector<1x2x2x8xf32>
    %67 = vector.shape_cast %66 : vector<1x2x2x8xf32> to vector<2x2x8xf32>
    %68 = vector.extract_strided_slice %12 {offsets = [1, 0, 0, 0], sizes = [1, 2, 2, 8], strides = [1, 1, 1, 1]} : vector<8x2x2x8xf32> to vector<1x2x2x8xf32>
    %69 = vector.shape_cast %68 : vector<1x2x2x8xf32> to vector<2x2x8xf32>
    %70 = vector.extract_strided_slice %13 {offsets = [1, 0, 0], sizes = [1, 2, 2], strides = [1, 1, 1]} : vector<8x2x2xf32> to vector<1x2x2xf32>
    %71 = vector.shape_cast %70 : vector<1x2x2xf32> to vector<2x2xf32>
    %72 = vector.extract_strided_slice %14 {offsets = [1, 0, 0], sizes = [1, 2, 2], strides = [1, 1, 1]} : vector<8x2x2xf32> to vector<1x2x2xf32>
    %73 = vector.shape_cast %72 : vector<1x2x2xf32> to vector<2x2xf32>
    %74 = arith.addf %73, %26 : vector<2x2xf32>
    %75 = arith.maximumf %74, %71 : vector<2x2xf32>
    %76 = arith.subf %71, %75 : vector<2x2xf32>
    %77 = math.exp %76 : vector<2x2xf32>
    %78 = arith.addf %73, %26 : vector<2x2xf32>
    %79 = arith.subf %78, %75 : vector<2x2xf32>
    %80 = math.exp %79 : vector<2x2xf32>
    %81 = vector.shape_cast %80 : vector<2x2xf32> to vector<2x2x1x1xf32>
    %82 = vector.broadcast %81 : vector<2x2x1x1xf32> to vector<2x2x8x8xf32>
    %83 = arith.mulf %82, %43 : vector<2x2x8x8xf32>
    %84 = vector.shape_cast %77 : vector<2x2xf32> to vector<2x2x1x1xf32>
    %85 = vector.shape_cast %69 : vector<2x2x8xf32> to vector<2x2x8x1xf32>
    %86 = vector.shape_cast %67 : vector<2x2x8xf32> to vector<2x2x1x8xf32>
    %87 = vector.broadcast %85 : vector<2x2x8x1xf32> to vector<2x2x8x8xf32>
    %88 = vector.broadcast %86 : vector<2x2x1x8xf32> to vector<2x2x8x8xf32>
    %89 = arith.mulf %87, %88 : vector<2x2x8x8xf32>
    %90 = vector.broadcast %84 : vector<2x2x1x1xf32> to vector<2x2x8x8xf32>
    %91 = arith.mulf %90, %89 : vector<2x2x8x8xf32>
    %92 = arith.addf %83, %91 : vector<2x2x8x8xf32>
    %93 = vector.shape_cast %80 : vector<2x2xf32> to vector<2x2x1xf32>
    %94 = vector.broadcast %93 : vector<2x2x1xf32> to vector<2x2x8xf32>
    %95 = arith.mulf %94, %50 : vector<2x2x8xf32>
    %96 = vector.shape_cast %77 : vector<2x2xf32> to vector<2x2x1xf32>
    %97 = vector.broadcast %96 : vector<2x2x1xf32> to vector<2x2x8xf32>
    %98 = arith.mulf %97, %67 : vector<2x2x8xf32>
    %99 = arith.addf %95, %98 : vector<2x2x8xf32>
    %100 = vector.shape_cast %65 : vector<2x2x8xf32> to vector<2x2x1x8xf32>
    %101 = vector.broadcast %100 : vector<2x2x1x8xf32> to vector<2x2x8x8xf32>
    %102 = arith.mulf %92, %101 : vector<2x2x8x8xf32>
    %cst_14 = arith.constant dense<0.000000e+00> : vector<2x2x8xf32>
    %103 = vector.multi_reduction <add>, %102, %cst_14 [3] : vector<2x2x8x8xf32> to vector<2x2x8xf32>
    %104 = arith.mulf %99, %65 : vector<2x2x8xf32>
    %cst_15 = arith.constant dense<0.000000e+00> : vector<2x2xf32>
    %105 = vector.multi_reduction <add>, %104, %cst_15 [2] : vector<2x2x8xf32> to vector<2x2xf32>
    %106 = math.absf %105 : vector<2x2xf32>
    %cst_16 = arith.constant 1.000000e+00 : f32
    %107 = vector.broadcast %cst_16 : f32 to vector<2x2xf32>
    %108 = arith.maximumf %106, %107 : vector<2x2xf32>
    %109 = tpu.reciprocal %108 {approx = true} : vector<2x2xf32> -> vector<2x2xf32>
    %110 = vector.shape_cast %109 : vector<2x2xf32> to vector<2x2x1xf32>
    %111 = vector.broadcast %110 : vector<2x2x1xf32> to vector<2x2x8xf32>
    %112 = arith.mulf %103, %111 : vector<2x2x8xf32>
    %113 = vector.extract_strided_slice %8 {offsets = [2, 0, 0, 0], sizes = [1, 2, 2, 8], strides = [1, 1, 1, 1]} : vector<8x2x2x8xf32> to vector<1x2x2x8xf32>
    %114 = vector.shape_cast %113 : vector<1x2x2x8xf32> to vector<2x2x8xf32>
    %115 = vector.extract_strided_slice %10 {offsets = [2, 0, 0, 0], sizes = [1, 2, 2, 8], strides = [1, 1, 1, 1]} : vector<8x2x2x8xf32> to vector<1x2x2x8xf32>
    %116 = vector.shape_cast %115 : vector<1x2x2x8xf32> to vector<2x2x8xf32>
    %117 = vector.extract_strided_slice %12 {offsets = [2, 0, 0, 0], sizes = [1, 2, 2, 8], strides = [1, 1, 1, 1]} : vector<8x2x2x8xf32> to vector<1x2x2x8xf32>
    %118 = vector.shape_cast %117 : vector<1x2x2x8xf32> to vector<2x2x8xf32>
    %119 = vector.extract_strided_slice %13 {offsets = [2, 0, 0], sizes = [1, 2, 2], strides = [1, 1, 1]} : vector<8x2x2xf32> to vector<1x2x2xf32>
    %120 = vector.shape_cast %119 : vector<1x2x2xf32> to vector<2x2xf32>
    %121 = vector.extract_strided_slice %14 {offsets = [2, 0, 0], sizes = [1, 2, 2], strides = [1, 1, 1]} : vector<8x2x2xf32> to vector<1x2x2xf32>
    %122 = vector.shape_cast %121 : vector<1x2x2xf32> to vector<2x2xf32>
    %123 = arith.addf %122, %75 : vector<2x2xf32>
    %124 = arith.maximumf %123, %120 : vector<2x2xf32>
    %125 = arith.subf %120, %124 : vector<2x2xf32>
    %126 = math.exp %125 : vector<2x2xf32>
    %127 = arith.addf %122, %75 : vector<2x2xf32>
    %128 = arith.subf %127, %124 : vector<2x2xf32>
    %129 = math.exp %128 : vector<2x2xf32>
    %130 = vector.shape_cast %129 : vector<2x2xf32> to vector<2x2x1x1xf32>
    %131 = vector.broadcast %130 : vector<2x2x1x1xf32> to vector<2x2x8x8xf32>
    %132 = arith.mulf %131, %92 : vector<2x2x8x8xf32>
    %133 = vector.shape_cast %126 : vector<2x2xf32> to vector<2x2x1x1xf32>
    %134 = vector.shape_cast %118 : vector<2x2x8xf32> to vector<2x2x8x1xf32>
    %135 = vector.shape_cast %116 : vector<2x2x8xf32> to vector<2x2x1x8xf32>
    %136 = vector.broadcast %134 : vector<2x2x8x1xf32> to vector<2x2x8x8xf32>
    %137 = vector.broadcast %135 : vector<2x2x1x8xf32> to vector<2x2x8x8xf32>
    %138 = arith.mulf %136, %137 : vector<2x2x8x8xf32>
    %139 = vector.broadcast %133 : vector<2x2x1x1xf32> to vector<2x2x8x8xf32>
    %140 = arith.mulf %139, %138 : vector<2x2x8x8xf32>
    %141 = arith.addf %132, %140 : vector<2x2x8x8xf32>
    %142 = vector.shape_cast %129 : vector<2x2xf32> to vector<2x2x1xf32>
    %143 = vector.broadcast %142 : vector<2x2x1xf32> to vector<2x2x8xf32>
    %144 = arith.mulf %143, %99 : vector<2x2x8xf32>
    %145 = vector.shape_cast %126 : vector<2x2xf32> to vector<2x2x1xf32>
    %146 = vector.broadcast %145 : vector<2x2x1xf32> to vector<2x2x8xf32>
    %147 = arith.mulf %146, %116 : vector<2x2x8xf32>
    %148 = arith.addf %144, %147 : vector<2x2x8xf32>
    %149 = vector.shape_cast %114 : vector<2x2x8xf32> to vector<2x2x1x8xf32>
    %150 = vector.broadcast %149 : vector<2x2x1x8xf32> to vector<2x2x8x8xf32>
    %151 = arith.mulf %141, %150 : vector<2x2x8x8xf32>
    %cst_17 = arith.constant dense<0.000000e+00> : vector<2x2x8xf32>
    %152 = vector.multi_reduction <add>, %151, %cst_17 [3] : vector<2x2x8x8xf32> to vector<2x2x8xf32>
    %153 = arith.mulf %148, %114 : vector<2x2x8xf32>
    %cst_18 = arith.constant dense<0.000000e+00> : vector<2x2xf32>
    %154 = vector.multi_reduction <add>, %153, %cst_18 [2] : vector<2x2x8xf32> to vector<2x2xf32>
    %155 = math.absf %154 : vector<2x2xf32>
    %cst_19 = arith.constant 1.000000e+00 : f32
    %156 = vector.broadcast %cst_19 : f32 to vector<2x2xf32>
    %157 = arith.maximumf %155, %156 : vector<2x2xf32>
    %158 = tpu.reciprocal %157 {approx = true} : vector<2x2xf32> -> vector<2x2xf32>
    %159 = vector.shape_cast %158 : vector<2x2xf32> to vector<2x2x1xf32>
    %160 = vector.broadcast %159 : vector<2x2x1xf32> to vector<2x2x8xf32>
    %161 = arith.mulf %152, %160 : vector<2x2x8xf32>
    %162 = vector.extract_strided_slice %8 {offsets = [3, 0, 0, 0], sizes = [1, 2, 2, 8], strides = [1, 1, 1, 1]} : vector<8x2x2x8xf32> to vector<1x2x2x8xf32>
    %163 = vector.shape_cast %162 : vector<1x2x2x8xf32> to vector<2x2x8xf32>
    %164 = vector.extract_strided_slice %10 {offsets = [3, 0, 0, 0], sizes = [1, 2, 2, 8], strides = [1, 1, 1, 1]} : vector<8x2x2x8xf32> to vector<1x2x2x8xf32>
    %165 = vector.shape_cast %164 : vector<1x2x2x8xf32> to vector<2x2x8xf32>
    %166 = vector.extract_strided_slice %12 {offsets = [3, 0, 0, 0], sizes = [1, 2, 2, 8], strides = [1, 1, 1, 1]} : vector<8x2x2x8xf32> to vector<1x2x2x8xf32>
    %167 = vector.shape_cast %166 : vector<1x2x2x8xf32> to vector<2x2x8xf32>
    %168 = vector.extract_strided_slice %13 {offsets = [3, 0, 0], sizes = [1, 2, 2], strides = [1, 1, 1]} : vector<8x2x2xf32> to vector<1x2x2xf32>
    %169 = vector.shape_cast %168 : vector<1x2x2xf32> to vector<2x2xf32>
    %170 = vector.extract_strided_slice %14 {offsets = [3, 0, 0], sizes = [1, 2, 2], strides = [1, 1, 1]} : vector<8x2x2xf32> to vector<1x2x2xf32>
    %171 = vector.shape_cast %170 : vector<1x2x2xf32> to vector<2x2xf32>
    %172 = arith.addf %171, %124 : vector<2x2xf32>
    %173 = arith.maximumf %172, %169 : vector<2x2xf32>
    %174 = arith.subf %169, %173 : vector<2x2xf32>
    %175 = math.exp %174 : vector<2x2xf32>
    %176 = arith.addf %171, %124 : vector<2x2xf32>
    %177 = arith.subf %176, %173 : vector<2x2xf32>
    %178 = math.exp %177 : vector<2x2xf32>
    %179 = vector.shape_cast %178 : vector<2x2xf32> to vector<2x2x1x1xf32>
    %180 = vector.broadcast %179 : vector<2x2x1x1xf32> to vector<2x2x8x8xf32>
    %181 = arith.mulf %180, %141 : vector<2x2x8x8xf32>
    %182 = vector.shape_cast %175 : vector<2x2xf32> to vector<2x2x1x1xf32>
    %183 = vector.shape_cast %167 : vector<2x2x8xf32> to vector<2x2x8x1xf32>
    %184 = vector.shape_cast %165 : vector<2x2x8xf32> to vector<2x2x1x8xf32>
    %185 = vector.broadcast %183 : vector<2x2x8x1xf32> to vector<2x2x8x8xf32>
    %186 = vector.broadcast %184 : vector<2x2x1x8xf32> to vector<2x2x8x8xf32>
    %187 = arith.mulf %185, %186 : vector<2x2x8x8xf32>
    %188 = vector.broadcast %182 : vector<2x2x1x1xf32> to vector<2x2x8x8xf32>
    %189 = arith.mulf %188, %187 : vector<2x2x8x8xf32>
    %190 = arith.addf %181, %189 : vector<2x2x8x8xf32>
    %191 = vector.shape_cast %178 : vector<2x2xf32> to vector<2x2x1xf32>
    %192 = vector.broadcast %191 : vector<2x2x1xf32> to vector<2x2x8xf32>
    %193 = arith.mulf %192, %148 : vector<2x2x8xf32>
    %194 = vector.shape_cast %175 : vector<2x2xf32> to vector<2x2x1xf32>
    %195 = vector.broadcast %194 : vector<2x2x1xf32> to vector<2x2x8xf32>
    %196 = arith.mulf %195, %165 : vector<2x2x8xf32>
    %197 = arith.addf %193, %196 : vector<2x2x8xf32>
    %198 = vector.shape_cast %163 : vector<2x2x8xf32> to vector<2x2x1x8xf32>
    %199 = vector.broadcast %198 : vector<2x2x1x8xf32> to vector<2x2x8x8xf32>
    %200 = arith.mulf %190, %199 : vector<2x2x8x8xf32>
    %cst_20 = arith.constant dense<0.000000e+00> : vector<2x2x8xf32>
    %201 = vector.multi_reduction <add>, %200, %cst_20 [3] : vector<2x2x8x8xf32> to vector<2x2x8xf32>
    %202 = arith.mulf %197, %163 : vector<2x2x8xf32>
    %cst_21 = arith.constant dense<0.000000e+00> : vector<2x2xf32>
    %203 = vector.multi_reduction <add>, %202, %cst_21 [2] : vector<2x2x8xf32> to vector<2x2xf32>
    %204 = math.absf %203 : vector<2x2xf32>
    %cst_22 = arith.constant 1.000000e+00 : f32
    %205 = vector.broadcast %cst_22 : f32 to vector<2x2xf32>
    %206 = arith.maximumf %204, %205 : vector<2x2xf32>
    %207 = tpu.reciprocal %206 {approx = true} : vector<2x2xf32> -> vector<2x2xf32>
    %208 = vector.shape_cast %207 : vector<2x2xf32> to vector<2x2x1xf32>
    %209 = vector.broadcast %208 : vector<2x2x1xf32> to vector<2x2x8xf32>
    %210 = arith.mulf %201, %209 : vector<2x2x8xf32>
    %211 = vector.extract_strided_slice %8 {offsets = [4, 0, 0, 0], sizes = [1, 2, 2, 8], strides = [1, 1, 1, 1]} : vector<8x2x2x8xf32> to vector<1x2x2x8xf32>
    %212 = vector.shape_cast %211 : vector<1x2x2x8xf32> to vector<2x2x8xf32>
    %213 = vector.extract_strided_slice %10 {offsets = [4, 0, 0, 0], sizes = [1, 2, 2, 8], strides = [1, 1, 1, 1]} : vector<8x2x2x8xf32> to vector<1x2x2x8xf32>
    %214 = vector.shape_cast %213 : vector<1x2x2x8xf32> to vector<2x2x8xf32>
    %215 = vector.extract_strided_slice %12 {offsets = [4, 0, 0, 0], sizes = [1, 2, 2, 8], strides = [1, 1, 1, 1]} : vector<8x2x2x8xf32> to vector<1x2x2x8xf32>
    %216 = vector.shape_cast %215 : vector<1x2x2x8xf32> to vector<2x2x8xf32>
    %217 = vector.extract_strided_slice %13 {offsets = [4, 0, 0], sizes = [1, 2, 2], strides = [1, 1, 1]} : vector<8x2x2xf32> to vector<1x2x2xf32>
    %218 = vector.shape_cast %217 : vector<1x2x2xf32> to vector<2x2xf32>
    %219 = vector.extract_strided_slice %14 {offsets = [4, 0, 0], sizes = [1, 2, 2], strides = [1, 1, 1]} : vector<8x2x2xf32> to vector<1x2x2xf32>
    %220 = vector.shape_cast %219 : vector<1x2x2xf32> to vector<2x2xf32>
    %221 = arith.addf %220, %173 : vector<2x2xf32>
    %222 = arith.maximumf %221, %218 : vector<2x2xf32>
    %223 = arith.subf %218, %222 : vector<2x2xf32>
    %224 = math.exp %223 : vector<2x2xf32>
    %225 = arith.addf %220, %173 : vector<2x2xf32>
    %226 = arith.subf %225, %222 : vector<2x2xf32>
    %227 = math.exp %226 : vector<2x2xf32>
    %228 = vector.shape_cast %227 : vector<2x2xf32> to vector<2x2x1x1xf32>
    %229 = vector.broadcast %228 : vector<2x2x1x1xf32> to vector<2x2x8x8xf32>
    %230 = arith.mulf %229, %190 : vector<2x2x8x8xf32>
    %231 = vector.shape_cast %224 : vector<2x2xf32> to vector<2x2x1x1xf32>
    %232 = vector.shape_cast %216 : vector<2x2x8xf32> to vector<2x2x8x1xf32>
    %233 = vector.shape_cast %214 : vector<2x2x8xf32> to vector<2x2x1x8xf32>
    %234 = vector.broadcast %232 : vector<2x2x8x1xf32> to vector<2x2x8x8xf32>
    %235 = vector.broadcast %233 : vector<2x2x1x8xf32> to vector<2x2x8x8xf32>
    %236 = arith.mulf %234, %235 : vector<2x2x8x8xf32>
    %237 = vector.broadcast %231 : vector<2x2x1x1xf32> to vector<2x2x8x8xf32>
    %238 = arith.mulf %237, %236 : vector<2x2x8x8xf32>
    %239 = arith.addf %230, %238 : vector<2x2x8x8xf32>
    %240 = vector.shape_cast %227 : vector<2x2xf32> to vector<2x2x1xf32>
    %241 = vector.broadcast %240 : vector<2x2x1xf32> to vector<2x2x8xf32>
    %242 = arith.mulf %241, %197 : vector<2x2x8xf32>
    %243 = vector.shape_cast %224 : vector<2x2xf32> to vector<2x2x1xf32>
    %244 = vector.broadcast %243 : vector<2x2x1xf32> to vector<2x2x8xf32>
    %245 = arith.mulf %244, %214 : vector<2x2x8xf32>
    %246 = arith.addf %242, %245 : vector<2x2x8xf32>
    %247 = vector.shape_cast %212 : vector<2x2x8xf32> to vector<2x2x1x8xf32>
    %248 = vector.broadcast %247 : vector<2x2x1x8xf32> to vector<2x2x8x8xf32>
    %249 = arith.mulf %239, %248 : vector<2x2x8x8xf32>
    %cst_23 = arith.constant dense<0.000000e+00> : vector<2x2x8xf32>
    %250 = vector.multi_reduction <add>, %249, %cst_23 [3] : vector<2x2x8x8xf32> to vector<2x2x8xf32>
    %251 = arith.mulf %246, %212 : vector<2x2x8xf32>
    %cst_24 = arith.constant dense<0.000000e+00> : vector<2x2xf32>
    %252 = vector.multi_reduction <add>, %251, %cst_24 [2] : vector<2x2x8xf32> to vector<2x2xf32>
    %253 = math.absf %252 : vector<2x2xf32>
    %cst_25 = arith.constant 1.000000e+00 : f32
    %254 = vector.broadcast %cst_25 : f32 to vector<2x2xf32>
    %255 = arith.maximumf %253, %254 : vector<2x2xf32>
    %256 = tpu.reciprocal %255 {approx = true} : vector<2x2xf32> -> vector<2x2xf32>
    %257 = vector.shape_cast %256 : vector<2x2xf32> to vector<2x2x1xf32>
    %258 = vector.broadcast %257 : vector<2x2x1xf32> to vector<2x2x8xf32>
    %259 = arith.mulf %250, %258 : vector<2x2x8xf32>
    %260 = vector.extract_strided_slice %8 {offsets = [5, 0, 0, 0], sizes = [1, 2, 2, 8], strides = [1, 1, 1, 1]} : vector<8x2x2x8xf32> to vector<1x2x2x8xf32>
    %261 = vector.shape_cast %260 : vector<1x2x2x8xf32> to vector<2x2x8xf32>
    %262 = vector.extract_strided_slice %10 {offsets = [5, 0, 0, 0], sizes = [1, 2, 2, 8], strides = [1, 1, 1, 1]} : vector<8x2x2x8xf32> to vector<1x2x2x8xf32>
    %263 = vector.shape_cast %262 : vector<1x2x2x8xf32> to vector<2x2x8xf32>
    %264 = vector.extract_strided_slice %12 {offsets = [5, 0, 0, 0], sizes = [1, 2, 2, 8], strides = [1, 1, 1, 1]} : vector<8x2x2x8xf32> to vector<1x2x2x8xf32>
    %265 = vector.shape_cast %264 : vector<1x2x2x8xf32> to vector<2x2x8xf32>
    %266 = vector.extract_strided_slice %13 {offsets = [5, 0, 0], sizes = [1, 2, 2], strides = [1, 1, 1]} : vector<8x2x2xf32> to vector<1x2x2xf32>
    %267 = vector.shape_cast %266 : vector<1x2x2xf32> to vector<2x2xf32>
    %268 = vector.extract_strided_slice %14 {offsets = [5, 0, 0], sizes = [1, 2, 2], strides = [1, 1, 1]} : vector<8x2x2xf32> to vector<1x2x2xf32>
    %269 = vector.shape_cast %268 : vector<1x2x2xf32> to vector<2x2xf32>
    %270 = arith.addf %269, %222 : vector<2x2xf32>
    %271 = arith.maximumf %270, %267 : vector<2x2xf32>
    %272 = arith.subf %267, %271 : vector<2x2xf32>
    %273 = math.exp %272 : vector<2x2xf32>
    %274 = arith.addf %269, %222 : vector<2x2xf32>
    %275 = arith.subf %274, %271 : vector<2x2xf32>
    %276 = math.exp %275 : vector<2x2xf32>
    %277 = vector.shape_cast %276 : vector<2x2xf32> to vector<2x2x1x1xf32>
    %278 = vector.broadcast %277 : vector<2x2x1x1xf32> to vector<2x2x8x8xf32>
    %279 = arith.mulf %278, %239 : vector<2x2x8x8xf32>
    %280 = vector.shape_cast %273 : vector<2x2xf32> to vector<2x2x1x1xf32>
    %281 = vector.shape_cast %265 : vector<2x2x8xf32> to vector<2x2x8x1xf32>
    %282 = vector.shape_cast %263 : vector<2x2x8xf32> to vector<2x2x1x8xf32>
    %283 = vector.broadcast %281 : vector<2x2x8x1xf32> to vector<2x2x8x8xf32>
    %284 = vector.broadcast %282 : vector<2x2x1x8xf32> to vector<2x2x8x8xf32>
    %285 = arith.mulf %283, %284 : vector<2x2x8x8xf32>
    %286 = vector.broadcast %280 : vector<2x2x1x1xf32> to vector<2x2x8x8xf32>
    %287 = arith.mulf %286, %285 : vector<2x2x8x8xf32>
    %288 = arith.addf %279, %287 : vector<2x2x8x8xf32>
    %289 = vector.shape_cast %276 : vector<2x2xf32> to vector<2x2x1xf32>
    %290 = vector.broadcast %289 : vector<2x2x1xf32> to vector<2x2x8xf32>
    %291 = arith.mulf %290, %246 : vector<2x2x8xf32>
    %292 = vector.shape_cast %273 : vector<2x2xf32> to vector<2x2x1xf32>
    %293 = vector.broadcast %292 : vector<2x2x1xf32> to vector<2x2x8xf32>
    %294 = arith.mulf %293, %263 : vector<2x2x8xf32>
    %295 = arith.addf %291, %294 : vector<2x2x8xf32>
    %296 = vector.shape_cast %261 : vector<2x2x8xf32> to vector<2x2x1x8xf32>
    %297 = vector.broadcast %296 : vector<2x2x1x8xf32> to vector<2x2x8x8xf32>
    %298 = arith.mulf %288, %297 : vector<2x2x8x8xf32>
    %cst_26 = arith.constant dense<0.000000e+00> : vector<2x2x8xf32>
    %299 = vector.multi_reduction <add>, %298, %cst_26 [3] : vector<2x2x8x8xf32> to vector<2x2x8xf32>
    %300 = arith.mulf %295, %261 : vector<2x2x8xf32>
    %cst_27 = arith.constant dense<0.000000e+00> : vector<2x2xf32>
    %301 = vector.multi_reduction <add>, %300, %cst_27 [2] : vector<2x2x8xf32> to vector<2x2xf32>
    %302 = math.absf %301 : vector<2x2xf32>
    %cst_28 = arith.constant 1.000000e+00 : f32
    %303 = vector.broadcast %cst_28 : f32 to vector<2x2xf32>
    %304 = arith.maximumf %302, %303 : vector<2x2xf32>
    %305 = tpu.reciprocal %304 {approx = true} : vector<2x2xf32> -> vector<2x2xf32>
    %306 = vector.shape_cast %305 : vector<2x2xf32> to vector<2x2x1xf32>
    %307 = vector.broadcast %306 : vector<2x2x1xf32> to vector<2x2x8xf32>
    %308 = arith.mulf %299, %307 : vector<2x2x8xf32>
    %309 = vector.extract_strided_slice %8 {offsets = [6, 0, 0, 0], sizes = [1, 2, 2, 8], strides = [1, 1, 1, 1]} : vector<8x2x2x8xf32> to vector<1x2x2x8xf32>
    %310 = vector.shape_cast %309 : vector<1x2x2x8xf32> to vector<2x2x8xf32>
    %311 = vector.extract_strided_slice %10 {offsets = [6, 0, 0, 0], sizes = [1, 2, 2, 8], strides = [1, 1, 1, 1]} : vector<8x2x2x8xf32> to vector<1x2x2x8xf32>
    %312 = vector.shape_cast %311 : vector<1x2x2x8xf32> to vector<2x2x8xf32>
    %313 = vector.extract_strided_slice %12 {offsets = [6, 0, 0, 0], sizes = [1, 2, 2, 8], strides = [1, 1, 1, 1]} : vector<8x2x2x8xf32> to vector<1x2x2x8xf32>
    %314 = vector.shape_cast %313 : vector<1x2x2x8xf32> to vector<2x2x8xf32>
    %315 = vector.extract_strided_slice %13 {offsets = [6, 0, 0], sizes = [1, 2, 2], strides = [1, 1, 1]} : vector<8x2x2xf32> to vector<1x2x2xf32>
    %316 = vector.shape_cast %315 : vector<1x2x2xf32> to vector<2x2xf32>
    %317 = vector.extract_strided_slice %14 {offsets = [6, 0, 0], sizes = [1, 2, 2], strides = [1, 1, 1]} : vector<8x2x2xf32> to vector<1x2x2xf32>
    %318 = vector.shape_cast %317 : vector<1x2x2xf32> to vector<2x2xf32>
    %319 = arith.addf %318, %271 : vector<2x2xf32>
    %320 = arith.maximumf %319, %316 : vector<2x2xf32>
    %321 = arith.subf %316, %320 : vector<2x2xf32>
    %322 = math.exp %321 : vector<2x2xf32>
    %323 = arith.addf %318, %271 : vector<2x2xf32>
    %324 = arith.subf %323, %320 : vector<2x2xf32>
    %325 = math.exp %324 : vector<2x2xf32>
    %326 = vector.shape_cast %325 : vector<2x2xf32> to vector<2x2x1x1xf32>
    %327 = vector.broadcast %326 : vector<2x2x1x1xf32> to vector<2x2x8x8xf32>
    %328 = arith.mulf %327, %288 : vector<2x2x8x8xf32>
    %329 = vector.shape_cast %322 : vector<2x2xf32> to vector<2x2x1x1xf32>
    %330 = vector.shape_cast %314 : vector<2x2x8xf32> to vector<2x2x8x1xf32>
    %331 = vector.shape_cast %312 : vector<2x2x8xf32> to vector<2x2x1x8xf32>
    %332 = vector.broadcast %330 : vector<2x2x8x1xf32> to vector<2x2x8x8xf32>
    %333 = vector.broadcast %331 : vector<2x2x1x8xf32> to vector<2x2x8x8xf32>
    %334 = arith.mulf %332, %333 : vector<2x2x8x8xf32>
    %335 = vector.broadcast %329 : vector<2x2x1x1xf32> to vector<2x2x8x8xf32>
    %336 = arith.mulf %335, %334 : vector<2x2x8x8xf32>
    %337 = arith.addf %328, %336 : vector<2x2x8x8xf32>
    %338 = vector.shape_cast %325 : vector<2x2xf32> to vector<2x2x1xf32>
    %339 = vector.broadcast %338 : vector<2x2x1xf32> to vector<2x2x8xf32>
    %340 = arith.mulf %339, %295 : vector<2x2x8xf32>
    %341 = vector.shape_cast %322 : vector<2x2xf32> to vector<2x2x1xf32>
    %342 = vector.broadcast %341 : vector<2x2x1xf32> to vector<2x2x8xf32>
    %343 = arith.mulf %342, %312 : vector<2x2x8xf32>
    %344 = arith.addf %340, %343 : vector<2x2x8xf32>
    %345 = vector.shape_cast %310 : vector<2x2x8xf32> to vector<2x2x1x8xf32>
    %346 = vector.broadcast %345 : vector<2x2x1x8xf32> to vector<2x2x8x8xf32>
    %347 = arith.mulf %337, %346 : vector<2x2x8x8xf32>
    %cst_29 = arith.constant dense<0.000000e+00> : vector<2x2x8xf32>
    %348 = vector.multi_reduction <add>, %347, %cst_29 [3] : vector<2x2x8x8xf32> to vector<2x2x8xf32>
    %349 = arith.mulf %344, %310 : vector<2x2x8xf32>
    %cst_30 = arith.constant dense<0.000000e+00> : vector<2x2xf32>
    %350 = vector.multi_reduction <add>, %349, %cst_30 [2] : vector<2x2x8xf32> to vector<2x2xf32>
    %351 = math.absf %350 : vector<2x2xf32>
    %cst_31 = arith.constant 1.000000e+00 : f32
    %352 = vector.broadcast %cst_31 : f32 to vector<2x2xf32>
    %353 = arith.maximumf %351, %352 : vector<2x2xf32>
    %354 = tpu.reciprocal %353 {approx = true} : vector<2x2xf32> -> vector<2x2xf32>
    %355 = vector.shape_cast %354 : vector<2x2xf32> to vector<2x2x1xf32>
    %356 = vector.broadcast %355 : vector<2x2x1xf32> to vector<2x2x8xf32>
    %357 = arith.mulf %348, %356 : vector<2x2x8xf32>
    %358 = vector.extract_strided_slice %8 {offsets = [7, 0, 0, 0], sizes = [1, 2, 2, 8], strides = [1, 1, 1, 1]} : vector<8x2x2x8xf32> to vector<1x2x2x8xf32>
    %359 = vector.shape_cast %358 : vector<1x2x2x8xf32> to vector<2x2x8xf32>
    %360 = vector.extract_strided_slice %10 {offsets = [7, 0, 0, 0], sizes = [1, 2, 2, 8], strides = [1, 1, 1, 1]} : vector<8x2x2x8xf32> to vector<1x2x2x8xf32>
    %361 = vector.shape_cast %360 : vector<1x2x2x8xf32> to vector<2x2x8xf32>
    %362 = vector.extract_strided_slice %12 {offsets = [7, 0, 0, 0], sizes = [1, 2, 2, 8], strides = [1, 1, 1, 1]} : vector<8x2x2x8xf32> to vector<1x2x2x8xf32>
    %363 = vector.shape_cast %362 : vector<1x2x2x8xf32> to vector<2x2x8xf32>
    %364 = vector.extract_strided_slice %13 {offsets = [7, 0, 0], sizes = [1, 2, 2], strides = [1, 1, 1]} : vector<8x2x2xf32> to vector<1x2x2xf32>
    %365 = vector.shape_cast %364 : vector<1x2x2xf32> to vector<2x2xf32>
    %366 = vector.extract_strided_slice %14 {offsets = [7, 0, 0], sizes = [1, 2, 2], strides = [1, 1, 1]} : vector<8x2x2xf32> to vector<1x2x2xf32>
    %367 = vector.shape_cast %366 : vector<1x2x2xf32> to vector<2x2xf32>
    %368 = arith.addf %367, %320 : vector<2x2xf32>
    %369 = arith.maximumf %368, %365 : vector<2x2xf32>
    %370 = arith.subf %365, %369 : vector<2x2xf32>
    %371 = math.exp %370 : vector<2x2xf32>
    %372 = arith.addf %367, %320 : vector<2x2xf32>
    %373 = arith.subf %372, %369 : vector<2x2xf32>
    %374 = math.exp %373 : vector<2x2xf32>
    %375 = vector.shape_cast %374 : vector<2x2xf32> to vector<2x2x1x1xf32>
    %376 = vector.broadcast %375 : vector<2x2x1x1xf32> to vector<2x2x8x8xf32>
    %377 = arith.mulf %376, %337 : vector<2x2x8x8xf32>
    %378 = vector.shape_cast %371 : vector<2x2xf32> to vector<2x2x1x1xf32>
    %379 = vector.shape_cast %363 : vector<2x2x8xf32> to vector<2x2x8x1xf32>
    %380 = vector.shape_cast %361 : vector<2x2x8xf32> to vector<2x2x1x8xf32>
    %381 = vector.broadcast %379 : vector<2x2x8x1xf32> to vector<2x2x8x8xf32>
    %382 = vector.broadcast %380 : vector<2x2x1x8xf32> to vector<2x2x8x8xf32>
    %383 = arith.mulf %381, %382 : vector<2x2x8x8xf32>
    %384 = vector.broadcast %378 : vector<2x2x1x1xf32> to vector<2x2x8x8xf32>
    %385 = arith.mulf %384, %383 : vector<2x2x8x8xf32>
    %386 = arith.addf %377, %385 : vector<2x2x8x8xf32>
    %387 = vector.shape_cast %374 : vector<2x2xf32> to vector<2x2x1xf32>
    %388 = vector.broadcast %387 : vector<2x2x1xf32> to vector<2x2x8xf32>
    %389 = arith.mulf %388, %344 : vector<2x2x8xf32>
    %390 = vector.shape_cast %371 : vector<2x2xf32> to vector<2x2x1xf32>
    %391 = vector.broadcast %390 : vector<2x2x1xf32> to vector<2x2x8xf32>
    %392 = arith.mulf %391, %361 : vector<2x2x8xf32>
    %393 = arith.addf %389, %392 : vector<2x2x8xf32>
    %394 = vector.shape_cast %359 : vector<2x2x8xf32> to vector<2x2x1x8xf32>
    %395 = vector.broadcast %394 : vector<2x2x1x8xf32> to vector<2x2x8x8xf32>
    %396 = arith.mulf %386, %395 : vector<2x2x8x8xf32>
    %cst_32 = arith.constant dense<0.000000e+00> : vector<2x2x8xf32>
    %397 = vector.multi_reduction <add>, %396, %cst_32 [3] : vector<2x2x8x8xf32> to vector<2x2x8xf32>
    %398 = arith.mulf %393, %359 : vector<2x2x8xf32>
    %cst_33 = arith.constant dense<0.000000e+00> : vector<2x2xf32>
    %399 = vector.multi_reduction <add>, %398, %cst_33 [2] : vector<2x2x8xf32> to vector<2x2xf32>
    %400 = math.absf %399 : vector<2x2xf32>
    %cst_34 = arith.constant 1.000000e+00 : f32
    %401 = vector.broadcast %cst_34 : f32 to vector<2x2xf32>
    %402 = arith.maximumf %400, %401 : vector<2x2xf32>
    %403 = tpu.reciprocal %402 {approx = true} : vector<2x2xf32> -> vector<2x2xf32>
    %404 = vector.shape_cast %403 : vector<2x2xf32> to vector<2x2x1xf32>
    %405 = vector.broadcast %404 : vector<2x2x1xf32> to vector<2x2x8xf32>
    %406 = arith.mulf %397, %405 : vector<2x2x8xf32>
    %c0_35 = arith.constant 0 : index
    %c0_36 = arith.constant 0 : index
    %c0_37 = arith.constant 0 : index
    %c0_38 = arith.constant 0 : index
    %407 = vector.load %arg11[%c0_35, %c0_36, %c0_37, %c0_38] : memref<2x2x8x8xf32, #tpu.memory_space<vmem>>, vector<2x2x8x8xf32>
    tpu.vector_store %arg11[%c0_35, %c0_36, %c0_37, %c0_38], %386 {strides = array<i32>} : memref<2x2x8x8xf32, #tpu.memory_space<vmem>>, vector<2x2x8x8xf32>,
    %c0_39 = arith.constant 0 : index
    %c0_40 = arith.constant 0 : index
    %c0_41 = arith.constant 0 : index
    %408 = vector.load %arg12[%c0_39, %c0_40, %c0_41] : memref<2x2x8xf32, #tpu.memory_space<vmem>>, vector<2x2x8xf32>
    tpu.vector_store %arg12[%c0_39, %c0_40, %c0_41], %393 {strides = array<i32>} : memref<2x2x8xf32, #tpu.memory_space<vmem>>, vector<2x2x8xf32>,
    %c0_42 = arith.constant 0 : index
    %c0_43 = arith.constant 0 : index
    %409 = vector.load %arg13[%c0_42, %c0_43] : memref<2x2xf32, #tpu.memory_space<vmem>>, vector<2x2xf32>
    tpu.vector_store %arg13[%c0_42, %c0_43], %369 {strides = array<i32>} : memref<2x2xf32, #tpu.memory_space<vmem>>, vector<2x2xf32>,
    %410 = vector.shape_cast %63 : vector<2x2x8xf32> to vector<1x2x2x8xf32>
    %411 = vector.shape_cast %112 : vector<2x2x8xf32> to vector<1x2x2x8xf32>
    %412 = vector.shape_cast %161 : vector<2x2x8xf32> to vector<1x2x2x8xf32>
    %413 = vector.shape_cast %210 : vector<2x2x8xf32> to vector<1x2x2x8xf32>
    %414 = vector.shape_cast %259 : vector<2x2x8xf32> to vector<1x2x2x8xf32>
    %415 = vector.shape_cast %308 : vector<2x2x8xf32> to vector<1x2x2x8xf32>
    %416 = vector.shape_cast %357 : vector<2x2x8xf32> to vector<1x2x2x8xf32>
    %417 = vector.shape_cast %406 : vector<2x2x8xf32> to vector<1x2x2x8xf32>
    %418 = tpu.concatenate %410, %411, %412, %413, %414, %415, %416, %417 in 0 : vector<1x2x2x8xf32>, vector<1x2x2x8xf32>, vector<1x2x2x8xf32>, vector<1x2x2x8xf32>, vector<1x2x2x8xf32>, vector<1x2x2x8xf32>, vector<1x2x2x8xf32>, vector<1x2x2x8xf32> -> vector<8x2x2x8xf32>
    %419 = vector.extract_strided_slice %6 {offsets = [0, 0, 48], sizes = [8, 2, 16], strides = [1, 1, 1]} : vector<8x2x128xf32> to vector<8x2x16xf32>
    %420 = vector.shape_cast %419 : vector<8x2x16xf32> to vector<8x2x2x8xf32>
    %421 = arith.mulf %420, %418 : vector<8x2x2x8xf32>
    %cst_44 = arith.constant dense<0.000000e+00> : vector<8x2x2xf32>
    %422 = vector.multi_reduction <add>, %421, %cst_44 [3] : vector<8x2x2x8xf32> to vector<8x2x2xf32>
    %423 = vector.shape_cast %422 : vector<8x2x2xf32> to vector<8x2x2x1xf32>
    %cst_45 = arith.constant 8.000000e+00 : f32
    %424 = vector.broadcast %cst_45 : f32 to vector<8x2x2x1xf32>
    %425 = arith.divf %423, %424 : vector<8x2x2x1xf32>
    %426 = vector.broadcast %425 : vector<8x2x2x1xf32> to vector<8x2x2x8xf32>
    %427 = arith.subf %421, %426 : vector<8x2x2x8xf32>
    %428 = arith.mulf %427, %427 : vector<8x2x2x8xf32>
    %cst_46 = arith.constant dense<0.000000e+00> : vector<8x2x2xf32>
    %429 = vector.multi_reduction <add>, %428, %cst_46 [3] : vector<8x2x2x8xf32> to vector<8x2x2xf32>
    %430 = vector.shape_cast %429 : vector<8x2x2xf32> to vector<8x2x2x1xf32>
    %cst_47 = arith.constant 8.000000e+00 : f32
    %431 = vector.broadcast %cst_47 : f32 to vector<8x2x2x1xf32>
    %432 = arith.divf %430, %431 : vector<8x2x2x1xf32>
    %433 = vector.broadcast %425 : vector<8x2x2x1xf32> to vector<8x2x2x8xf32>
    %434 = arith.subf %421, %433 : vector<8x2x2x8xf32>
    %cst_48 = arith.constant 9.99999974E-6 : f32
    %435 = vector.broadcast %cst_48 : f32 to vector<8x2x2x1xf32>
    %436 = arith.addf %432, %435 : vector<8x2x2x1xf32>
    %437 = math.rsqrt %436 : vector<8x2x2x1xf32>
    %438 = vector.broadcast %437 : vector<8x2x2x1xf32> to vector<8x2x2x8xf32>
    %439 = arith.mulf %434, %438 : vector<8x2x2x8xf32>
    %440 = vector.shape_cast %439 : vector<8x2x2x8xf32> to vector<8x2x16xf32>
    %c0_49 = arith.constant 0 : index
    %c0_50 = arith.constant 0 : index
    %441 = vector.load %arg6[%c0_49, %c0_50] : memref<1x16xf32, #tpu.memory_space<vmem>>, vector<1x16xf32>
    %442 = vector.shape_cast %441 : vector<1x16xf32> to vector<1x1x16xf32>
    %443 = vector.broadcast %442 : vector<1x1x16xf32> to vector<8x2x16xf32>
    %444 = arith.mulf %440, %443 : vector<8x2x16xf32>
    %c0_51 = arith.constant 0 : index
    %c0_52 = arith.constant 0 : index
    %445 = vector.load %arg7[%c0_51, %c0_52] : memref<1x16xf32, #tpu.memory_space<vmem>>, vector<1x16xf32>
    %446 = vector.shape_cast %445 : vector<1x16xf32> to vector<1x1x16xf32>
    %447 = vector.broadcast %446 : vector<1x1x16xf32> to vector<8x2x16xf32>
    %448 = arith.addf %444, %447 : vector<8x2x16xf32>
    %449 = vector.extract_strided_slice %6 {offsets = [0, 0, 64], sizes = [8, 2, 16], strides = [1, 1, 1]} : vector<8x2x128xf32> to vector<8x2x16xf32>
    %450 = vector.extract_strided_slice %6 {offsets = [0, 0, 80], sizes = [8, 2, 16], strides = [1, 1, 1]} : vector<8x2x128xf32> to vector<8x2x16xf32>
    %451 = arith.addf %448, %449 : vector<8x2x16xf32>
    %452 = arith.mulf %451, %450 : vector<8x2x16xf32>
    %453 = vector.shape_cast %452 : vector<8x2x16xf32> to vector<16x16xf32>
    %454 = arith.truncf %453 : vector<16x16xf32> to vector<16x16xbf16>
    %c0_53 = arith.constant 0 : index
    %c0_54 = arith.constant 0 : index
    %455 = vector.load %arg8[%c0_53, %c0_54] : memref<16x16xbf16, #tpu.memory_space<vmem>>, vector<16x16xbf16>
    %cst_55 = arith.constant dense<0.000000e+00> : vector<16x16xf32>
    %456 = tpu.matmul %454, %455, %cst_55 {dimension_numbers = #tpu.dot_dimension_numbers<[1], [0], [0], [1], [0, 0, 1, 1], [], []>} : vector<16x16xbf16>, vector<16x16xbf16>, vector<16x16xf32> -> vector<16x16xf32>
    %c0_56 = arith.constant 0 : index
    %c0_57 = arith.constant 0 : index
    %457 = vector.load %arg9[%c0_56, %c0_57] : memref<1x16xf32, #tpu.memory_space<vmem>>, vector<1x16xf32>
    %458 = vector.broadcast %457 : vector<1x16xf32> to vector<16x16xf32>
    %459 = arith.addf %456, %458 : vector<16x16xf32>
    %460 = vector.shape_cast %459 : vector<16x16xf32> to vector<8x2x16xf32>
    %c0_58 = arith.constant 0 : index
    %c0_59 = arith.constant 0 : index
    %c0_60 = arith.constant 0 : index
    %461 = vector.load %arg1[%c0_58, %c0_59, %c0_60] : memref<8x2x16xf32, #tpu.memory_space<vmem>>, vector<8x2x16xf32>
    %462 = arith.addf %460, %461 : vector<8x2x16xf32>
    %c0_61 = arith.constant 0 : index
    %c0_62 = arith.constant 0 : index
    %c0_63 = arith.constant 0 : index
    %463 = vector.load %arg10[%c0_61, %c0_62, %c0_63] : memref<8x2x16xf32, #tpu.memory_space<vmem>>, vector<8x2x16xf32>
    tpu.vector_store %arg10[%c0_61, %c0_62, %c0_63], %462 {strides = array<i32>} : memref<8x2x16xf32, #tpu.memory_space<vmem>>, vector<8x2x16xf32>,
    return
  }
  func.func @transform_0(%arg0: i32) -> (i32, i32, i32) {
    %c0_i32 = arith.constant 0 : i32
    %c0_i32_0 = arith.constant 0 : i32
    %c0_i32_1 = arith.constant 0 : i32
    return %arg0, %c0_i32, %c0_i32_0 : i32, i32, i32
  }
  func.func @transform_1(%arg0: i32) -> (i32, i32, i32) {
    %c0_i32 = arith.constant 0 : i32
    %c0_i32_0 = arith.constant 0 : i32
    %c0_i32_1 = arith.constant 0 : i32
    return %arg0, %c0_i32, %c0_i32_0 : i32, i32, i32
  }
  func.func @transform_2(%arg0: i32) -> (i32, i32, i32, i32) {
    %c0_i32 = arith.constant 0 : i32
    %c0_i32_0 = arith.constant 0 : i32
    %c0_i32_1 = arith.constant 0 : i32
    %c0_i32_2 = arith.constant 0 : i32
    %c0_i32_3 = arith.constant 0 : i32
    return %c0_i32, %c0_i32_0, %c0_i32_1, %c0_i32_2 : i32, i32, i32, i32
  }
  func.func @transform_3(%arg0: i32) -> (i32, i32, i32) {
    %c0_i32 = arith.constant 0 : i32
    %c0_i32_0 = arith.constant 0 : i32
    %c0_i32_1 = arith.constant 0 : i32
    %c0_i32_2 = arith.constant 0 : i32
    return %c0_i32, %c0_i32_0, %c0_i32_1 : i32, i32, i32
  }
  func.func @transform_4(%arg0: i32) -> (i32, i32) {
    %c0_i32 = arith.constant 0 : i32
    %c0_i32_0 = arith.constant 0 : i32
    %c0_i32_1 = arith.constant 0 : i32
    return %c0_i32, %c0_i32_0 : i32, i32
  }
  func.func @transform_5(%arg0: i32) -> (i32, i32) {
    %c0_i32 = arith.constant 0 : i32
    %c0_i32_0 = arith.constant 0 : i32
    %c0_i32_1 = arith.constant 0 : i32
    return %c0_i32, %c0_i32_0 : i32, i32
  }
  func.func @transform_6(%arg0: i32) -> (i32, i32) {
    %c0_i32 = arith.constant 0 : i32
    %c0_i32_0 = arith.constant 0 : i32
    %c0_i32_1 = arith.constant 0 : i32
    return %c0_i32, %c0_i32_0 : i32, i32
  }
  func.func @transform_7(%arg0: i32) -> (i32, i32) {
    %c0_i32 = arith.constant 0 : i32
    %c0_i32_0 = arith.constant 0 : i32
    %c0_i32_1 = arith.constant 0 : i32
    return %c0_i32, %c0_i32_0 : i32, i32
  }
  func.func @transform_8(%arg0: i32) -> (i32, i32) {
    %c0_i32 = arith.constant 0 : i32
    %c0_i32_0 = arith.constant 0 : i32
    %c0_i32_1 = arith.constant 0 : i32
    return %c0_i32, %c0_i32_0 : i32, i32
  }
  func.func @transform_9(%arg0: i32) -> (i32, i32, i32) {
    %c0_i32 = arith.constant 0 : i32
    %c0_i32_0 = arith.constant 0 : i32
    %c0_i32_1 = arith.constant 0 : i32
    return %arg0, %c0_i32, %c0_i32_0 : i32, i32, i32
  }
  func.func @transform_10(%arg0: i32) -> (i32, i32, i32, i32) {
    %c0_i32 = arith.constant 0 : i32
    %c0_i32_0 = arith.constant 0 : i32
    %c0_i32_1 = arith.constant 0 : i32
    %c0_i32_2 = arith.constant 0 : i32
    %c0_i32_3 = arith.constant 0 : i32
    return %c0_i32, %c0_i32_0, %c0_i32_1, %c0_i32_2 : i32, i32, i32, i32
  }
  func.func @transform_11(%arg0: i32) -> (i32, i32, i32) {
    %c0_i32 = arith.constant 0 : i32
    %c0_i32_0 = arith.constant 0 : i32
    %c0_i32_1 = arith.constant 0 : i32
    %c0_i32_2 = arith.constant 0 : i32
    return %c0_i32, %c0_i32_0, %c0_i32_1 : i32, i32, i32
  }
  func.func @transform_12(%arg0: i32) -> (i32, i32) {
    %c0_i32 = arith.constant 0 : i32
    %c0_i32_0 = arith.constant 0 : i32
    %c0_i32_1 = arith.constant 0 : i32
    return %c0_i32, %c0_i32_0 : i32, i32
  }
}

</mosaic_0001>

<bundles_post_ra>
// kernel: xlstm_forward.5
= control target key start
LH: loop header
LB: loop body
LE: loop exit
PB: predicated region body
PF: predicated region fallthrough
CT: control target
= control target key end

     0   :  { %vm37_vm0 = vcmask 130048   ;;  %vm210_vm1 = vcmask 261120   ;;  %s593_s30 = smov 32   ;;  %vm450_vm2 = vcmask 392192   ;;  %vm455_vm3 = vcmask 523264   ;;  %s762_s0 = inlined_call_operand.vmem [shape: f32[32,16], index: 0, kind: input, shape index: {}]   ;;  %s763_s3 = inlined_call_operand.vmem [shape: bf16[16,48], index: 3, kind: input, shape index: {}]   ;;  %s764_s1 = inlined_call_operand.vmem [shape: f32[1,16], index: 1, kind: input, shape index: {}]   ;;  %s765_s2 = inlined_call_operand.vmem [shape: f32[1,16], index: 2, kind: input, shape index: {}]   ;;  %s766_s5 = inlined_call_operand.vmem [shape: bf16[32,64], index: 5, kind: input, shape index: {}]   ;;  %s767_s4 = inlined_call_operand.vmem [shape: f32[1,48], index: 4, kind: input, shape index: {}]   ;;  %s768_s7 = inlined_call_operand.vmem [shape: bf16[32,52], index: 7, kind: input, shape index: {}]   ;;  %s769_s6 = inlined_call_operand.vmem [shape: f32[1,64], index: 6, kind: input, shape index: {}]   ;;  %s770_s8 = inlined_call_operand.vmem [shape: f32[1,52], index: 8, kind: input, shape index: {}]   ;;  %s771_s9 = inlined_call_operand.vmem [shape: f32[32,128], index: 9, kind: output, shape index: {}]  }
   0x1   :  { %v33_v0 = vld [vmem:[%s762_s0] sm:$0xff]  ;;  %v35_v1 = vld [vmem:[%s762_s0 + $0x10] sm:$0xff]  ;;  %v34_v2 = vld [vmem:[%s762_s0 + $0x8] sm:$0xff]  ;;  %vm465_vm4 = vcmask 785408   ;;  %vm460_vm5 = vcmask 654336   ;;  %vm470_vm6 = vcmask 801792  }
   0x2   :  { %v38_v3 = vsel %vm37_vm0, %v33_v0, 0.0  ;;  %v44_v4 = vsel %vm37_vm0, %v35_v1, 0.0  ;;  %v36_v5 = vld [vmem:[%s762_s0 + $0x18] sm:$0xff]  ;;  %v41_v6 = vsel %vm37_vm0, %v34_v2, 0.0  ;;  %v547_v28 = vld [vmem:[%s763_s3] sm:$0xff]   ;;  %v548_v61 = vld [vmem:[%s766_s5 + $0x8] sm:$0xff]  }
   0x3   :  { %39 = vadd.xlane.f32.xlu0 %v38_v3  ;;  %45 = vadd.xlane.f32.xlu1 %v44_v4  ;;  %v47_v7 = vsel %vm37_vm0, %v36_v5, 0.0  ;;  %v488_v43 = vld [vmem:[%s764_s1] ss:$0 sm:$0xff]  ;;  %vm475_vm7 = vcmask 818176  }
   0x4   :  { %523 = vmatprep.subr.bf16.mxu0 %v547_v28  ;;  %v489_v48 = vld [vmem:[%s765_s2] ss:$0 sm:$0xff]  ;;  %529 = vmatprep.subr.bf16.mxu1 %v548_v61 }
   0x5   :  { %524 = vmatpush3.bf16.msra.mxu0 %v547_v28  ;;  %530 = vmatpush3.bf16.msra.mxu1 %v548_v61  ;;  %v549_v62 = vld [vmem:[%s766_s5] sm:$0xff]  }
   0x6   :  { %531 = vmatprep.subr.bf16.mxu1 %v549_v62  ;;  %v490_v63 = vld [vmem:[%s767_s4] ss:$0 sm:$0xff]  ;;  %s592_s4 = smov 48  }
   0x7   :  { %42 = vadd.xlane.f32.xlu0 %v41_v6  ;;  %48 = vadd.xlane.f32.xlu1 %v47_v7 }
   0x9   :  { %532 = vmatpush3.bf16.msra.mxu1 %v549_v62 }
  0x8c   :  { %v40_v8 = vpop.xlane.xlu0 %39  ;;  %v46_v9 = vpop.xlane.xlu1 %45 }
  0x8d   :  { %v51_v10 = vmul.f32 0.0625, %v40_v8  ;;  %v53_v11 = vmul.f32 0.0625, %v46_v9 }
  0x8f   :  { %v55_v12 = vsub.f32 %v33_v0, %v51_v10  ;;  %v57_v13 = vsub.f32 %v35_v1, %v53_v11 }
  0x90   :  { %v43_v14 = vpop.xlane.xlu0 %42  ;;  %v49_v15 = vpop.xlane.xlu1 %48 }
  0x91   :  { %v52_v16 = vmul.f32 0.0625, %v43_v14  ;;  %v54_v17 = vmul.f32 0.0625, %v49_v15  ;;  %v59_v18 = vmul.f32 %v55_v12, %v55_v12  ;;  %v61_v19 = vmul.f32 %v57_v13, %v57_v13 }
  0x93   :  { %v56_v20 = vsub.f32 %v34_v2, %v52_v16  ;;  %v58_v21 = vsub.f32 %v36_v5, %v54_v17  ;;  %v63_v22 = vsel %vm37_vm0, %v59_v18, 0.0  ;;  %v69_v23 = vsel %vm37_vm0, %v61_v19, 0.0 }
  0x94   :  { %64 = vadd.xlane.f32.xlu0 %v63_v22 }
  0x95   :  { %v60_v24 = vmul.f32 %v56_v20, %v56_v20  ;;  %v62_v25 = vmul.f32 %v58_v21, %v58_v21 }
  0x97   :  { %v66_v26 = vsel %vm37_vm0, %v60_v24, 0.0  ;;  %v72_v27 = vsel %vm37_vm0, %v62_v25, 0.0 }
  0x98   :  { %70 = vadd.xlane.f32.xlu0 %v69_v23  ;;  %67 = vadd.xlane.f32.xlu1 %v66_v26 }
  0x9c   :  { %73 = vadd.xlane.f32.xlu1 %v72_v27 }
 0x11d   :  { %v65_v29 = vpop.xlane.xlu0 %64 }
 0x11e   :  { %v75_v30 = vmul.f32 0.0625, %v65_v29 }
 0x120   :  { %v79_v31 = vadd.f32 1e-05, %v75_v30  ;;  %v550_v30 = vld [vmem:[%s768_s7 + $0x8] sm:$0xff]  }
 0x121   :  { %v68_v32 = vpop.xlane.xlu1 %67  ;;  %v71_v33 = vpop.xlane.xlu0 %70  ;;  %537 = vmatprep.subr.bf16.mxu0 %v550_v30 }
 0x122   :  { %552 = vrsqrt.f32 %v79_v31  ;;  %v76_v34 = vmul.f32 0.0625, %v68_v32  ;;  %v77_v35 = vmul.f32 0.0625, %v71_v33  ;;  %v551_v31 = vld [vmem:[%s768_s7] sm:$0xff]  }
 0x123   :  { %v494_v32 = vld [vmem:[%s769_s6] ss:$0 sm:$0xff] }
 0x124   :  { %v80_v36 = vadd.f32 1e-05, %v76_v34  ;;  %v81_v37 = vadd.f32 1e-05, %v77_v35 }
 0x125   :  { %v74_v38 = vpop.xlane.xlu1 %73 }
 0x126   :  { %554 = vrsqrt.f32 %v80_v36  ;;  %v78_v39 = vmul.f32 0.0625, %v74_v38 }
 0x127   :  { %556 = vrsqrt.f32 %v81_v37 }
 0x128   :  { %v82_v40 = vadd.f32 1e-05, %v78_v39 }
 0x12a   :  { %558 = vrsqrt.f32 %v82_v40 }
 0x12f   :  { %v553_v41 = vpop.eup %552 }
 0x130   :  { %v87_v42 = vmul.f32 %v553_v41, %v55_v12 }
 0x132   :  { %v98_v47 = vmul.f32 %v488_v43, %v87_v42 }
 0x133   :  { %v555_v44 = vpop.eup %554 }
 0x134   :  { %v557_v45 = vpop.eup %556  ;;  %v88_v46 = vmul.f32 %v555_v44, %v56_v20  ;;  %v109_v52 = vadd.f32 %v489_v48, %v98_v47 }
 0x135   :  { %v89_v49 = vmul.f32 %v557_v45, %v57_v13 }
 0x136   :  { %v99_v50 = vmul.f32 %v488_v43, %v88_v46 }
 0x137   :  { %v559_v51 = vpop.eup %558  ;;  %v100_v55 = vmul.f32 %v488_v43, %v89_v49 }
 0x138   :  { %v110_v53 = vadd.f32 %v489_v48, %v99_v50  ;;  %v90_v54 = vmul.f32 %v559_v51, %v58_v21 }
 0x139   :  { %v111_v58 = vadd.f32 %v489_v48, %v100_v55 }
 0x13a   :  { %v113_v56 = vpack.c.bf16 %v110_v53, %v109_v52  ;;  %v101_v57 = vmul.f32 %v488_v43, %v90_v54 }
 0x13c   :  { %525 = vmatprep.mubr.msk.bf16.mxu0 %vm37_vm0, %v113_v56  ;;  %v112_v59 = vadd.f32 %v489_v48, %v101_v57 }
 0x13e   :  { %v114_v60 = vpack.c.bf16 %v112_v59, %v111_v58 }
 0x140   :  { %526 = vmatmul.mubr.msk.bf16.vlgmr.msra.gmra.mxu0 %vm37_vm0, %v114_v60 }
 0x141   :  { %538 = vmatpush3.bf16.msra.mxu0 %v550_v30 }
 0x142   :  { %539 = vmatprep.subr.bf16.mxu0 %v551_v31 }
 0x145   :  { %540 = vmatpush3.bf16.msra.mxu0 %v551_v31 }
 0x200   :  { %v527_v0 = vpop.f32.mrf.mxu0 }
 0x201   :  { %v179_v1 = vadd.f32 %v527_v0, %v490_v63 }
 0x202   :  { %v170_v2 = vpop.f32.mrf.mxu0 }
 0x203   :  { %v510_v3 = vmul.f32 -1.442695, %v179_v1  ;;  %v171_v4 = vadd.f32 %v490_v63, %v170_v2 }
 0x204   :  { %v528_v5 = vpop.f32.mrf.mxu0 }
 0x205   :  { %560 = vpow2.f32 %v510_v3  ;;  %v508_v6 = vmul.f32 -1.442695, %v171_v4  ;;  %v182_v7 = vadd.f32 %v528_v5, %v490_v63 }
 0x206   :  { %v173_v8 = vpop.f32.mrf.mxu0 }
 0x207   :  { %562 = vpow2.f32 %v508_v6  ;;  %v511_v9 = vmul.f32 -1.442695, %v182_v7  ;;  %v174_v10 = vadd.f32 %v490_v63, %v173_v8  ;;  %v186_v13 = vpack.c.bf16 %v182_v7, %v179_v1  ;;  %v503_v63 = vld [vmem:[%s770_s8] ss:$0 sm:$0xff] }
 0x209   :  { %564 = vpow2.f32 %v511_v9  ;;  %v509_v11 = vmul.f32 -1.442695, %v174_v10  ;;  %v185_v12 = vpack.c.bf16 %v174_v10, %v171_v4 }
 0x20b   :  { %566 = vpow2.f32 %v509_v11  ;;  %533 = vmatprep.mubr.msk.bf16.mxu1 %vm210_vm1, %v185_v12 }
 0x20c   :  { %534 = vmatmul.mubr.msk.bf16.vlgmr.msra.gmra.mxu1 %vm210_vm1, %v186_v13 }
 0x212   :  { %v561_v14 = vpop.eup %560 }
 0x213   :  { %v388_v15 = vadd.f32 1.0, %v561_v14 }
 0x214   :  { %v563_v16 = vpop.eup %562 }
 0x215   :  { %568 = vrcp.f32 %v388_v15  ;;  %v386_v17 = vadd.f32 1.0, %v563_v16 }
 0x216   :  { %v565_v18 = vpop.eup %564 }
 0x217   :  { %570 = vrcp.f32 %v386_v17  ;;  %v389_v19 = vadd.f32 1.0, %v565_v18 }
 0x218   :  { %v567_v20 = vpop.eup %566 }
 0x219   :  { %572 = vrcp.f32 %v389_v19  ;;  %v387_v21 = vadd.f32 1.0, %v567_v20 }
 0x21b   :  { %574 = vrcp.f32 %v387_v21 }
 0x222   :  { %v569_v22 = vpop.eup %568 }
 0x223   :  { %v400_v23 = vmul.f32 %v569_v22, %v179_v1 }
 0x224   :  { %v571_v24 = vpop.eup %570 }
 0x225   :  { %426 = vrot.lane.b32.xlu0 %v400_v23, %s592_s4  ;;  %v398_v27 = vmul.f32 %v571_v24, %v171_v4 }
 0x226   :  { %v573_v25 = vpop.eup %572 }
 0x227   :  { %v401_v26 = vmul.f32 %v573_v25, %v182_v7 }
 0x228   :  { %v575_v28 = vpop.eup %574 }
 0x229   :  { %428 = vrot.lane.b32.xlu1 %v401_v26, %s592_s4  ;;  %422 = vrot.lane.b32.xlu0 %v398_v27, %s592_s4  ;;  %v399_v29 = vmul.f32 %v575_v28, %v174_v10 }
 0x22d   :  { %424 = vrot.lane.b32.xlu1 %v399_v29, %s592_s4 }
 0x297   :  { %v427_v9 = vpop.permute.xlu0 %426 }
 0x29b   :  { %v429_v8 = vpop.permute.xlu1 %428  ;;  %v423_v11 = vpop.permute.xlu0 %422 }
 0x29f   :  { %v425_v10 = vpop.permute.xlu1 %424 }
 0x2cc   :  { %v535_v33 = vpop.f32.mrf.mxu1 }
 0x2cd   :  { %v699_v34 = vadd.f32 %v535_v33, %v494_v32 }
 0x2ce   :  { %v251_v35 = vpop.f32.mrf.mxu1 }
 0x2cf   :  { %v501_v36 = vmul.f32 -1.442695, %v699_v34  ;;  %v252_v37 = vadd.f32 %v494_v32, %v251_v35 }
 0x2d0   :  { %v536_v38 = vpop.f32.mrf.mxu1 }
 0x2d1   :  { %v499_v39 = vmul.f32 -1.442695, %v252_v37  ;;  %v702_v40 = vadd.f32 %v536_v38, %v494_v32  ;;  %576 = vpow2.f32 %v501_v36 }
 0x2d2   :  { %v254_v41 = vpop.f32.mrf.mxu1 }
 0x2d3   :  { %578 = vpow2.f32 %v499_v39  ;;  %v502_v42 = vmul.f32 -1.442695, %v702_v40  ;;  %v255_v43 = vadd.f32 %v494_v32, %v254_v41 }
 0x2d5   :  { %580 = vpow2.f32 %v502_v42  ;;  %v500_v44 = vmul.f32 -1.442695, %v255_v43 }
 0x2d7   :  { %582 = vpow2.f32 %v500_v44 }
 0x2de   :  { %v577_v45 = vpop.eup %576 }
 0x2df   :  { %v280_v49 = vadd.f32 1.0, %v577_v45 }
 0x2e0   :  { %v579_v46 = vpop.eup %578 }
 0x2e1   :  { %v278_v47 = vadd.f32 1.0, %v579_v46 }
 0x2e2   :  { %v581_v48 = vpop.eup %580 }
 0x2e3   :  { %v281_v50 = vadd.f32 1.0, %v581_v48  ;;  %584 = vrcp.f32 %v278_v47 }
 0x2e4   :  { %v583_v51 = vpop.eup %582 }
 0x2e5   :  { %586 = vrcp.f32 %v281_v50  ;;  %v279_v52 = vadd.f32 1.0, %v583_v51 }
 0x2e6   :  { %588 = vrcp.f32 %v280_v49 }
 0x2e7   :  { %590 = vrcp.f32 %v279_v52 }
 0x2f0   :  { %v585_v53 = vpop.eup %584 }
 0x2f1   :  { %v290_v58 = vmul.f32 %v585_v53, %v252_v37 }
 0x2f2   :  { %v705_v54 = vpop.eup %586 }
 0x2f3   :  { %v589_v55 = vpop.eup %588  ;;  %v293_v57 = vmul.f32 %v705_v54, %v702_v40 }
 0x2f4   :  { %v591_v56 = vpop.eup %590  ;;  %v292_v60 = vmul.f32 %v589_v55, %v699_v34 }
 0x2f5   :  { %v291_v59 = vmul.f32 %v591_v56, %v255_v43 }
 0x2f6   :  { %v295_v62 = vpack.c.bf16 %v293_v57, %v292_v60 }
 0x2f7   :  { %v294_v61 = vpack.c.bf16 %v291_v59, %v290_v58 }
 0x2f9   :  { %541 = vmatprep.mubr.msk.bf16.mxu0 %vm210_vm1, %v294_v61 }
 0x2fa   :  { %542 = vmatmul.mubr.msk.bf16.vlgmr.msra.gmra.mxu0 %vm210_vm1, %v295_v62 }
 0x3ba   :  { %v543_v0 = vpop.f32.mrf.mxu0 }
 0x3bb   :  { %v368_v1 = vadd.f32 %v543_v0, %v503_v63 }
 0x3bc   :  { %v359_v2 = vpop.f32.mrf.mxu0 }
 0x3bd   :  { %v360_v3 = vadd.f32 %v503_v63, %v359_v2  ;;  %410 = vrot.lane.b32.xlu1 %v368_v1, %s593_s30  ;;  %v448_v16 = vsel %vm210_vm1, %v368_v1, %v699_v34 }
 0x3be   :  { %v544_v4 = vpop.f32.mrf.mxu0  ;;  %v453_v20 = vsel %vm450_vm2, %v448_v16, %v589_v55 }
 0x3bf   :  { %v371_v5 = vadd.f32 %v544_v4, %v503_v63  ;;  %406 = vrot.lane.b32.xlu0 %v360_v3, %s593_s30  ;;  %v446_v12 = vsel %vm210_vm1, %v360_v3, %v252_v37 }
 0x3c0   :  { %v362_v6 = vpop.f32.mrf.mxu0  ;;  %v451_v15 = vsel %vm450_vm2, %v446_v12, %v585_v53 }
 0x3c1   :  { %412 = vrot.lane.b32.xlu1 %v371_v5, %s593_s30  ;;  %v363_v7 = vadd.f32 %v503_v63, %v362_v6  ;;  %v449_v28 = vsel %vm210_vm1, %v371_v5, %v702_v40 }
 0x3c2   :  { %v454_v34 = vsel %vm450_vm2, %v449_v28, %v705_v54 }
 0x3c3   :  { %434 = vrot.lane.b32.xlu0 %v360_v3, %s592_s4  ;;  %v447_v19 = vsel %vm210_vm1, %v363_v7, %v255_v43 }
 0x3c4   :  { %v452_v27 = vsel %vm450_vm2, %v447_v19, %v591_v56 }
 0x3c5   :  { %408 = vrot.lane.b32.xlu1 %v363_v7, %s593_s30 }
 0x3c7   :  { %438 = vrot.lane.b32.xlu0 %v368_v1, %s592_s4 }
 0x3c9   :  { %436 = vrot.lane.b32.xlu1 %v363_v7, %s592_s4 }
 0x3cd   :  { %440 = vrot.lane.b32.xlu1 %v371_v5, %s592_s4 }
 0x42f   :  { %v411_v13 = vpop.permute.xlu1 %410 }
 0x430   :  { %v458_v23 = vsel %vm455_vm3, %v453_v20, %v411_v13 }
 0x431   :  { %v407_v14 = vpop.permute.xlu0 %406  ;;  %v463_v31 = vsel %vm460_vm5, %v458_v23, %v427_v9 }
 0x432   :  { %v456_v17 = vsel %vm455_vm3, %v451_v15, %v407_v14 }
 0x433   :  { %v413_v18 = vpop.permute.xlu1 %412  ;;  %v461_v22 = vsel %vm460_vm5, %v456_v17, %v423_v11 }
 0x434   :  { %v459_v38 = vsel %vm455_vm3, %v454_v34, %v413_v18 }
 0x435   :  { %v435_v21 = vpop.permute.xlu0 %434  ;;  %v464_v43 = vsel %vm460_vm5, %v459_v38, %v429_v8 }
 0x436   :  { %v466_v24 = vsel %vm465_vm4, %v461_v22, %v435_v21 }
 0x437   :  { %v471_v25 = vsel %vm470_vm6, %v466_v24, %v435_v21  ;;  %v409_v26 = vpop.permute.xlu1 %408 }
 0x438   :  { %v476_v29 = vsel %vm475_vm7, %v471_v25, 0.0  ;;  %v457_v30 = vsel %vm455_vm3, %v452_v27, %v409_v26 }
 0x439   :  { %480 = vst [vmem:[%s771_s9] sm:$0xff] %v476_v29  ;;  %v439_v32 = vpop.permute.xlu0 %438  ;;  %v462_v37 = vsel %vm460_vm5, %v457_v30, %v425_v10 }
 0x43a   :  { %v468_v33 = vsel %vm465_vm4, %v463_v31, %v439_v32 }
 0x43b   :  { %v473_v35 = vsel %vm470_vm6, %v468_v33, %v439_v32  ;;  %v437_v36 = vpop.permute.xlu1 %436 }
 0x43c   :  { %v478_v39 = vsel %vm475_vm7, %v473_v35, 0.0  ;;  %v467_v40 = vsel %vm465_vm4, %v462_v37, %v437_v36 }
 0x43d   :  { %482 = vst [vmem:[%s771_s9 + $0x10] sm:$0xff] %v478_v39  ;;  %v472_v41 = vsel %vm470_vm6, %v467_v40, %v437_v36 }
 0x43e   :  { %v477_v42 = vsel %vm475_vm7, %v472_v41, 0.0 }
 0x43f   :  { %481 = vst [vmem:[%s771_s9 + $0x8] sm:$0xff] %v477_v42  ;;  %v441_v44 = vpop.permute.xlu1 %440 }
 0x440   :  { %v469_v45 = vsel %vm465_vm4, %v464_v43, %v441_v44 }
 0x441   :  { %v474_v46 = vsel %vm470_vm6, %v469_v45, %v441_v44 }
 0x442   :  { %v479_v47 = vsel %vm475_vm7, %v474_v46, 0.0 }
 0x443   :  { %483 = vst [vmem:[%s771_s9 + $0x18] sm:$0xff] %v479_v47 }

// kernel: xlstm_forward.9
= control target key start
LH: loop header
LB: loop body
LE: loop exit
PB: predicated region body
PF: predicated region fallthrough
CT: control target
= control target key end

     0   :  { %vm37_vm0 = vcmask 130048   ;;  %s269_s0 = inlined_call_operand.vmem [shape: f32[32,16], index: 0, kind: input, shape index: {}]   ;;  %s270_s1 = inlined_call_operand.vmem [shape: bf16[16,32], index: 1, kind: input, shape index: {}]   ;;  %s271_s2 = inlined_call_operand.vmem [shape: f32[1,32], index: 2, kind: input, shape index: {}]   ;;  %s272_s3 = inlined_call_operand.hbm [shape: f32[32,32], index: 3, kind: output, shape index: {}]  }
   0x1   :  { %v174_v0 = vld [vmem:[%s270_s1] sm:$0xff]   ;;  %v17_v2 = vld [vmem:[%s269_s0 + $0x8] sm:$0xff]  ;;  %v18_v3 = vld [vmem:[%s269_s0 + $0x10] sm:$0xff] }
   0x2   :  { %v16_v1 = vld [vmem:[%s269_s0] sm:$0xff]  ;;  %165 = vmatprep.subr.bf16.mxu0 %v174_v0  ;;  %v19_v5 = vld [vmem:[%s269_s0 + $0x18] sm:$0xff] }
   0x3   :  { %v20_v4 = vpack.c.bf16 %v17_v2, %v16_v1 }
   0x4   :  { %8 = vsyncpa [#allocation3], 0  ;;  %166 = vmatpush3.bf16.msra.mxu0 %v174_v0  ;;  %v21_v6 = vpack.c.bf16 %v19_v5, %v18_v3  ;;  %v158_v7 = vld [vmem:[%s271_s2] ss:$0 sm:$0xff]  ;;  %vm93_vm1 = vcmask 261120   ;;  %s213_s0 = smov [#allocation2]  }
   0x5   :  { %167 = vmatprep.mubr.msk.bf16.mxu0 %vm37_vm0, %v20_v4  ;;  %s147_s2 = sshll.u32 %s213_s0, 4  ;;  %s148_s2 = int_to_ptr.vmem [resolvable:$true] %s147_s2 }
   0x6   :  { %s191_s23 = scalar_lea.vmem %s148_s2, 512  ;;  %p196_p1 = scmp.lt.s32.totalorder %s148_s2, %s148_s2 }
   0x7   :  { %168 = vmatmul.mubr.msk.bf16.vlgmr.msra.gmra.mxu0 %vm37_vm0, %v21_v6  ;;  %p192_p0 = scmp.ne.s32.totalorder %s148_s2, %s191_s23  ;;  %p197_p2 = scmp.lt.s32.totalorder %s191_s23, %s191_s23 }
   0x9   :  { %p198_p3 = por %p197_p2, %p196_p1 }
   0xb   :  { %p199_p4 = pnand %p198_p3, %p192_p0 }
  0xc7   :  { %v169_v8 = vpop.f32.mrf.mxu0 }
  0xc8   :  { %v87_v9 = vadd.f32 %v169_v8, %v158_v7 }
  0xc9   :  { %v78_v10 = vpop.f32.mrf.mxu0 }
  0xca   :  { %v79_v11 = vadd.f32 %v158_v7, %v78_v10  ;;  %v100_v12 = vsel %vm93_vm1, %v87_v9, -inf }
  0xcb   :  { %101 = vmax.xlane.f32.xlu1 %v100_v12  ;;  %v170_v13 = vpop.f32.mrf.mxu0 }
  0xcc   :  { %v90_v14 = vadd.f32 %v170_v13, %v158_v7  ;;  %v94_v15 = vsel %vm93_vm1, %v79_v11, -inf }
  0xcd   :  { %v81_v16 = vpop.f32.mrf.mxu0  ;;  %95 = vmax.xlane.f32.xlu0 %v94_v15 }
  0xce   :  { %v82_v17 = vadd.f32 %v158_v7, %v81_v16  ;;  %v103_v18 = vsel %vm93_vm1, %v90_v14, -inf }
  0xcf   :  { %104 = vmax.xlane.f32.xlu1 %v103_v18 }
  0xd0   :  { %v97_v19 = vsel %vm93_vm1, %v82_v17, -inf }
  0xd1   :  { %98 = vmax.xlane.f32.xlu0 %v97_v19 }
 0x154   :  { %v102_v20 = vpop.xlane.xlu1 %101 }
 0x155   :  { %v108_v21 = vsub.f32 %v87_v9, %v102_v20 }
 0x156   :  { %v96_v22 = vpop.xlane.xlu0 %95 }
 0x157   :  { %v106_v23 = vsub.f32 %v79_v11, %v96_v22  ;;  %v114_v25 = vmul.f32 1.442695, %v108_v21 }
 0x158   :  { %v105_v24 = vpop.xlane.xlu1 %104 }
 0x159   :  { %v110_v26 = vmul.f32 1.442695, %v106_v23  ;;  %v109_v27 = vsub.f32 %v90_v14, %v105_v24 }
 0x15a   :  { %v99_v28 = vpop.xlane.xlu0 %98 }
 0x15b   :  { %175 = vpow2.f32 %v110_v26  ;;  %v107_v29 = vsub.f32 %v82_v17, %v99_v28  ;;  %v116_v30 = vmul.f32 1.442695, %v109_v27 }
 0x15c   :  { %177 = vpow2.f32 %v114_v25 }
 0x15d   :  { %v112_v31 = vmul.f32 1.442695, %v107_v29 }
 0x15f   :  { %179 = vpow2.f32 %v112_v31 }
 0x160   :  { %181 = vpow2.f32 %v116_v30 }
 0x168   :  { %v176_v32 = vpop.eup %175 }
 0x169   :  { %v118_v33 = vsel %vm93_vm1, %v176_v32, 0.0  ;;  %v178_v34 = vpop.eup %177 }
 0x16a   :  { %119 = vadd.xlane.f32.xlu0 %v118_v33  ;;  %v124_v36 = vsel %vm93_vm1, %v178_v34, 0.0 }
 0x16c   :  { %v180_v35 = vpop.eup %179 }
 0x16d   :  { %v121_v37 = vsel %vm93_vm1, %v180_v35, 0.0  ;;  %v182_v38 = vpop.eup %181 }
 0x16e   :  { %125 = vadd.xlane.f32.xlu0 %v124_v36  ;;  %122 = vadd.xlane.f32.xlu1 %v121_v37  ;;  %v127_v39 = vsel %vm93_vm1, %v182_v38, 0.0 }
 0x172   :  { %128 = vadd.xlane.f32.xlu1 %v127_v39 }
 0x1f3   :  { %v120_v40 = vpop.xlane.xlu0 %119 }
 0x1f4   :  { %183 = vrcp.f32 %v120_v40 }
 0x1f7   :  { %v123_v41 = vpop.xlane.xlu1 %122  ;;  %v126_v42 = vpop.xlane.xlu0 %125 }
 0x1f8   :  { %185 = vrcp.f32 %v123_v41 }
 0x1f9   :  { %187 = vrcp.f32 %v126_v42 }
 0x1fb   :  { %v129_v43 = vpop.xlane.xlu1 %128 }
 0x1fc   :  { %189 = vrcp.f32 %v129_v43 }
 0x201   :  { %v184_v44 = vpop.eup %183 }
 0x202   :  { %v131_v45 = vmul.f32 %v184_v44, %v176_v32 }
 0x204   :  { %138 = vst.msk [vmem:[#allocation2] sm:$0xff] %vm93_vm1, %v131_v45 }
 0x205   :  { %v186_v46 = vpop.eup %185 }
 0x206   :  { %v188_v47 = vpop.eup %187  ;;  %v133_v48 = vmul.f32 %v186_v46, %v180_v35 }
 0x207   :  { %v135_v49 = vmul.f32 %v188_v47, %v178_v34 }
 0x208   :  { %139 = vst.msk [vmem:[#allocation2 + $0x8] sm:$0xff] %vm93_vm1, %v133_v48 }
 0x209   :  { %v190_v50 = vpop.eup %189  ;;  %140 = vst.msk [vmem:[#allocation2 + $0x10] sm:$0xff] %vm93_vm1, %v135_v49 }
 0x20a   :  { %v137_v51 = vmul.f32 %v190_v50, %v182_v38 }
 0x20c   :  { %141 = vst.msk [vmem:[#allocation2 + $0x18] sm:$0xff] %vm93_vm1, %v137_v51 }
 0x20d   :  { %202 = shalt.err (!%p199_p4)
}
 0x20e   :  { %s214_s24 = smov 128   ;;  %s215_s25 = smov 8  }
 0x20f   :  { %153 = dma.vmem_to_hbm [thread:$0]  %s148_s2, 512, %s272_s3, [#allocation3], %s214_s24, %s214_s24, %s215_s25  }
 0x210   :  { %211 = dma.done.wait [#allocation3], 512  }
 0x211   :  { %212 = vsyncadd [#allocation3], 4294966784 }
 0x212   :  { %157 = vsyncpa [#allocation3], 1 }

// kernel: xlstm_forward.6
= control target key start
LH: loop header
LB: loop body
LE: loop exit
PB: predicated region body
PF: predicated region fallthrough
CT: control target
= control target key end

     0   :  { %18 = vsyncpa [#allocation3], 0  ;;  %s7109_s0 = inlined_call_operand.vmem [shape: f32[16,2,16], index: 0, kind: input, shape index: {}]   ;;  %s7110_s1 = inlined_call_operand.vmem [shape: f32[16,2,128], index: 1, kind: input, shape index: {}]   ;;  %s7111_s2 = inlined_call_operand.vmem [shape: f32[2,2,8,8], index: 2, kind: input, shape index: {}]   ;;  %s7112_s3 = inlined_call_operand.vmem [shape: f32[2,2,8], index: 3, kind: input, shape index: {}]   ;;  %s7113_s4 = inlined_call_operand.vmem [shape: f32[2,2], index: 4, kind: input, shape index: {}]   ;;  %s7114_s5 = inlined_call_operand.vmem [shape: f32[1,16], index: 5, kind: input, shape index: {}]   ;;  %s7115_s6 = inlined_call_operand.vmem [shape: f32[1,16], index: 6, kind: input, shape index: {}]   ;;  %s7116_s7 = inlined_call_operand.vmem [shape: bf16[16,16], index: 7, kind: input, shape index: {}]   ;;  %s7117_s8 = inlined_call_operand.vmem [shape: f32[1,16], index: 8, kind: input, shape index: {}]   ;;  %s7118_s9 = inlined_call_operand.vmem [shape: f32[16,2,16], index: 9, kind: output, shape index: {0}]   ;;  %s7119_s10 = inlined_call_operand.hbm [shape: f32[2,2,8,8], index: 10, kind: output, shape index: {1}]   ;;  %s7120_s11 = inlined_call_operand.hbm [shape: f32[2,2,8], index: 11, kind: output, shape index: {2}]   ;;  %s7121_s12 = inlined_call_operand.hbm [shape: f32[2,2], index: 12, kind: output, shape index: {3}]  }
   0x1   :  { %19 = vsyncpa [#allocation5], 0  ;;  %s4953_s21 = smov 0  }
   0x2 LB: > { %s4959_s22 = sadd.s32 4294967295, %s4864_s21   ;;  %p4590_p0 = scmp.ge.s32.totalorder %s4864_s21, 1  ;;  %s4864_s21 = sphi %s4953_s21, %s25_s21  }
   0x3   : > { %p368_p1 = scmp.lt.s32.totalorder %s4864_s21, 3 }
   0x5   : > { %p369_p2 = pnand %p4590_p0, %p368_p1 }
   0x7   : > { %372 = sbr.rel (%p369_p2) target bundleno = 1529 (0x5f9), region = 56 }
   0xc   : > { %s4591_s23 = sshll.u32 %s4959_s22, 3  ;;  %p4597_p4 = scmp.ne.s32.totalorder %s4959_s22, 0 }
   0xd   : > { %p416_p3 = scmp.lt.s32.totalorder %s4591_s23, 15 }
   0xe   : > { %437 = sbr.rel (%p4597_p4) target bundleno = 24 (0x18), region = 60 }
   0xf   : > { %s7472_s23 = smov (!%p416_p3, %s4591_s23), 15 }
  0x10   : > { %s4592_s24 = sshll.u32 %s7472_s23, 1 }
  0x11   : > { %s4967_s27 = scalar_lea.vmem %s7109_s0, %s4592_s24  ;;  %s4972_s30 = scalar_lea.vmem %s7110_s1, %s4592_s24 }
  0x12   : > { %s4977_s15 = scalar_lea.vmem %s7118_s9, %s4592_s24 }
  0x13   : > { %v438_v0 = vld [vmem:[%s7111_s2] sm:$0xff]  ;;  %vm442_vm0 = vcmask 64512   ;;  %v439_v1 = vld [vmem:[%s7111_s2 + $0x8] sm:$0xff]  ;;  %v440_v2 = vld [vmem:[%s7111_s2 + $0x10] sm:$0xff]  ;;  %vm449_vm1 = vcmask 58368   ;;  %vm453_vm2 = vcmask 9216  }
  0x14   : > { %443 = vst.msk [vmem:[#allocation2] sm:$0xff] %vm442_vm0, %v438_v0  ;;  %444 = vst.msk [vmem:[#allocation2 + $0x8] sm:$0xff] %vm442_vm0, %v439_v1  ;;  %v441_v3 = vld [vmem:[%s7111_s2 + $0x18] sm:$0xff]  ;;  %v447_v4 = vld [vmem:[%s7112_s3] sm:$0x3] }
  0x15   : > { %445 = vst.msk [vmem:[#allocation2 + $0x10] sm:$0xff] %vm442_vm0, %v440_v2  ;;  %v448_v5 = vld [vmem:[%s7112_s3 + $0x2] sm:$0x3]  ;;  %446 = vst.msk [vmem:[#allocation2 + $0x18] sm:$0xff] %vm442_vm0, %v441_v3  ;;  %v452_v6 = vld [vmem:[%s7113_s4] sm:$0x3] }
  0x16   : > { %450 = vst.msk [vmem:[#allocation4] sm:$0x3] %vm449_vm1, %v447_v4  ;;  %451 = vst.msk [vmem:[#allocation4 + $0x2] sm:$0x3] %vm449_vm1, %v448_v5 }
  0x17   : > { %454 = vst.msk [vmem:[#allocation6] sm:$0x3] %vm453_vm2, %v452_v6 }
  0x18 PF: > { %v5002_v7 = vld [vmem:[%s4972_s30] sm:$0x3]  ;;  %s4866_s17 = smov 2   ;;  %s4867_s18 = smov 98   ;;  %v5007_v9 = vld [vmem:[%s4972_s30 + $0x2] sm:$0x3]  ;;  %v7122_v52 = vlaneseq }
  0x19   : > { %819 = vrot.lane.b32.xlu1 %v5002_v7, %s4866_s17  ;;  %s4868_s19 = smov 120   ;;  %v5012_v10 = vld [vmem:[%s4972_s30 + $0x4] sm:$0x3]  ;;  %v7124_v11 = vmov 0.0   ;;  %v5019_v12 = vld [vmem:[%s4972_s30 + $0x6] sm:$0x3] }
  0x1a   : > { %4613 = vmatprep.subr.bf16.mxu0 %v7124_v11  ;;  %v5025_v13 = vld [vmem:[%s4972_s30 + $0x8] sm:$0x3]  ;;  %v5031_v14 = vld [vmem:[%s4972_s30 + $0xa] sm:$0x3]  ;;  %v5037_v15 = vld [vmem:[%s4972_s30 + $0xc] sm:$0x3] }
  0x1b   : > { %v5043_v16 = vld [vmem:[%s4972_s30 + $0xe] sm:$0x3]  ;;  %s4870_s20 = smov 112   ;;  %s4871_s23 = smov 96   ;;  %v5155_v57 = vshrl.u32 %v7122_v52, 7  ;;  %vm1106_vm3 = vcmask 58368  }
  0x1c   : > { %s4872_s24 = smov 126   ;;  %vm1091_vm4 = vcmask 64512   ;;  %s4876_s25 = smov 80   ;;  %vm3809_vm5 = vcmask 1041409   ;;  %vm4881_vm6 = vmmov 0   ;;  %vm3429_vm7 = vcmask 9216  }
  0x1d   : > { %480 = vrot.lane.b32.xlu1 %v5007_v9, %s4868_s19  ;;  %7206 = vst [vmem:[#allocation17_spill] sm:$0xff] %v5155_v57  ;;  %v5162_v59 = vsub.s32 0, %v5155_v57  ;;  %s4877_s26 = smov 64   ;;  %s4878_s28 = smov 48   ;;  %vm4333_vm8 = vcmask 130048  }
  0x1e   : > { %v461_v8 = vld [vmem:[#allocation6] sm:$0x3]  ;;  %s4879_s29 = smov 8   ;;  %s4880_s13 = smov 30  }
  0x1f   : > { %815 = vrot.lane.b32.xlu0 %v461_v8, %s4867_s18  ;;  %p4631_p5 = scmp.eq.s32.totalorder %s4959_s22, 1 }
  0x21   : > { %482 = vrot.lane.b32.xlu1 %v5012_v10, %s4868_s19 }
  0x23   : > { %478 = vrot.lane.b32.xlu0 %v5002_v7, %s4868_s19 }
  0x25   : > { %484 = vrot.lane.b32.xlu1 %v5019_v12, %s4868_s19 }
  0x27   : > { %1146 = vrot.lane.b32.xlu0 %v5007_v9, %s4866_s17 }
  0x29   : > { %486 = vrot.lane.b32.xlu1 %v5025_v13, %s4868_s19 }
  0x2b   : > { %1471 = vrot.lane.b32.xlu0 %v5012_v10, %s4866_s17 }
  0x2d   : > { %488 = vrot.lane.b32.xlu1 %v5031_v14, %s4868_s19 }
  0x2f   : > { %1796 = vrot.lane.b32.xlu0 %v5019_v12, %s4866_s17 }
  0x31   : > { %490 = vrot.lane.b32.xlu1 %v5037_v15, %s4868_s19 }
  0x33   : > { %2121 = vrot.lane.b32.xlu0 %v5025_v13, %s4866_s17 }
  0x35   : > { %492 = vrot.lane.b32.xlu1 %v5043_v16, %s4868_s19 }
  0x37   : > { %2446 = vrot.lane.b32.xlu0 %v5031_v14, %s4866_s17 }
  0x39   : > { %574 = vrot.lane.b32.xlu1 %v5002_v7, %s4870_s20 }
  0x3b   : > { %2771 = vrot.lane.b32.xlu0 %v5037_v15, %s4866_s17 }
  0x3d   : > { %578 = vrot.lane.b32.xlu1 %v5007_v9, %s4870_s20 }
  0x3f   : > { %3096 = vrot.lane.b32.xlu0 %v5043_v16, %s4866_s17 }
  0x41   : > { %582 = vrot.lane.b32.xlu1 %v5012_v10, %s4870_s20 }
  0x45   : > { %586 = vrot.lane.b32.xlu1 %v5019_v12, %s4870_s20 }
  0x49   : > { %590 = vrot.lane.b32.xlu1 %v5025_v13, %s4870_s20 }
  0x4d   : > { %594 = vrot.lane.b32.xlu1 %v5031_v14, %s4870_s20 }
  0x51   : > { %598 = vrot.lane.b32.xlu1 %v5037_v15, %s4870_s20 }
  0x55   : > { %602 = vrot.lane.b32.xlu1 %v5043_v16, %s4870_s20 }
  0x59   : > { %694 = vrot.lane.b32.xlu1 %v5002_v7, %s4871_s23 }
  0x5d   : > { %698 = vrot.lane.b32.xlu1 %v5007_v9, %s4871_s23 }
  0x61   : > { %702 = vrot.lane.b32.xlu1 %v5012_v10, %s4871_s23 }
  0x65   : > { %706 = vrot.lane.b32.xlu1 %v5019_v12, %s4871_s23 }
  0x69   : > { %710 = vrot.lane.b32.xlu1 %v5025_v13, %s4871_s23 }
  0x6d   : > { %714 = vrot.lane.b32.xlu1 %v5031_v14, %s4871_s23 }
  0x71   : > { %718 = vrot.lane.b32.xlu1 %v5037_v15, %s4871_s23 }
  0x75   : > { %722 = vrot.lane.b32.xlu1 %v5043_v16, %s4871_s23 }
  0x8b   : > { %v820_v17 = vpop.permute.xlu1 %819 }
  0x8f   : > { %v5085_v21 = vpop.permute.xlu1 %480 }
  0x90   : > { %7198 = vst [vmem:[#allocation9_spill] sm:$0xff] %v5085_v21 }
  0x91   : > { %v816_v18 = vpop.permute.xlu0 %815 }
  0x92   : > { %v818_v19 = vadd.f32 %v816_v18, %v5002_v7 }
  0x93   : > { %v5093_v24 = vpop.permute.xlu1 %482 }
  0x94   : > { %v5083_v20 = vmax.f32 %v818_v19, %v820_v17  ;;  %7200 = vst [vmem:[#allocation11_spill] sm:$0xff] %v5093_v24 }
  0x95   : > { %v5087_v22 = vpop.permute.xlu0 %478 }
  0x96   : > { %7199 = vst [vmem:[#allocation10_spill] sm:$0xff] %v5087_v22  ;;  %576 = vrot.lane.b32.xlu0 %v5087_v22, %s4870_s20  ;;  %v1145_v23 = vadd.f32 %v5083_v20, %v5007_v9  ;;  %v830_v35 = vsub.f32 %v818_v19, %v5083_v20 }
  0x97   : > { %v5101_v28 = vpop.permute.xlu1 %484 }
  0x98   : > { %7201 = vst [vmem:[#allocation12_spill] sm:$0xff] %v5101_v28  ;;  %v831_v39 = vmul.f32 1.442695, %v830_v35 }
  0x99   : > { %v1147_v25 = vpop.permute.xlu0 %1146 }
  0x9a   : > { %v5095_v26 = vmax.f32 %v1145_v23, %v1147_v25  ;;  %580 = vrot.lane.b32.xlu0 %v5085_v21, %s4870_s20  ;;  %4670 = vpow2.f32 %v831_v39 }
  0x9b   : > { %v5109_v32 = vpop.permute.xlu1 %486 }
  0x9c   : > { %v1470_v27 = vadd.f32 %v5095_v26, %v5012_v10  ;;  %7202 = vst [vmem:[#allocation13_spill] sm:$0xff] %v5109_v32  ;;  %v1157_v42 = vsub.f32 %v1145_v23, %v5095_v26 }
  0x9d   : > { %v1472_v29 = vpop.permute.xlu0 %1471 }
  0x9e   : > { %v5103_v30 = vmax.f32 %v1470_v27, %v1472_v29  ;;  %584 = vrot.lane.b32.xlu0 %v5093_v24, %s4870_s20  ;;  %v1158_v46 = vmul.f32 1.442695, %v1157_v42 }
  0x9f   : > { %v5118_v37 = vpop.permute.xlu1 %488 }
  0xa0   : > { %v1795_v31 = vadd.f32 %v5103_v30, %v5019_v12  ;;  %7203 = vst [vmem:[#allocation14_spill] sm:$0xff] %v5118_v37  ;;  %v1482_v47 = vsub.f32 %v1470_v27, %v5103_v30  ;;  %4672 = vpow2.f32 %v1158_v46 }
  0xa1   : > { %v1797_v33 = vpop.permute.xlu0 %1796 }
  0xa2   : > { %v5111_v34 = vmax.f32 %v1795_v31, %v1797_v33  ;;  %588 = vrot.lane.b32.xlu0 %v5101_v28, %s4870_s20  ;;  %v1483_v50 = vmul.f32 1.442695, %v1482_v47 }
  0xa3   : > { %v5124_v41 = vpop.permute.xlu1 %490 }
  0xa4   : > { %v2120_v36 = vadd.f32 %v5111_v34, %v5025_v13  ;;  %7204 = vst [vmem:[#allocation15_spill] sm:$0xff] %v5124_v41  ;;  %v1807_v49 = vsub.f32 %v1795_v31, %v5111_v34  ;;  %4674 = vpow2.f32 %v1483_v50 }
  0xa5   : > { %v2122_v38 = vpop.permute.xlu0 %2121 }
  0xa6   : > { %592 = vrot.lane.b32.xlu0 %v5109_v32, %s4870_s20  ;;  %v5122_v40 = vmax.f32 %v2120_v36, %v2122_v38  ;;  %v1808_v54 = vmul.f32 1.442695, %v1807_v49 }
  0xa7   : > { %v5131_v45 = vpop.permute.xlu1 %492  ;;  %v4671_v58 = vpop.eup %4670 }
  0xa8   : > { %v2445_v43 = vadd.f32 %v5122_v40, %v5031_v14  ;;  %7205 = vst [vmem:[#allocation16_spill] sm:$0xff] %v5131_v45  ;;  %604 = vrot.lane.b32.xlu1 %v5131_v45, %s4870_s20  ;;  %v2132_v55 = vsub.f32 %v2120_v36, %v5122_v40  ;;  %4676 = vpow2.f32 %v1808_v54  ;;  %v836_v63 = vrot.slane %v4671_v58, %v5162_v59 }
  0xa9   : > { %v2447_v44 = vpop.permute.xlu0 %2446 }
  0xaa   : > { %596 = vrot.lane.b32.xlu0 %v5118_v37, %s4870_s20  ;;  %v5138_v48 = vmax.f32 %v2445_v43, %v2447_v44  ;;  %v2133_v60 = vmul.f32 1.442695, %v2132_v55 }
  0xab   : > { %v5173_v4 = vpop.permute.xlu1 %574 }
  0xac   : > { %696 = vrot.lane.b32.xlu1 %v5087_v22, %s4871_s23  ;;  %v2770_v51 = vadd.f32 %v5138_v48, %v5037_v15  ;;  %v2457_v61 = vsub.f32 %v2445_v43, %v5138_v48  ;;  %4678 = vpow2.f32 %v2133_v60 }
  0xad   : > { %v2772_v53 = vpop.permute.xlu0 %2771  ;;  %v4673_v5 = vpop.eup %4672 }
  0xae   : > { %600 = vrot.lane.b32.xlu0 %v5124_v41, %s4870_s20  ;;  %v5152_v56 = vmax.f32 %v2770_v51, %v2772_v53  ;;  %v2458_v1 = vmul.f32 1.442695, %v2457_v61  ;;  %v1163_v17 = vrot.slane %v4673_v5, %v5162_v59 }
  0xaf   : > { %v5181_v19 = vpop.permute.xlu1 %578 }
  0xb0   : > { %700 = vrot.lane.b32.xlu1 %v5085_v21, %s4871_s23  ;;  %v3095_v62 = vadd.f32 %v5152_v56, %v5043_v16  ;;  %v2782_v2 = vsub.f32 %v2770_v51, %v5152_v56  ;;  %4680 = vpow2.f32 %v2458_v1 }
  0xb1   : > { %v3097_v0 = vpop.permute.xlu0 %3096  ;;  %v4675_v18 = vpop.eup %4674 }
  0xb2   : > { %708 = vrot.lane.b32.xlu0 %v5101_v28, %s4871_s23  ;;  %v5171_v3 = vmax.f32 %v3095_v62, %v3097_v0  ;;  %v2783_v6 = vmul.f32 1.442695, %v2782_v2  ;;  %v1488_v27 = vrot.slane %v4675_v18, %v5162_v59 }
  0xb3   : > { %v5187_v31 = vpop.permute.xlu1 %582 }
  0xb4   : > { %704 = vrot.lane.b32.xlu1 %v5093_v24, %s4871_s23  ;;  %7207 = vst [vmem:[#allocation18_spill] sm:$0xff] %v5171_v3  ;;  %v3107_v8 = vsub.f32 %v3095_v62, %v5171_v3  ;;  %4682 = vpow2.f32 %v2783_v6 }
  0xb5   : > { %v4677_v23 = vpop.eup %4676 }
  0xb6   : > { %712 = vrot.lane.b32.xlu0 %v5109_v32, %s4871_s23  ;;  %v3108_v25 = vmul.f32 1.442695, %v3107_v8  ;;  %v1813_v29 = vrot.slane %v4677_v23, %v5162_v59 }
  0xb7   : > { %v5194_v36 = vpop.permute.xlu1 %586 }
  0xb8   : > { %839 = vbcast.lane.b32.xlu1 %v836_v63, 352  ;;  %4684 = vpow2.f32 %v3108_v25 }
  0xb9   : > { %v4679_v33 = vpop.eup %4678 }
  0xba   : > { %716 = vrot.lane.b32.xlu0 %v5118_v37, %s4871_s23 }
  0xbb   : > { %v5203_v42 = vpop.permute.xlu1 %590 }
  0xbc   : > { %1009 = vbcast.lane.b32.xlu1 %v836_v63, 354 }
  0xbd   : > { %v4681_v35 = vpop.eup %4680 }
  0xbe   : > { %720 = vrot.lane.b32.xlu0 %v5124_v41, %s4871_s23 }
  0xc0   : > { %1166 = vbcast.lane.b32.xlu1 %v1163_v17, 352 }
  0xc1   : > { %v4683_v38 = vpop.eup %4682 }
  0xc2   : > { %724 = vrot.lane.b32.xlu0 %v5131_v45, %s4871_s23  ;;  %v2788_v39 = vrot.slane %v4683_v38, %v5162_v59  ;;  %s4883_s23 = smov [#allocation4]  }
  0xc4   : > { %1491 = vbcast.lane.b32.xlu1 %v1488_v27, 352 }
  0xc5   : > { %v4685_v43 = vpop.eup %4684 }
  0xc6   : > { %824 = vrot.lane.b32.xlu0 %v5083_v20, %s4872_s24  ;;  %v2138_v20 = vrot.slane %v4679_v33, %v5162_v59  ;;  %v5209_v44 = vrot.slane %v4685_v43, %v5162_v59 }
  0xc8   : > { %1816 = vbcast.lane.b32.xlu1 %v1813_v29, 352 }
  0xca   : > { %1151 = vrot.lane.b32.xlu0 %v5095_v26, %s4872_s24  ;;  %v2463_v26 = vrot.slane %v4681_v35, %v5162_v59 }
  0xcc   : > { %2311 = vbcast.lane.b32.xlu1 %v2138_v20, 354 }
  0xce   : > { %1476 = vrot.lane.b32.xlu0 %v5103_v30, %s4872_s24  ;;  %v5201_v30 = vsub.s32 1, %v5155_v57 }
  0xd0   : > { %2636 = vbcast.lane.b32.xlu1 %v2463_v26, 354  ;;  %v1496_v51 = vrot.slane %v4675_v18, %v5201_v30  ;;  %v2146_v61 = vrot.slane %v4679_v33, %v5201_v30  ;;  %v2471_v0 = vrot.slane %v4681_v35, %v5201_v30  ;;  %v2796_v2 = vrot.slane %v4683_v38, %v5201_v30 }
  0xd1   : > { %v5239_v8 = vrot.slane %v4685_v43, %v5201_v30 }
  0xd2   : > { %1801 = vrot.lane.b32.xlu0 %v5111_v34, %s4872_s24  ;;  %v844_v34 = vrot.slane %v4671_v58, %v5201_v30 }
  0xd4   : > { %2961 = vbcast.lane.b32.xlu1 %v2788_v39, 354 }
  0xd6   : > { %2126 = vrot.lane.b32.xlu0 %v5122_v40, %s4872_s24  ;;  %v5212_v40 = vpop.permute.xlu1 %594 }
  0xd8   : > { %3286 = vbcast.lane.b32.xlu1 %v5209_v44, 354 }
  0xda   : > { %2451 = vrot.lane.b32.xlu0 %v5138_v48, %s4872_s24  ;;  %v5214_v46 = vpop.permute.xlu1 %598  ;;  %v1171_v48 = vrot.slane %v4673_v5, %v5201_v30 }
  0xdc   : > { %2141 = vbcast.lane.b32.xlu1 %v2138_v20, 352 }
  0xde   : > { %847 = vbcast.lane.b32.xlu0 %v844_v34, 352  ;;  %v5218_v47 = vpop.permute.xlu1 %602 }
  0xe0   : > { %2466 = vbcast.lane.b32.xlu1 %v2463_v26, 352 }
  0xe2   : > { %1013 = vbcast.lane.b32.xlu0 %v844_v34, 354  ;;  %v695_v49 = vpop.permute.xlu1 %694 }
  0xe4   : > { %2791 = vbcast.lane.b32.xlu1 %v2788_v39, 352 }
  0xe6   : > { %2776 = vrot.lane.b32.xlu0 %v5152_v56, %s4872_s24  ;;  %v699_v50 = vpop.permute.xlu1 %698  ;;  %v1821_v56 = vrot.slane %v4677_v23, %v5201_v30  ;;  %v4873_v23 = vmov 1934713408  }
  0xe7   : > { %v497_v25 = vunpack.c.l.s4 %v4873_v23 }
  0xe9   : > { %v498_v33 = vunpack.c.0.s8 %v497_v25 }
  0xea   : > { %1336 = vbcast.lane.b32.xlu0 %v1163_v17, 354  ;;  %v703_v53 = vpop.permute.xlu1 %702 }
  0xeb   : > { %v5251_v26 = vsub.s32 %v498_v33, %v5155_v57 }
  0xed   : > { %7208 = vst [vmem:[#allocation19_spill] sm:$0xff] %v5251_v26 }
  0xee   : > { %1340 = vbcast.lane.b32.xlu0 %v1171_v48, 354  ;;  %v707_v54 = vpop.permute.xlu1 %706 }
  0xf2   : > { %1174 = vbcast.lane.b32.xlu0 %v1171_v48, 352  ;;  %v711_v58 = vpop.permute.xlu1 %710 }
  0xf6   : > { %3101 = vrot.lane.b32.xlu0 %v5171_v3, %s4872_s24  ;;  %v715_v62 = vpop.permute.xlu1 %714  ;;  %s4475_s24 = sshll.u32 %s4883_s23, 4  ;;  %s4476_s24 = int_to_ptr.vmem [resolvable:$true] %s4475_s24 }
  0xf7   : > { %p4785_p9 = scmp.lt.s32.totalorder %s4476_s24, %s4476_s24 }
  0xfa   : > { %1661 = vbcast.lane.b32.xlu0 %v1488_v27, 354  ;;  %v719_v5 = vpop.permute.xlu1 %718 }
  0xfe   : > { %1665 = vbcast.lane.b32.xlu0 %v1496_v51, 354  ;;  %v5242_v17 = vpop.permute.xlu1 %722 }
 0x102   : > { %1499 = vbcast.lane.b32.xlu0 %v1496_v51, 352 }
 0x106   : > { %1986 = vbcast.lane.b32.xlu0 %v1813_v29, 354 }
 0x108   : > { %v5224_v55 = vpop.permute.xlu0 %576 }
 0x10a   : > { %1990 = vbcast.lane.b32.xlu0 %v1821_v56, 354 }
 0x10c   : > { %v5227_v60 = vpop.permute.xlu0 %580 }
 0x10e   : > { %2315 = vbcast.lane.b32.xlu0 %v2146_v61, 354 }
 0x110   : > { %v5230_v63 = vpop.permute.xlu0 %584 }
 0x112   : > { %2640 = vbcast.lane.b32.xlu0 %v2471_v0, 354 }
 0x114   : > { %v5233_v1 = vpop.permute.xlu0 %588 }
 0x116   : > { %2965 = vbcast.lane.b32.xlu0 %v2796_v2, 354 }
 0x118   : > { %v5236_v6 = vpop.permute.xlu0 %592 }
 0x11a   : > { %3290 = vbcast.lane.b32.xlu0 %v5239_v8, 354  ;;  %v5246_v27 = vpop.permute.xlu1 %604 }
 0x11c   : > { %v5244_v18 = vpop.permute.xlu0 %596 }
 0x11e   : > { %1824 = vbcast.lane.b32.xlu0 %v1821_v56, 352  ;;  %v697_v20 = vpop.permute.xlu1 %696 }
 0x11f   : > { %v728_v38 = vcombine.low %v695_v49, %v697_v20 }
 0x120   : > { %v5248_v29 = vpop.permute.xlu0 %600 }
 0x121   : > { %v735_v39 = vrot.slane %v728_v38, %v5251_v26 }
 0x122   : > { %2149 = vbcast.lane.b32.xlu0 %v2146_v61, 352  ;;  %v701_v43 = vpop.permute.xlu1 %700 }
 0x123   : > { %v739_v48 = vcombine.low %v699_v50, %v701_v43  ;;  %v904_v51 = vrot.slane %v735_v39, %v5162_v59  ;;  %v911_v25 = vrot.slane %v735_v39, %v5201_v30 }
 0x124   : > { %v709_v35 = vpop.permute.xlu0 %708 }
 0x125   : > { %v746_v56 = vrot.slane %v739_v48, %v5251_v26  ;;  %906 = vbcast.lane.b32.xlu1 %v904_v51, 256  ;;  %v761_v52 = vcombine.low %v707_v54, %v709_v35 }
 0x126   : > { %2474 = vbcast.lane.b32.xlu0 %v2471_v0, 352  ;;  %v705_v23 = vpop.permute.xlu1 %704 }
 0x127   : > { %v750_v33 = vcombine.low %v703_v53, %v705_v23  ;;  %v1231_v49 = vrot.slane %v746_v56, %v5162_v59  ;;  %v1238_v50 = vrot.slane %v746_v56, %v5201_v30 }
 0x128   : > { %v713_v34 = vpop.permute.xlu0 %712 }
 0x129   : > { %v757_v0 = vrot.slane %v750_v33, %v5251_v26  ;;  %1233 = vbcast.lane.b32.xlu1 %v1231_v49, 256  ;;  %v772_v38 = vcombine.low %v711_v58, %v713_v34 }
 0x12a   : > { %2799 = vbcast.lane.b32.xlu0 %v2796_v2, 352  ;;  %v768_v2 = vrot.slane %v761_v52, %v5251_v26 }
 0x12b   : > { %v1556_v43 = vrot.slane %v757_v0, %v5162_v59  ;;  %v1563_v53 = vrot.slane %v757_v0, %v5201_v30  ;;  %v779_v54 = vrot.slane %v772_v38, %v5251_v26 }
 0x12c   : > { %v717_v61 = vpop.permute.xlu0 %716  ;;  %v1881_v51 = vrot.slane %v768_v2, %v5162_v59 }
 0x12d   : > { %1558 = vbcast.lane.b32.xlu1 %v1556_v43, 256  ;;  %v783_v35 = vcombine.low %v715_v62, %v717_v61  ;;  %v2206_v34 = vrot.slane %v779_v54, %v5162_v59  ;;  %v2213_v49 = vrot.slane %v779_v54, %v5201_v30 }
 0x12e   : > { %913 = vbcast.lane.b32.xlu0 %v911_v25, 256  ;;  %v1888_v25 = vrot.slane %v768_v2, %v5201_v30 }
 0x12f   : > { %v790_v52 = vrot.slane %v783_v35, %v5251_v26 }
 0x130   : > { %v721_v20 = vpop.permute.xlu0 %720 }
 0x131   : > { %1883 = vbcast.lane.b32.xlu1 %v1881_v51, 256  ;;  %v794_v58 = vcombine.low %v719_v5, %v721_v20  ;;  %v2531_v62 = vrot.slane %v790_v52, %v5162_v59  ;;  %v2538_v38 = vrot.slane %v790_v52, %v5201_v30  ;;  %v736_v5 = vcombine.high %v735_v39, %v7124_v11 }
 0x132   : > { %1240 = vbcast.lane.b32.xlu0 %v1238_v50, 256  ;;  %v747_v51 = vcombine.high %v746_v56, %v7124_v11  ;;  %v758_v39 = vcombine.high %v757_v0, %v7124_v11 }
 0x133   : > { %v801_v50 = vrot.slane %v794_v58, %v5251_v26  ;;  %v918_v35 = vrot.slane %v736_v5, %v5162_v59 }
 0x134   : > { %v5262_v48 = vpop.permute.xlu0 %724  ;;  %v1252_v56 = vrot.slane %v747_v51, %v5201_v30  ;;  %v1577_v0 = vrot.slane %v758_v39, %v5201_v30 }
 0x135   : > { %2208 = vbcast.lane.b32.xlu1 %v2206_v34, 256  ;;  %v2856_v43 = vrot.slane %v801_v50, %v5162_v59  ;;  %v925_v34 = vrot.slane %v736_v5, %v5201_v30 }
 0x136   : > { %1565 = vbcast.lane.b32.xlu0 %v1563_v53, 256  ;;  %v2863_v53 = vrot.slane %v801_v50, %v5201_v30 }
 0x138   : > { %v825_v23 = vpop.permute.xlu0 %824 }
 0x139   : > { %2533 = vbcast.lane.b32.xlu1 %v2531_v62, 256 }
 0x13a   : > { %1890 = vbcast.lane.b32.xlu0 %v1888_v25, 256  ;;  %v827_v25 = vsub.f32 %v5002_v7, %v825_v23  ;;  %v1570_v23 = vrot.slane %v758_v39, %v5162_v59 }
 0x13c   : > { %v1152_v33 = vpop.permute.xlu0 %1151  ;;  %v828_v62 = vmul.f32 1.442695, %v827_v25 }
 0x13d   : > { %2858 = vbcast.lane.b32.xlu1 %v2856_v43, 256 }
 0x13e   : > { %2215 = vbcast.lane.b32.xlu0 %v2213_v49, 256  ;;  %v1245_v49 = vrot.slane %v747_v51, %v5162_v59  ;;  %4686 = vpow2.f32 %v828_v62  ;;  %v780_v51 = vcombine.high %v779_v54, %v7124_v11 }
 0x140   : > { %v1477_v61 = vpop.permute.xlu0 %1476  ;;  %v2220_v39 = vrot.slane %v780_v51, %v5162_v59 }
 0x141   : > { %920 = vbcast.lane.b32.xlu1 %v918_v35, 256  ;;  %v769_v35 = vcombine.high %v768_v2, %v7124_v11  ;;  %v1479_v2 = vsub.f32 %v5012_v10, %v1477_v61 }
 0x142   : > { %2540 = vbcast.lane.b32.xlu0 %v2538_v38, 256  ;;  %v1154_v38 = vsub.f32 %v5007_v9, %v1152_v33 }
 0x143   : > { %v1480_v54 = vmul.f32 1.442695, %v1479_v2 }
 0x144   : > { %v1802_v20 = vpop.permute.xlu0 %1801  ;;  %v1155_v5 = vmul.f32 1.442695, %v1154_v38  ;;  %v791_v38 = vcombine.high %v790_v52, %v7124_v11 }
 0x145   : > { %1247 = vbcast.lane.b32.xlu1 %v1245_v49, 256  ;;  %v1902_v49 = vrot.slane %v769_v35, %v5201_v30 }
 0x146   : > { %2865 = vbcast.lane.b32.xlu0 %v2863_v53, 256  ;;  %v1804_v53 = vsub.f32 %v5019_v12, %v1802_v20  ;;  %4688 = vpow2.f32 %v1155_v5 }
 0x148   : > { %v5280_v58 = vpop.permute.xlu0 %2126  ;;  %v1805_v25 = vmul.f32 1.442695, %v1804_v53  ;;  %v2227_v53 = vrot.slane %v780_v51, %v5201_v30 }
 0x149   : > { %1572 = vbcast.lane.b32.xlu1 %v1570_v23, 256  ;;  %v2545_v23 = vrot.slane %v791_v38, %v5162_v59 }
 0x14a   : > { %927 = vbcast.lane.b32.xlu0 %v925_v34, 256  ;;  %v1895_v34 = vrot.slane %v769_v35, %v5162_v59  ;;  %4690 = vpow2.f32 %v1805_v25  ;;  %v5308_v35 = vcombine.high %v801_v50, %v7124_v11  ;;  %v2129_v50 = vsub.f32 %v5025_v13, %v5280_v58 }
 0x14b   : > { %v4687_v25 = vpop.eup %4686 }
 0x14c   : > { %v2452_v43 = vpop.permute.xlu0 %2451  ;;  %v880_v51 = vrot.slane %v4687_v25, %v5201_v30 }
 0x14d   : > { %v2454_v33 = vsub.f32 %v5031_v14, %v2452_v43  ;;  %1897 = vbcast.lane.b32.xlu1 %v1895_v34, 256  ;;  %v5302_v43 = vpop.permute.xlu1 %839 }
 0x14e   : > { %1254 = vbcast.lane.b32.xlu0 %v1252_v56, 256 }
 0x14f   : > { %v2455_v62 = vmul.f32 1.442695, %v2454_v33 }
 0x150   : > { %v5290_v3 = vpop.permute.xlu0 %847 }
 0x151   : > { %2222 = vbcast.lane.b32.xlu1 %v2220_v39, 256  ;;  %4692 = vpow2.f32 %v2455_v62  ;;  %v5313_v33 = vpop.permute.xlu1 %1009 }
 0x152   : > { %1579 = vbcast.lane.b32.xlu0 %v1577_v0, 256  ;;  %4694 = vpow2.f32 %v1480_v54  ;;  %v2552_v0 = vrot.slane %v791_v38, %v5201_v30  ;;  %v2130_v38 = vmul.f32 1.442695, %v2129_v50 }
 0x153   : > { %v4689_v2 = vpop.eup %4688 }
 0x154   : > { %v5297_v20 = vpop.permute.xlu0 %1013 }
 0x155   : > { %2547 = vbcast.lane.b32.xlu1 %v2545_v23, 256  ;;  %v5323_v39 = vpop.permute.xlu1 %1166  ;;  %v1207_v23 = vrot.slane %v4689_v2, %v5201_v30 }
 0x156   : > { %1904 = vbcast.lane.b32.xlu0 %v1902_v49, 256  ;;  %v872_v49 = vrot.slane %v4687_v25, %v5162_v59 }
 0x157   : > { %v4691_v62 = vpop.eup %4690 }
 0x158   : > { %v2777_v56 = vpop.permute.xlu0 %2776 }
 0x159   : > { %v2779_v61 = vsub.f32 %v5037_v15, %v2777_v56  ;;  %v2870_v15 = vrot.slane %v5308_v35, %v5162_v59  ;;  %v1199_v56 = vrot.slane %v4689_v2, %v5162_v59 }
 0x15a   : > { %2229 = vbcast.lane.b32.xlu0 %v2227_v53, 256  ;;  %v1857_v53 = vrot.slane %v4691_v62, %v5201_v30 }
 0x15b   : > { %v2780_v5 = vmul.f32 1.442695, %v2779_v61  ;;  %2872 = vbcast.lane.b32.xlu1 %v2870_v15, 256 }
 0x15c   : > { %v5310_v52 = vpop.permute.xlu0 %1336 }
 0x15d   : > { %7209 = vst [vmem:[#allocation20_spill] sm:$0xff] %v5310_v52  ;;  %4696 = vpow2.f32 %v2780_v5 }
 0x15e   : > { %2554 = vbcast.lane.b32.xlu0 %v2552_v0, 256  ;;  %v4693_v58 = vpop.eup %4692  ;;  %4698 = vpow2.f32 %v2130_v38  ;;  %v5330_v0 = vpop.permute.xlu1 %1491 }
 0x15f   : > { %875 = vbcast.lane.b32.xlu1 %v872_v49, 352  ;;  %v4695_v5 = vpop.eup %4694  ;;  %v2499_v15 = vrot.slane %v4693_v58, %v5162_v59 }
 0x160   : > { %v5319_v34 = vpop.permute.xlu0 %1340 }
 0x161   : > { %7210 = vst [vmem:[#allocation21_spill] sm:$0xff] %v5319_v34 }
 0x162   : > { %883 = vbcast.lane.b32.xlu0 %v880_v51, 352  ;;  %v5338_v2 = vpop.permute.xlu1 %1816 }
 0x163   : > { %1860 = vbcast.lane.b32.xlu1 %v1857_v53, 352 }
 0x164   : > { %v5325_v54 = vpop.permute.xlu0 %1174 }
 0x166   : > { %1202 = vbcast.lane.b32.xlu0 %v1199_v56, 352  ;;  %v1524_v56 = vrot.slane %v4695_v5, %v5162_v59 }
 0x167   : > { %2502 = vbcast.lane.b32.xlu1 %v2499_v15, 352  ;;  %v5346_v15 = vpop.permute.xlu1 %2311 }
 0x168   : > { %v3102_v61 = vpop.permute.xlu0 %3101  ;;  %7213 = vst [vmem:[#allocation24_spill] sm:$0xff] %v5346_v15  ;;  %v2507_v15 = vrot.slane %v4693_v58, %v5201_v30 }
 0x169   : > { %v3104_v25 = vsub.f32 %v5043_v16, %v3102_v61  ;;  %v1532_v16 = vrot.slane %v4695_v5, %v5201_v30 }
 0x16a   : > { %v4697_v50 = vpop.eup %4696  ;;  %1210 = vbcast.lane.b32.xlu0 %v1207_v23, 352  ;;  %v1849_v23 = vrot.slane %v4691_v62, %v5162_v59 }
 0x16b   : > { %v3105_v51 = vmul.f32 1.442695, %v3104_v25  ;;  %v2824_v38 = vrot.slane %v4697_v50, %v5162_v59  ;;  %v4699_v25 = vpop.eup %4698  ;;  %v5353_v45 = vpop.permute.xlu1 %2636 }
 0x16c   : > { %v5334_v49 = vpop.permute.xlu0 %1661  ;;  %7215 = vst [vmem:[#allocation26_spill] sm:$0xff] %v5353_v45  ;;  %v2182_v62 = vrot.slane %v4699_v25, %v5201_v30 }
 0x16d   : > { %7211 = vst [vmem:[#allocation22_spill] sm:$0xff] %v5334_v49  ;;  %4700 = vpow2.f32 %v3105_v51  ;;  %2827 = vbcast.lane.b32.xlu1 %v2824_v38, 352  ;;  %v805_v38 = vcombine.low %v5242_v17, %v5262_v48  ;;  %v7219_v48 = vmov 0.0  }
 0x16e   : > { %1527 = vbcast.lane.b32.xlu0 %v1524_v56, 352  ;;  %v2174_v56 = vrot.slane %v4699_v25, %v5162_v59  ;;  %v2832_v25 = vrot.slane %v4697_v50, %v5201_v30  ;;  %v4874_v50 = vmov 1966171168  }
 0x170   : > { %v5340_v53 = vpop.permute.xlu0 %1665 }
 0x171   : > { %7212 = vst [vmem:[#allocation23_spill] sm:$0xff] %v5340_v53  ;;  %v535_v53 = vcombine.low %v5025_v13, %v5109_v32 }
 0x172   : > { %1535 = vbcast.lane.b32.xlu0 %v1532_v16, 352 }
 0x174   : > { %v5343_v61 = vpop.permute.xlu0 %1499 }
 0x176   : > { %1852 = vbcast.lane.b32.xlu0 %v1849_v23, 352  ;;  %v812_v23 = vrot.slane %v805_v38, %v5251_v26 }
 0x178   : > { %v5348_v51 = vpop.permute.xlu0 %1986  ;;  %v3181_v17 = vrot.slane %v812_v23, %v5162_v59  ;;  %v813_v45 = vcombine.high %v812_v23, %v7219_v48 }
 0x179   : > { %7214 = vst [vmem:[#allocation25_spill] sm:$0xff] %v5348_v51 }
 0x17a   : > { %v4701_v11 = vpop.eup %4700  ;;  %2177 = vbcast.lane.b32.xlu0 %v2174_v56, 352  ;;  %v5363_v56 = vpop.permute.xlu1 %2961 }
 0x17b   : > { %v3149_v5 = vrot.slane %v4701_v11, %v5162_v59  ;;  %7218 = vst [vmem:[#allocation29_spill] sm:$0xff] %v5363_v56 }
 0x17c   : > { %v5356_v16 = vpop.permute.xlu0 %1990 }
 0x17d   : > { %7216 = vst [vmem:[#allocation27_spill] sm:$0xff] %v5356_v16  ;;  %3152 = vbcast.lane.b32.xlu1 %v3149_v5, 352  ;;  %v3195_v5 = vrot.slane %v813_v45, %v5162_v59 }
 0x17e   : > { %2185 = vbcast.lane.b32.xlu0 %v2182_v62, 352  ;;  %v5371_v38 = vpop.permute.xlu1 %3286  ;;  %v3157_v62 = vrot.slane %v4701_v11, %v5201_v30  ;;  %v505_v11 = vcombine.low %v5007_v9, %v5085_v21 }
 0x17f   : > { %7221 = vst [vmem:[#allocation31_spill] sm:$0xff] %v5371_v38 }
 0x180   : > { %v5360_v41 = vpop.permute.xlu0 %2315  ;;  %v5404_v9 = vrot.slane %v505_v11, %v5251_v26 }
 0x181   : > { %7217 = vst [vmem:[#allocation28_spill] sm:$0xff] %v5360_v41  ;;  %3116 = vbcast.lane.b32.xlu1 %v5209_v44, 352 }
 0x182   : > { %2510 = vbcast.lane.b32.xlu0 %v2507_v15, 352  ;;  %v2877_v15 = vrot.slane %v5308_v35, %v5201_v30  ;;  %v5381_v56 = vpop.permute.xlu1 %2141  ;;  %v3188_v35 = vrot.slane %v812_v23, %v5201_v30  ;;  %7226 = vst [vmem:[#allocation36_spill] sm:$0xff] %v5404_v9  ;;  %v5421_v11 = vcombine.high %v5404_v9, %v7219_v48 }
 0x184   : > { %v5368_v16 = vpop.permute.xlu0 %2640  ;;  %7230 = vst [vmem:[#allocation40_spill] sm:$0xff] %v5421_v11 }
 0x185   : > { %7220 = vst [vmem:[#allocation30_spill] sm:$0xff] %v5368_v16  ;;  %3183 = vbcast.lane.b32.xlu1 %v3181_v17, 256  ;;  %v932_v17 = vunpack.c.l.s4 %v4874_v50 }
 0x186   : > { %2835 = vbcast.lane.b32.xlu0 %v2832_v25, 352  ;;  %v495_v25 = vcombine.low %v5002_v7, %v5087_v22  ;;  %v515_v7 = vcombine.low %v5012_v10, %v5093_v24  ;;  %v525_v10 = vcombine.low %v5019_v12, %v5101_v28 }
 0x188   : > { %v5374_v58 = vpop.permute.xlu0 %2965  ;;  %v5396_v50 = vrot.slane %v495_v25, %v5251_v26 }
 0x189   : > { %7222 = vst [vmem:[#allocation32_spill] sm:$0xff] %v5374_v58  ;;  %3197 = vbcast.lane.b32.xlu1 %v3195_v5, 256  ;;  %v933_v58 = vunpack.c.0.s8 %v932_v17  ;;  %v5390_v5 = vpop.permute.xlu1 %2466  ;;  %v3202_v17 = vrot.slane %v813_v45, %v5201_v30 }
 0x18a   : > { %3160 = vbcast.lane.b32.xlu0 %v3157_v62, 352  ;;  %7224 = vst [vmem:[#allocation34_spill] sm:$0xff] %v5396_v50  ;;  %v5411_v23 = vcombine.high %v5396_v50, %v7219_v48 }
 0x18c   : > { %v5377_v44 = vpop.permute.xlu0 %3290  ;;  %7228 = vst [vmem:[#allocation38_spill] sm:$0xff] %v5411_v23 }
 0x18d   : > { %7223 = vst [vmem:[#allocation33_spill] sm:$0xff] %v5377_v44  ;;  %v5413_v25 = vpop.permute.xlu1 %2791 }
 0x18e   : > { %2879 = vbcast.lane.b32.xlu0 %v2877_v15, 256  ;;  %v5399_v15 = vsub.s32 %v933_v58, %v5155_v57  ;;  %7229 = vst [vmem:[#allocation39_spill] sm:$0xff] %v5413_v25 }
 0x190   : > { %v5385_v38 = vpop.permute.xlu0 %1824  ;;  %7225 = vst [vmem:[#allocation35_spill] sm:$0xff] %v5399_v15  ;;  %v1029_v58 = vrot.slane %v5396_v50, %v5399_v15  ;;  %v1356_v45 = vrot.slane %v5404_v9, %v5399_v15  ;;  %v1051_v21 = vrot.slane %v5411_v23, %v5399_v15  ;;  %v1378_v12 = vrot.slane %v5421_v11, %v5399_v15 }
 0x192   : > { %3124 = vbcast.lane.b32.xlu0 %v5239_v8, 352  ;;  %v1030_v44 = vcombine.high %v1029_v58, %v1029_v58  ;;  %v1357_v28 = vcombine.high %v1356_v45, %v1356_v45  ;;  %v1037_v41 = vrot.slane %v1029_v58, %v5399_v15  ;;  %v1052_v51 = vcombine.high %v1051_v21, %v1051_v21 }
 0x193   : > { %v1379_v34 = vcombine.high %v1378_v12, %v1378_v12  ;;  %v1059_v13 = vrot.slane %v1051_v21, %v5399_v15 }
 0x194   : > { %v5392_v62 = vpop.permute.xlu0 %2149  ;;  %v5451_v11 = vrot.slane %v1030_v44, %v5399_v15  ;;  %v5465_v32 = vrot.slane %v1357_v28, %v5399_v15  ;;  %v1386_v28 = vrot.slane %v1378_v12, %v5399_v15 }
 0x196   : > { %3190 = vbcast.lane.b32.xlu0 %v3188_v35, 256  ;;  %v5424_v35 = vrot.slane %v515_v7, %v5251_v26  ;;  %v5441_v7 = vrot.slane %v525_v10, %v5251_v26  ;;  %7235 = vst [vmem:[#allocation45_spill] sm:$0xff] %v5451_v11  ;;  %v608_v10 = vcombine.low %v5173_v4, %v5224_v55  ;;  %7237 = vst [vmem:[#allocation47_spill] sm:$0xff] %v5465_v32 }
 0x197   : > { %v5432_v22 = vpop.permute.xlu1 %906  ;;  %v5473_v4 = vrot.slane %v1052_v51, %v5399_v15  ;;  %v1364_v55 = vrot.slane %v1356_v45, %v5399_v15  ;;  %v5490_v51 = vrot.slane %v1379_v34, %v5399_v15 }
 0x198   : > { %v5406_v8 = vpop.permute.xlu0 %2474  ;;  %7231 = vst [vmem:[#allocation41_spill] sm:$0xff] %v5424_v35  ;;  %7234 = vst [vmem:[#allocation44_spill] sm:$0xff] %v5441_v7  ;;  %v1681_v9 = vrot.slane %v5424_v35, %v5399_v15  ;;  %v5461_v58 = vcombine.high %v5441_v7, %v7219_v48 }
 0x199   : > { %7227 = vst [vmem:[#allocation37_spill] sm:$0xff] %v5406_v8  ;;  %7240 = vst [vmem:[#allocation50_spill] sm:$0xff] %v5473_v4 }
 0x19a   : > { %3204 = vbcast.lane.b32.xlu0 %v3202_v17, 256  ;;  %v5438_v17 = vcombine.high %v5424_v35, %v7219_v48  ;;  %7236 = vst [vmem:[#allocation46_spill] sm:$0xff] %v5461_v58  ;;  %v5470_v35 = vrot.slane %v1037_v41, %v5162_v59  ;;  %v1682_v23 = vcombine.high %v1681_v9, %v1681_v9  ;;  %7242 = vst [vmem:[#allocation52_spill] sm:$0xff] %v5490_v51 }
 0x19b   : > { %v5448_v49 = vpop.permute.xlu1 %1233  ;;  %v5487_v41 = vrot.slane %v608_v10, %v5251_v26  ;;  %v1689_v21 = vrot.slane %v1681_v9, %v5399_v15  ;;  %v619_v10 = vcombine.low %v5181_v19, %v5227_v60  ;;  %v5515_v9 = vrot.slane %v1386_v28, %v5162_v59 }
 0x19c   : > { %v5428_v24 = vpop.permute.xlu0 %2799  ;;  %7233 = vst [vmem:[#allocation43_spill] sm:$0xff] %v5438_v17  ;;  %v1703_v52 = vrot.slane %v5438_v17, %v5399_v15  ;;  %7239 = vst [vmem:[#allocation49_spill] sm:$0xff] %v5470_v35  ;;  %v2006_v17 = vrot.slane %v5441_v7, %v5399_v15  ;;  %v2028_v7 = vrot.slane %v5461_v58, %v5399_v15 }
 0x19d   : > { %7232 = vst [vmem:[#allocation42_spill] sm:$0xff] %v5428_v24  ;;  %v5495_v35 = vrot.slane %v1059_v13, %v5162_v59  ;;  %v5508_v58 = vrot.slane %v1364_v55, %v5162_v59  ;;  %7245 = vst [vmem:[#allocation55_spill] sm:$0xff] %v5515_v9  ;;  %v5526_v60 = vcombine.high %v5487_v41, %v7219_v48 }
 0x19e   : > { %v1704_v45 = vcombine.high %v1703_v52, %v1703_v52  ;;  %v2007_v13 = vcombine.high %v2006_v17, %v2006_v17  ;;  %v2029_v34 = vcombine.high %v2028_v7, %v2028_v7  ;;  %v630_v28 = vcombine.low %v5187_v31, %v5230_v63 }
 0x19f   : > { %v5478_v50 = vpop.permute.xlu1 %1558  ;;  %7243 = vst [vmem:[#allocation53_spill] sm:$0xff] %v5495_v35  ;;  %7244 = vst [vmem:[#allocation54_spill] sm:$0xff] %v5508_v58  ;;  %v545_v35 = vcombine.low %v5031_v14, %v5118_v37  ;;  %v2014_v9 = vrot.slane %v2006_v17, %v5399_v15  ;;  %v5543_v58 = vrot.slane %v619_v10, %v5251_v26 }
 0x1a0   : > { %v5443_v16 = vpop.permute.xlu0 %913  ;;  %v5531_v14 = vrot.slane %v1704_v45, %v5399_v15  ;;  %v937_v55 = vrot.slane %v5487_v41, %v5399_v15  ;;  %v5550_v51 = vrot.slane %v2007_v13, %v5399_v15  ;;  %v5567_v13 = vsub.s32 2, %v5155_v57 }
 0x1a1   : > { %7251 = vst [vmem:[#allocation61_spill] sm:$0xff] %v5543_v58  ;;  %v5564_v10 = vrot.slane %v545_v35, %v5251_v26  ;;  %v641_v17 = vcombine.low %v5194_v36, %v5233_v1  ;;  %v5582_v35 = vsub.s32 3, %v5155_v57  ;;  %v5589_v32 = vcombine.high %v5543_v58, %v7219_v48 }
 0x1a2   : > { %7248 = vst [vmem:[#allocation58_spill] sm:$0xff] %v5531_v14  ;;  %7252 = vst [vmem:[#allocation62_spill] sm:$0xff] %v5550_v51  ;;  %v1264_v36 = vrot.slane %v5543_v58, %v5399_v15 }
 0x1a3   : > { %v5512_v12 = vpop.permute.xlu1 %1883  ;;  %7255 = vst [vmem:[#allocation65_spill] sm:$0xff] %v5564_v10  ;;  %7259 = vst [vmem:[#allocation69_spill] sm:$0xff] %v5589_v32  ;;  %v5619_v4 = vrot.slane %v5564_v10, %v5399_v15 }
 0x1a4   : > { %v5467_v44 = vpop.permute.xlu0 %1240 }
 0x1a5   : > { %7238 = vst [vmem:[#allocation48_spill] sm:$0xff] %v5467_v44  ;;  %v5484_v44 = vrot.slane %v535_v53, %v5251_v26  ;;  %v1711_v53 = vrot.slane %v1703_v52, %v5399_v15  ;;  %v5518_v52 = vrot.slane %v1682_v23, %v5399_v15  ;;  %v5536_v23 = vrot.slane %v1689_v21, %v5162_v59 }
 0x1a6   : > { %v2036_v21 = vrot.slane %v2028_v7, %v5399_v15  ;;  %v5577_v7 = vrot.slane %v630_v28, %v5251_v26  ;;  %7266 = vst [vmem:[#allocation76_spill] sm:$0xff] %v5619_v4  ;;  %v663_v4 = vcombine.low %v5212_v40, %v5244_v18  ;;  %v685_v40 = vcombine.low %v5218_v47, %v5246_v27 }
 0x1a7   : > { %7241 = vst [vmem:[#allocation51_spill] sm:$0xff] %v5484_v44  ;;  %7246 = vst [vmem:[#allocation56_spill] sm:$0xff] %v5518_v52  ;;  %v5522_v19 = vrot.slane %v5484_v44, %v5399_v15  ;;  %v5539_v37 = vrot.slane %v1711_v53, %v5162_v59  ;;  %v5554_v31 = vcombine.high %v5484_v44, %v7219_v48  ;;  %v5556_v63 = vpop.permute.xlu1 %2208 }
 0x1a8   : > { %v5503_v11 = vpop.permute.xlu0 %1565  ;;  %7249 = vst [vmem:[#allocation59_spill] sm:$0xff] %v5536_v23  ;;  %7254 = vst [vmem:[#allocation64_spill] sm:$0xff] %v5556_v63  ;;  %v959_v44 = vrot.slane %v5526_v60, %v5399_v15  ;;  %v5574_v23 = vrot.slane %v2029_v34, %v5399_v15  ;;  %v5585_v52 = vrot.slane %v2014_v9, %v5162_v59 }
 0x1a9   : > { %7247 = vst [vmem:[#allocation57_spill] sm:$0xff] %v5522_v19  ;;  %7250 = vst [vmem:[#allocation60_spill] sm:$0xff] %v5539_v37  ;;  %v2332_v53 = vcombine.high %v5522_v19, %v5522_v19  ;;  %v938_v37 = vcombine.high %v937_v55, %v937_v55  ;;  %v5597_v28 = vrot.slane %v5554_v31, %v5399_v15 }
 0x1aa   : > { %7253 = vst [vmem:[#allocation63_spill] sm:$0xff] %v5554_v31  ;;  %7256 = vst [vmem:[#allocation66_spill] sm:$0xff] %v5574_v23  ;;  %v5604_v9 = vrot.slane %v2036_v21, %v5162_v59  ;;  %v652_v34 = vcombine.low %v5203_v42, %v5236_v6  ;;  %v960_v31 = vcombine.high %v959_v44, %v959_v44 }
 0x1ab   : > { %7257 = vst [vmem:[#allocation67_spill] sm:$0xff] %v5577_v7  ;;  %7258 = vst [vmem:[#allocation68_spill] sm:$0xff] %v5585_v52  ;;  %v5601_v1 = vpop.permute.xlu1 %2533  ;;  %v5607_v57 = vrot.slane %v2332_v53, %v5399_v15  ;;  %v5611_v52 = vcombine.high %v5564_v10, %v7219_v48  ;;  %v5623_v21 = vcombine.high %v5577_v7, %v7219_v48 }
 0x1ac   : > { %v5547_v45 = vpop.permute.xlu0 %1890  ;;  %7261 = vst [vmem:[#allocation71_spill] sm:$0xff] %v5597_v28  ;;  %7262 = vst [vmem:[#allocation72_spill] sm:$0xff] %v5601_v1  ;;  %v5626_v53 = vrot.slane %v641_v17, %v5251_v26  ;;  %v5632_v6 = vrot.slane %v938_v37, %v5399_v15  ;;  %v1286_v10 = vrot.slane %v5589_v32, %v5399_v15 }
 0x1ad   : > { %7263 = vst [vmem:[#allocation73_spill] sm:$0xff] %v5604_v9  ;;  %7264 = vst [vmem:[#allocation74_spill] sm:$0xff] %v5607_v57  ;;  %v1265_v9 = vcombine.high %v1264_v36, %v1264_v36  ;;  %v967_v37 = vrot.slane %v959_v44, %v5399_v15  ;;  %v5650_v19 = vrot.slane %v652_v34, %v5251_v26 }
 0x1ae   : > { %7265 = vst [vmem:[#allocation75_spill] sm:$0xff] %v5611_v52  ;;  %7267 = vst [vmem:[#allocation77_spill] sm:$0xff] %v5623_v21  ;;  %v945_v52 = vrot.slane %v937_v55, %v5399_v15  ;;  %v1589_v55 = vrot.slane %v5577_v7, %v5399_v15  ;;  %v1272_v32 = vrot.slane %v1264_v36, %v5399_v15 }
 0x1af   : > { %7268 = vst [vmem:[#allocation78_spill] sm:$0xff] %v5626_v53  ;;  %v5644_v23 = vpop.permute.xlu1 %2858  ;;  %7271 = vst [vmem:[#allocation81_spill] sm:$0xff] %v5650_v19  ;;  %v5656_v17 = vrot.slane %v960_v31, %v5399_v15  ;;  %v5660_v28 = vcombine.high %v5626_v53, %v7219_v48  ;;  %v674_v44 = vcombine.low %v5214_v46, %v5248_v29 }
 0x1b0   : > { %v5591_v14 = vpop.permute.xlu0 %2215  ;;  %7270 = vst [vmem:[#allocation80_spill] sm:$0xff] %v5644_v23  ;;  %v5665_v42 = vrot.slane %v945_v52, %v5162_v59  ;;  %v1611_v34 = vrot.slane %v5623_v21, %v5399_v15  ;;  %v1294_v36 = vrot.slane %v1286_v10, %v5399_v15  ;;  %v1287_v57 = vcombine.high %v1286_v10, %v1286_v10 }
 0x1b1   : > { %7260 = vst [vmem:[#allocation70_spill] sm:$0xff] %v5591_v14  ;;  %7272 = vst [vmem:[#allocation82_spill] sm:$0xff] %v5656_v17  ;;  %v5677_v7 = vrot.slane %v1265_v9, %v5399_v15  ;;  %v1590_v46 = vcombine.high %v1589_v55, %v1589_v55  ;;  %v1914_v29 = vrot.slane %v5626_v53, %v5399_v15 }
 0x1b2   : > { %7273 = vst [vmem:[#allocation83_spill] sm:$0xff] %v5660_v28  ;;  %v5682_v52 = vrot.slane %v967_v37, %v5162_v59  ;;  %v5688_v47 = vcombine.high %v5650_v19, %v7219_v48  ;;  %v5691_v27 = vrot.slane %v663_v4, %v5251_v26  ;;  %v5694_v10 = vrot.slane %v1272_v32, %v5162_v59 }
 0x1b3   : > { %v5684_v21 = vpop.permute.xlu1 %920  ;;  %v5699_v18 = vrot.slane %v674_v44, %v5251_v26  ;;  %v1597_v37 = vrot.slane %v1589_v55, %v5399_v15  ;;  %v1612_v53 = vcombine.high %v1611_v34, %v1611_v34  ;;  %v1936_v58 = vrot.slane %v5660_v28, %v5399_v15 }
 0x1b4   : > { %v5634_v51 = vpop.permute.xlu0 %2540  ;;  %7275 = vst [vmem:[#allocation85_spill] sm:$0xff] %v5688_v47  ;;  %7276 = vst [vmem:[#allocation86_spill] sm:$0xff] %v5691_v27  ;;  %v2239_v4 = vrot.slane %v5650_v19, %v5399_v15  ;;  %v5712_v23 = vrot.slane %v1294_v36, %v5162_v59  ;;  %v5715_v44 = vrot.slane %v1287_v57, %v5399_v15 }
 0x1b5   : > { %7269 = vst [vmem:[#allocation79_spill] sm:$0xff] %v5634_v51  ;;  %7277 = vst [vmem:[#allocation87_spill] sm:$0xff] %v5699_v18  ;;  %v5720_v9 = vrot.slane %v1590_v46, %v5399_v15  ;;  %v1915_v28 = vcombine.high %v1914_v29, %v1914_v29  ;;  %v5727_v19 = vcombine.high %v5691_v27, %v7219_v48 }
 0x1b6   : > { %7280 = vst [vmem:[#allocation90_spill] sm:$0xff] %v5712_v23  ;;  %7281 = vst [vmem:[#allocation91_spill] sm:$0xff] %v5715_v44  ;;  %v1922_v36 = vrot.slane %v1914_v29, %v5399_v15  ;;  %v2564_v57 = vrot.slane %v5691_v27, %v5399_v15  ;;  %v2261_v55 = vrot.slane %v5688_v47, %v5399_v15 }
 0x1b7   : > { %7283 = vst [vmem:[#allocation93_spill] sm:$0xff] %v5727_v19  ;;  %v5735_v46 = vrot.slane %v1597_v37, %v5162_v59  ;;  %v2889_v23 = vrot.slane %v5699_v18, %v5399_v15  ;;  %v5748_v29 = vcombine.high %v5699_v18, %v7219_v48  ;;  %v2240_v27 = vcombine.high %v2239_v4, %v2239_v4 }
 0x1b8   : > { %v5673_v31 = vpop.permute.xlu0 %2865  ;;  %v5766_v18 = vrot.slane %v1922_v36, %v5162_v59  ;;  %v2565_v14 = vcombine.high %v2564_v57, %v2564_v57  ;;  %v2262_v37 = vcombine.high %v2261_v55, %v2261_v55  ;;  %v2586_v44 = vrot.slane %v5727_v19, %v5399_v15 }
 0x1b9   : > { %7274 = vst [vmem:[#allocation84_spill] sm:$0xff] %v5673_v31  ;;  %v5705_v31 = vrot.slane %v685_v40, %v5251_v26  ;;  %v5722_v40 = vpop.permute.xlu1 %1247  ;;  %v1619_v26 = vrot.slane %v1611_v34, %v5399_v15  ;;  %v5740_v34 = vrot.slane %v1612_v53, %v5399_v15  ;;  %7286 = vst [vmem:[#allocation96_spill] sm:$0xff] %v5748_v29 }
 0x1ba   : > { %7282 = vst [vmem:[#allocation92_spill] sm:$0xff] %v5722_v40  ;;  %v1937_v40 = vcombine.high %v1936_v58, %v1936_v58  ;;  %v5757_v53 = vrot.slane %v1915_v28, %v5399_v15  ;;  %v2247_v1 = vrot.slane %v2239_v4, %v5399_v15  ;;  %v2911_v36 = vrot.slane %v5748_v29, %v5399_v15 }
 0x1bb   : > { %7278 = vst [vmem:[#allocation88_spill] sm:$0xff] %v5705_v31  ;;  %7284 = vst [vmem:[#allocation94_spill] sm:$0xff] %v5740_v34  ;;  %v5744_v51 = vcombine.high %v5705_v31, %v7219_v48  ;;  %v5760_v17 = vrot.slane %v1619_v26, %v5162_v59  ;;  %v1944_v48 = vrot.slane %v1936_v58, %v5399_v15 }
 0x1bc   : > { %v5709_v32 = vpop.permute.xlu0 %927  ;;  %v5774_v26 = vrot.slane %v1937_v40, %v5399_v15  ;;  %v3214_v19 = vrot.slane %v5705_v31, %v5399_v15  ;;  %v2572_v40 = vrot.slane %v2564_v57, %v5399_v15  ;;  %v5797_v29 = vrot.slane %v2565_v14, %v5399_v15  ;;  %v455_v14 = vld [vmem:[#allocation2] sm:$0xff] }
 0x1bd   : > { %7279 = vst [vmem:[#allocation89_spill] sm:$0xff] %v5709_v32  ;;  %7285 = vst [vmem:[#allocation95_spill] sm:$0xff] %v5744_v51  ;;  %v5762_v32 = vpop.permute.xlu1 %1572  ;;  %v3236_v4 = vrot.slane %v5744_v51, %v5399_v15  ;;  %v5791_v34 = vrot.slane %v1944_v48, %v5162_v59  ;;  %v2897_v31 = vrot.slane %v2889_v23, %v5399_v15 }
 0x1be   : > { %7288 = vst [vmem:[#allocation98_spill] sm:$0xff] %v5760_v17  ;;  %7289 = vst [vmem:[#allocation99_spill] sm:$0xff] %v5762_v32  ;;  %v5777_v17 = vrot.slane %v2240_v27, %v5399_v15  ;;  %v5801_v32 = vrot.slane %v2262_v37, %v5399_v15  ;;  %v2587_v51 = vcombine.high %v2586_v44, %v2586_v44 }
 0x1bf   : > { %7290 = vst [vmem:[#allocation100_spill] sm:$0xff] %v5774_v26  ;;  %7293 = vst [vmem:[#allocation103_spill] sm:$0xff] %v5791_v34  ;;  %v5804_v28 = vrot.slane %v2247_v1, %v5162_v59  ;;  %v3215_v37 = vcombine.high %v3214_v19, %v3214_v19  ;;  %v852_v1 = vrot.slane %v5302_v43, %v5567_v13  ;;  %v456_v26 = vld [vmem:[#allocation2 + $0x8] sm:$0xff] }
 0x1c0   : > { %v5752_v47 = vpop.permute.xlu0 %1254  ;;  %7291 = vst [vmem:[#allocation101_spill] sm:$0xff] %v5777_v17  ;;  %7295 = vst [vmem:[#allocation105_spill] sm:$0xff] %v5797_v29  ;;  %v5831_v17 = vrot.slane %v2897_v31, %v5162_v59  ;;  %v3244_v31 = vrot.slane %v3236_v4, %v5399_v15 }
 0x1c1   : > { %7287 = vst [vmem:[#allocation97_spill] sm:$0xff] %v5752_v47  ;;  %v2890_v47 = vcombine.high %v2889_v23, %v2889_v23  ;;  %v5793_v27 = vpop.permute.xlu1 %1897  ;;  %7296 = vst [vmem:[#allocation106_spill] sm:$0xff] %v5801_v32  ;;  %v2912_v23 = vcombine.high %v2911_v36, %v2911_v36 }
 0x1c2   : > { %7294 = vst [vmem:[#allocation104_spill] sm:$0xff] %v5793_v27  ;;  %7297 = vst [vmem:[#allocation107_spill] sm:$0xff] %v5804_v28  ;;  %v3237_v27 = vcombine.high %v3236_v4, %v3236_v4  ;;  %v5821_v28 = vrot.slane %v2572_v40, %v5162_v59  ;;  %v459_v40 = vld [vmem:[#allocation4] sm:$0x3] }
 0x1c3   : > { %v5807_v57 = vrot.slane %v2890_v47, %v5399_v15  ;;  %v856_v47 = vrot.slane %v5302_v43, %v5582_v35  ;;  %v5836_v43 = vrot.slane %v2587_v51, %v5399_v15  ;;  %v5849_v63 = vrot.slane %v2912_v23, %v5399_v15 }
 0x1c4   : > { %v5779_v58 = vpop.permute.xlu0 %1579  ;;  %v5852_v51 = vrot.slane %v3215_v37, %v5399_v15  ;;  %v5855_v32 = vrot.slane %v3237_v27, %v5399_v15  ;;  %v5864_v4 = vmul.f32 %v5313_v33, %v459_v40  ;;  %v457_v37 = vld [vmem:[#allocation2 + $0x10] sm:$0xff]  ;;  %v5885_v27 = vrot.slane %v3244_v31, %v5162_v59 }
 0x1c5   : > { %7292 = vst [vmem:[#allocation102_spill] sm:$0xff] %v5779_v58  ;;  %v2269_v58 = vrot.slane %v2261_v55, %v5399_v15  ;;  %v2594_v55 = vrot.slane %v2586_v44, %v5399_v15  ;;  %v5826_v44 = vpop.permute.xlu1 %2222  ;;  %7302 = vst [vmem:[#allocation112_spill] sm:$0xff] %v5849_v63 }
 0x1c6   : > { %7300 = vst [vmem:[#allocation110_spill] sm:$0xff] %v5826_v44  ;;  %v2919_v44 = vrot.slane %v2911_v36, %v5399_v15  ;;  %7303 = vst [vmem:[#allocation113_spill] sm:$0xff] %v5852_v51  ;;  %v860_v36 = vrot.slane %v5290_v3, %v5567_v13 }
 0x1c7   : > { %v5824_v48 = vrot.slane %v2269_v58, %v5162_v59  ;;  %7304 = vst [vmem:[#allocation114_spill] sm:$0xff] %v5855_v32  ;;  %v865_v58 = vmul.f32 %v852_v1, %v455_v14  ;;  %v458_v14 = vld [vmem:[#allocation2 + $0x18] sm:$0xff]  ;;  %7306 = vst [vmem:[#allocation116_spill] sm:$0xff] %v5885_v27  ;;  %v1647_v1 = vmul.f32 %v5735_v46, %v5478_v50 }
 0x1c8   : > { %v5814_v34 = vpop.permute.xlu0 %1904  ;;  %v5877_v33 = vrot.slane %v2919_v44, %v5162_v59  ;;  %v7308_v27 = vld [vmem:[#allocation48_spill] sm:$0xff]  ;;  %v997_v50 = vmul.f32 %v5682_v52, %v5684_v21  ;;  %v7317_v52 = vld [vmem:[#allocation89_spill] sm:$0xff] }
 0x1c9   : > { %7298 = vst [vmem:[#allocation108_spill] sm:$0xff] %v5814_v34  ;;  %7299 = vst [vmem:[#allocation109_spill] sm:$0xff] %v5824_v48  ;;  %v5841_v48 = vrot.slane %v2594_v55, %v5162_v59  ;;  %v3222_v34 = vrot.slane %v3214_v19, %v5399_v15  ;;  %v866_v55 = vmul.f32 %v856_v47, %v456_v26  ;;  %v460_v47 = vld [vmem:[#allocation4 + $0x2] sm:$0x3] }
 0x1ca   : > { %v864_v19 = vrot.slane %v5290_v3, %v5582_v35  ;;  %v5897_v15 = vmul.f32 %v860_v36, %v457_v37  ;;  %v1016_v3 = vmul.f32 %v5297_v20, %v460_v47  ;;  %v995_v26 = vmul.f32 %v5665_v42, %v5432_v22 }
 0x1cb   : > { %7301 = vst [vmem:[#allocation111_spill] sm:$0xff] %v5841_v48  ;;  %v5861_v48 = vpop.permute.xlu1 %2547  ;;  %v5880_v40 = vrot.slane %v3222_v34, %v5162_v59  ;;  %v7307_v47 = vrot.slane %v5632_v6, %v5162_v59 }
 0x1cc   : > { %v5845_v29 = vpop.permute.xlu0 %2229 }
 0x1cd   : > { %7305 = vst [vmem:[#allocation115_spill] sm:$0xff] %v5880_v40  ;;  %v5899_v40 = vmul.f32 %v864_v19, %v458_v14  ;;  %v996_v34 = vmul.f32 %v7307_v47, %v5443_v16  ;;  %v1322_v16 = vmul.f32 %v5694_v10, %v5448_v49  ;;  %v7309_v19 = vrot.slane %v5677_v7, %v5162_v59 }
 0x1cf   : > { %v5901_v31 = vpop.permute.xlu1 %2872  ;;  %v1323_v51 = vmul.f32 %v7309_v19, %v7308_v27  ;;  %v5969_v27 = vmul.f32 %v5766_v18, %v5512_v12 }
 0x1d0   : > { %v5882_v23 = vpop.permute.xlu0 %2554 }
 0x1d3   : > { %v876_v20 = vpop.permute.xlu1 %875 }
 0x1d4   : > { %v884_v44 = vpop.permute.xlu0 %883  ;;  %v888_v36 = vrot.slane %v876_v20, %v5162_v59  ;;  %v892_v37 = vrot.slane %v876_v20, %v5201_v30  ;;  %v1017_v47 = vmul.f32 %v876_v20, %v5487_v41  ;;  %v7310_v41 = vrot.slane %v5720_v9, %v5162_v59  ;;  %v7315_v9 = vld [vmem:[#allocation101_spill] sm:$0xff] }
 0x1d5   : > { %v1018_v14 = vmul.f32 %v884_v44, %v5526_v60  ;;  %v896_v22 = vrot.slane %v884_v44, %v5162_v59  ;;  %v900_v46 = vrot.slane %v884_v44, %v5201_v30  ;;  %v7316_v12 = vrot.slane %v7315_v9, %v5162_v59  ;;  %v7318_v44 = vld [vmem:[#allocation82_spill] sm:$0xff]  ;;  %v7327_v9 = vld [vmem:[#allocation80_spill] sm:$0xff] }
 0x1d6   : > { %v999_v60 = vmul.f32 %v995_v26, %v888_v36  ;;  %v1000_v6 = vmul.f32 %v996_v34, %v892_v37  ;;  %v1648_v7 = vmul.f32 %v7310_v41, %v5503_v11  ;;  %v7312_v26 = vld [vmem:[#allocation64_spill] sm:$0xff]  ;;  %v7314_v11 = vld [vmem:[#allocation70_spill] sm:$0xff]  ;;  %v1019_v21 = vadd.f32 %v1017_v47, %v5864_v4 }
 0x1d7   : > { %v5961_v10 = vadd.f32 %v1018_v14, %v1016_v3  ;;  %v7313_v3 = vld [vmem:[#allocation107_spill] sm:$0xff]  ;;  %v5988_v18 = vmul.f32 %v7316_v12, %v7314_v11  ;;  %v7319_v19 = vrot.slane %v7318_v44, %v5162_v59  ;;  %v7320_v37 = vrot.slane %v5323_v39, %v5567_v13  ;;  %v7323_v47 = vld [vmem:[#allocation38_spill] sm:$0xff]  ;;  %v7325_v11 = vld [vmem:[#allocation105_spill] sm:$0xff] }
 0x1d8   : > { %v1203_v32 = vpop.permute.xlu0 %1202  ;;  %v1003_v24 = vadd.f32 %v999_v60, %v865_v58  ;;  %v1004_v63 = vadd.f32 %v1000_v6, %v866_v55  ;;  %v7311_v58 = vrot.slane %v5757_v53, %v5162_v59  ;;  %v5982_v34 = vmul.f32 %v7313_v3, %v7312_v26  ;;  %v7321_v60 = vld [vmem:[#allocation72_spill] sm:$0xff]  ;;  %v7324_v3 = vld [vmem:[#allocation79_spill] sm:$0xff]  ;;  %v7332_v12 = vld [vmem:[#allocation90_spill] sm:$0xff] }
 0x1d9   : > { %v1215_v42 = vrot.slane %v1203_v32, %v5162_v59  ;;  %v1219_v49 = vrot.slane %v1203_v32, %v5201_v30  ;;  %v998_v53 = vmul.f32 %v7319_v19, %v7317_v52  ;;  %v6000_v6 = vmul.f32 %v5821_v28, %v7321_v60  ;;  %v7328_v28 = vld [vmem:[#allocation84_spill] sm:$0xff] }
 0x1da   : > { %v5978_v55 = vmul.f32 %v7311_v58, %v5547_v45  ;;  %v1001_v45 = vmul.f32 %v997_v50, %v896_v22  ;;  %v1192_v14 = vmul.f32 %v7320_v37, %v1003_v24  ;;  %v7322_v41 = vrot.slane %v5323_v39, %v5582_v35  ;;  %v7333_v37 = vld [vmem:[#allocation34_spill] sm:$0xff] }
 0x1db   : > { %v1326_v20 = vmul.f32 %v1322_v16, %v1215_v42  ;;  %v1327_v4 = vmul.f32 %v1323_v51, %v1219_v49  ;;  %v1105_v26 = vmul.f32 %v5961_v10, %v7323_v47  ;;  %v7326_v22 = vrot.slane %v7325_v11, %v5162_v59  ;;  %v7331_v49 = vld [vmem:[#allocation92_spill] sm:$0xff]  ;;  %v7335_v47 = vld [vmem:[#allocation91_spill] sm:$0xff] }
 0x1dc   : > { %v1211_v36 = vpop.permute.xlu0 %1210  ;;  %v1193_v58 = vmul.f32 %v7322_v41, %v1004_v63  ;;  %v6015_v42 = vmul.f32 %v5831_v17, %v7327_v9  ;;  %v7329_v16 = vrot.slane %v5807_v57, %v5162_v59  ;;  %v1002_v51 = vmul.f32 %v998_v53, %v900_v46  ;;  %v7334_v17 = vld [vmem:[#allocation97_spill] sm:$0xff] }
 0x1dd   : > { %v6011_v50 = vmul.f32 %v7326_v22, %v7324_v3  ;;  %v1324_v52 = vmul.f32 %v7332_v12, %v7331_v49  ;;  %v1223_v44 = vrot.slane %v1211_v36, %v5162_v59  ;;  %v1110_v19 = vsel %vm1106_vm3, %v1105_v26, 0.0  ;;  %v7338_v49 = vld [vmem:[#allocation98_spill] sm:$0xff] }
 0x1de   : > { %v6021_v39 = vmul.f32 %v7329_v16, %v7328_v28  ;;  %v1104_v60 = vmul.f32 %v1019_v21, %v7333_v37  ;;  %v7336_v3 = vrot.slane %v7335_v47, %v5162_v59  ;;  %v1005_v57 = vadd.f32 %v1001_v45, %v5897_v15  ;;  %1111 = vadd.xlane.f32.xlu0 %v1110_v19  ;;  %v7337_v16 = vld [vmem:[#allocation99_spill] sm:$0xff]  ;;  %v7339_v37 = vld [vmem:[#allocation102_spill] sm:$0xff] }
 0x1df   : > { %v6035_v22 = vadd.f32 %v1326_v20, %v1192_v14  ;;  %v1227_v46 = vrot.slane %v1211_v36, %v5201_v30  ;;  %v1331_v53 = vadd.f32 %v1327_v4, %v1193_v58  ;;  %v1649_v12 = vmul.f32 %v7338_v49, %v7337_v16  ;;  %v7342_v20 = vld [vmem:[#allocation45_spill] sm:$0xff]  ;;  %v7345_v16 = vld [vmem:[#allocation104_spill] sm:$0xff]  ;;  %v7346_v49 = vld [vmem:[#allocation103_spill] sm:$0xff] }
 0x1e0   : > { %7330 = vst [vmem:[#allocation48_spill] sm:$0xff] %v6021_v39  ;;  %v6028_v41 = vpop.permute.xlu0 %1527  ;;  %v1325_v11 = vmul.f32 %v7336_v3, %v7334_v17  ;;  %v1107_v9 = vsel %vm1106_vm3, %v1104_v60, 0.0  ;;  %v7340_v17 = vld [vmem:[#allocation94_spill] sm:$0xff]  ;;  %v1006_v14 = vadd.f32 %v1002_v51, %v5899_v40  ;;  %v7343_v58 = vrot.slane %v7342_v20, %v5162_v59  ;;  %v7344_v3 = vld [vmem:[#allocation49_spill] sm:$0xff] }
 0x1e1   : > { %v1540_v26 = vrot.slane %v6028_v41, %v5162_v59  ;;  %v1544_v28 = vrot.slane %v6028_v41, %v5201_v30  ;;  %v7341_v15 = vrot.slane %v7340_v17, %v5162_v59  ;;  %1108 = vadd.xlane.f32.xlu1 %v1107_v9  ;;  %v1328_v19 = vmul.f32 %v1324_v52, %v1223_v44  ;;  %v7347_v17 = vld [vmem:[#allocation61_spill] sm:$0xff]  ;;  %v6066_v52 = vpop.permute.xlu1 %1860 }
 0x1e2   : > { %v1088_v4 = vmul.f32 %v7343_v58, %v1004_v63  ;;  %v1087_v8 = vmul.f32 %v7344_v3, %v1003_v24  ;;  %v6058_v39 = vmul.f32 %v7346_v49, %v7345_v16  ;;  %v7348_v40 = vrot.slane %v5330_v0, %v5567_v13  ;;  %v7352_v58 = vld [vmem:[#allocation50_spill] sm:$0xff]  ;;  %v7354_v3 = vld [vmem:[#allocation53_spill] sm:$0xff] }
 0x1e3   : > { %v1650_v45 = vmul.f32 %v7341_v15, %v7339_v37  ;;  %v1651_v60 = vmul.f32 %v1647_v1, %v1540_v26  ;;  %v1652_v47 = vmul.f32 %v1648_v7, %v1544_v28  ;;  %v1344_v37 = vmul.f32 %v1203_v32, %v7347_v17 }
 0x1e4   : > { %v6054_v25 = vpop.permute.xlu0 %1535  ;;  %v1517_v51 = vmul.f32 %v7348_v40, %v6035_v22  ;;  %v1095_v63 = vsel %vm1091_vm4, %v1088_v4, 0.0  ;;  %v7349_v24 = vrot.slane %v5325_v54, %v5567_v13  ;;  %v1329_v7 = vmul.f32 %v1325_v11, %v1227_v46 }
 0x1e5   : > { %v7350_v44 = vrot.slane %v5330_v0, %v5582_v35  ;;  %1096 = vadd.xlane.f32.xlu0 %v1095_v63  ;;  %v1092_v32 = vsel %vm1091_vm4, %v1087_v8, 0.0  ;;  %v7351_v26 = vrot.slane %v5325_v54, %v5582_v35  ;;  %v1548_v20 = vrot.slane %v6054_v25, %v5162_v59  ;;  %v7355_v54 = vld [vmem:[#allocation20_spill] sm:$0xff] }
 0x1e6   : > { %v1194_v1 = vmul.f32 %v7349_v24, %v1005_v57  ;;  %v6078_v15 = vadd.f32 %v1651_v60, %v1517_v51  ;;  %1093 = vadd.xlane.f32.xlu1 %v1092_v32  ;;  %v7353_v11 = vrot.slane %v7352_v58, %v5162_v59  ;;  %v1089_v8 = vmul.f32 %v7354_v3, %v1005_v57  ;;  %v7356_v60 = vld [vmem:[#allocation69_spill] sm:$0xff]  ;;  %v7362_v3 = vld [vmem:[#allocation47_spill] sm:$0xff] }
 0x1e7   : > { %v1518_v9 = vmul.f32 %v7350_v44, %v1331_v53  ;;  %v1195_v28 = vmul.f32 %v7351_v26, %v1006_v14  ;;  %v1342_v49 = vmul.f32 %v7355_v54, %v1019_v21  ;;  %v1345_v17 = vmul.f32 %v1211_v36, %v7356_v60  ;;  %v7358_v44 = vld [vmem:[#allocation21_spill] sm:$0xff] }
 0x1e8   : > { %v1090_v46 = vmul.f32 %v7353_v11, %v1006_v14  ;;  %v6085_v4 = vadd.f32 %v1328_v19, %v1194_v1  ;;  %v6090_v16 = vpop.permute.xlu0 %1852  ;;  %v1552_v40 = vrot.slane %v6054_v25, %v5201_v30  ;;  %v1653_v21 = vmul.f32 %v1649_v12, %v1548_v20  ;;  %v7361_v20 = vld [vmem:[#allocation36_spill] sm:$0xff] }
 0x1e9   : > { %v6087_v0 = vadd.f32 %v1652_v47, %v1518_v9  ;;  %v1865_v14 = vrot.slane %v6090_v16, %v5162_v59  ;;  %v1333_v19 = vadd.f32 %v1329_v7, %v1195_v28  ;;  %v1098_v47 = vsel %vm1091_vm4, %v1089_v8, 0.0  ;;  %v6111_v9 = vpop.permute.xlu1 %2502 }
 0x1ea   : > { %v1101_v51 = vsel %vm1091_vm4, %v1090_v46, 0.0  ;;  %v1869_v57 = vrot.slane %v6090_v16, %v5201_v30  ;;  %v6102_v63 = vadd.f32 %v1344_v37, %v1342_v49  ;;  %1099 = vadd.xlane.f32.xlu1 %v1098_v47  ;;  %v7357_v36 = vrot.slane %v5338_v2, %v5567_v13  ;;  %v7368_v47 = vld [vmem:[#allocation109_spill] sm:$0xff] }
 0x1eb   : > { %1102 = vadd.xlane.f32.xlu0 %v1101_v51  ;;  %v1976_v1 = vmul.f32 %v5969_v27, %v1865_v14  ;;  %v1343_v7 = vmul.f32 %v7358_v44, %v5961_v10  ;;  %v7359_v32 = vrot.slane %v5343_v61, %v5567_v13  ;;  %v7360_v12 = vrot.slane %v5338_v2, %v5582_v35  ;;  %v7364_v51 = vld [vmem:[#allocation108_spill] sm:$0xff] }
 0x1ec   : > { %v1842_v24 = vmul.f32 %v7357_v36, %v6078_v15  ;;  %v1977_v28 = vmul.f32 %v5978_v55, %v1869_v57  ;;  %v1430_v27 = vmul.f32 %v6102_v63, %v7361_v20  ;;  %v6124_v58 = vpop.permute.xlu0 %2177  ;;  %v1654_v10 = vmul.f32 %v1650_v45, %v1552_v40  ;;  %v7365_v14 = vld [vmem:[#allocation100_spill] sm:$0xff] }
 0x1ed   : > { %v1519_v37 = vmul.f32 %v7359_v32, %v6085_v4  ;;  %v1843_v26 = vmul.f32 %v7360_v12, %v6087_v0  ;;  %v1347_v46 = vadd.f32 %v1345_v17, %v1343_v7  ;;  %v7363_v8 = vrot.slane %v7362_v3, %v5162_v59  ;;  %v7367_v17 = vld [vmem:[#allocation110_spill] sm:$0xff] }
 0x1ee   : > { %v6126_v11 = vadd.f32 %v1976_v1, %v1842_v24  ;;  %v1432_v2 = vsel %vm1106_vm3, %v1430_v27, 0.0  ;;  %v2190_v55 = vrot.slane %v6124_v58, %v5162_v59  ;;  %v2194_v60 = vrot.slane %v6124_v58, %v5201_v30 }
 0x1ef   : > { %v1415_v54 = vmul.f32 %v7363_v8, %v1331_v53  ;;  %v6131_v49 = vadd.f32 %v1977_v28, %v1843_v26  ;;  %v7366_v45 = vrot.slane %v7365_v14, %v5162_v59  ;;  %v2299_v57 = vmul.f32 %v7368_v47, %v7367_v17  ;;  %1433 = vadd.xlane.f32.xlu0 %v1432_v2  ;;  %v7369_v53 = vld [vmem:[#allocation40_spill] sm:$0xff]  ;;  %v7374_v8 = vld [vmem:[#allocation106_spill] sm:$0xff]  ;;  %v6175_v14 = vpop.permute.xlu1 %2827 }
 0x1f0   : > { %v6144_v36 = vadd.f32 %v1653_v21, %v1519_v37  ;;  %v1431_v24 = vmul.f32 %v1347_v46, %v7369_v53  ;;  %v1873_v1 = vrot.slane %v6066_v52, %v5162_v59  ;;  %v7370_v44 = vrot.slane %v5343_v61, %v5582_v35  ;;  %v6157_v28 = vpop.permute.xlu0 %2185  ;;  %v7373_v61 = vld [vmem:[#allocation54_spill] sm:$0xff] }
 0x1f1   : > { %v1975_v40 = vmul.f32 %v7366_v45, %v7364_v51  ;;  %v7371_v32 = vrot.slane %v5381_v56, %v5567_v13  ;;  %v2301_v26 = vmul.f32 %v5982_v34, %v2190_v55  ;;  %v7372_v37 = vrot.slane %v5381_v56, %v5582_v35  ;;  %v7376_v34 = vld [vmem:[#allocation111_spill] sm:$0xff] }
 0x1f2   : > { %v1520_v7 = vmul.f32 %v7370_v44, %v1333_v19  ;;  %v1435_v21 = vsel %vm1106_vm3, %v1431_v24, 0.0  ;;  %v2302_v27 = vmul.f32 %v5988_v18, %v2194_v60  ;;  %v1414_v3 = vmul.f32 %v7373_v61, %v6035_v22  ;;  %v7385_v61 = vld [vmem:[#allocation77_spill] sm:$0xff] }
 0x1f3   : > { %v2167_v12 = vmul.f32 %v7371_v32, %v6126_v11  ;;  %v2168_v20 = vmul.f32 %v7372_v37, %v6131_v49  ;;  %v7375_v2 = vrot.slane %v7374_v8, %v5162_v59  ;;  %v6173_v55 = vmul.f32 %v7376_v34, %v5861_v48  ;;  %1436 = vadd.xlane.f32.xlu1 %v1435_v21  ;;  %v7381_v32 = vld [vmem:[#allocation55_spill] sm:$0xff]  ;;  %v6221_v21 = vpop.permute.xlu1 %3152 }
 0x1f4   : > { %v6177_v45 = vadd.f32 %v1654_v10, %v1520_v7  ;;  %v1421_v56 = vsel %vm1091_vm4, %v1415_v54, 0.0  ;;  %v7377_v18 = vrot.slane %v5836_v43, %v5162_v59  ;;  %v7378_v48 = vrot.slane %v5385_v38, %v5567_v13  ;;  %v7379_v10 = vld [vmem:[#allocation52_spill] sm:$0xff]  ;;  %v6204_v24 = vpop.permute.xlu0 %2510 }
 0x1f5   : > { %v2300_v51 = vmul.f32 %v7375_v2, %v5845_v29  ;;  %v1877_v29 = vrot.slane %v6066_v52, %v5201_v30  ;;  %1422 = vadd.xlane.f32.xlu0 %v1421_v56  ;;  %v7380_v17 = vrot.slane %v7379_v10, %v5162_v59  ;;  %v6197_v54 = vmul.f32 %v5877_v33, %v5901_v31 }
 0x1f6   : > { %v6184_v22 = vmul.f32 %v7377_v18, %v5882_v23  ;;  %v1844_v60 = vmul.f32 %v7378_v48, %v6144_v36  ;;  %v1978_v43 = vmul.f32 %v6058_v39, %v1873_v1  ;;  %v2515_v23 = vrot.slane %v6111_v9, %v5162_v59  ;;  %v7382_v39 = vld [vmem:[#allocation67_spill] sm:$0xff] }
 0x1f7   : > { %v1417_v47 = vmul.f32 %v7380_v17, %v1333_v19  ;;  %v6202_v53 = vadd.f32 %v2301_v26, %v2167_v12  ;;  %v6206_v44 = vadd.f32 %v2302_v27, %v2168_v20  ;;  %v1418_v7 = vsel %vm1091_vm4, %v1414_v3, 0.0  ;;  %v7384_v27 = vld [vmem:[#allocation83_spill] sm:$0xff] }
 0x1f8   : > { %v2198_v19 = vrot.slane %v6157_v28, %v5162_v59  ;;  %v1416_v33 = vmul.f32 %v7381_v32, %v6085_v4  ;;  %v2519_v31 = vrot.slane %v6111_v9, %v5201_v30  ;;  %v1669_v1 = vmul.f32 %v6028_v41, %v7382_v39  ;;  %1419 = vadd.xlane.f32.xlu1 %v1418_v7  ;;  %v7386_v41 = vld [vmem:[#allocation86_spill] sm:$0xff]  ;;  %v6242_v18 = vpop.permute.xlu0 %2835  ;;  %v7392_v32 = vld [vmem:[#allocation87_spill] sm:$0xff] }
 0x1f9   : > { %v7383_v12 = vrot.slane %v5385_v38, %v5582_v35  ;;  %v1427_v37 = vsel %vm1091_vm4, %v1417_v47, 0.0  ;;  %v1979_v20 = vmul.f32 %v1975_v40, %v1877_v29  ;;  %v1995_v4 = vmul.f32 %v6066_v52, %v7384_v27  ;;  %v7388_v52 = vld [vmem:[#allocation22_spill] sm:$0xff]  ;;  %v7395_v27 = vld [vmem:[#allocation43_spill] sm:$0xff] }
 0x1fa   : > { %v1670_v3 = vmul.f32 %v6054_v25, %v7385_v61  ;;  %v6228_v8 = vadd.f32 %v1978_v43, %v1844_v60  ;;  %1428 = vadd.xlane.f32.xlu0 %v1427_v37  ;;  %v6232_v2 = vmul.f32 %v6111_v9, %v7386_v41  ;;  %v7387_v38 = vrot.slane %v5390_v5, %v5567_v13  ;;  %v7390_v60 = vld [vmem:[#allocation23_spill] sm:$0xff] }
 0x1fb   : > { %v1845_v26 = vmul.f32 %v7383_v12, %v6177_v45  ;;  %v2202_v40 = vrot.slane %v6157_v28, %v5201_v30  ;;  %v1667_v56 = vmul.f32 %v7388_v52, %v6102_v63  ;;  %v7389_v25 = vrot.slane %v5390_v5, %v5582_v35  ;;  %v7394_v12 = vld [vmem:[#allocation78_spill] sm:$0xff]  ;;  %v7399_v52 = vld [vmem:[#allocation48_spill] sm:$0xff] }
 0x1fc   : > { %v2492_v34 = vmul.f32 %v7387_v38, %v6202_v53  ;;  %v2303_v9 = vmul.f32 %v2299_v57, %v2198_v19  ;;  %v1424_v48 = vsel %vm1091_vm4, %v1416_v33, 0.0  ;;  %v1668_v10 = vmul.f32 %v7390_v60, %v1347_v46  ;;  %v7397_v38 = vld [vmem:[#allocation56_spill] sm:$0xff] }
 0x1fd   : > { %v2493_v29 = vmul.f32 %v7389_v25, %v6206_v44  ;;  %v2626_v17 = vmul.f32 %v6000_v6, %v2515_v23  ;;  %v2627_v47 = vmul.f32 %v6011_v50, %v2519_v31  ;;  %v6252_v43 = vadd.f32 %v1979_v20, %v1845_v26  ;;  %1425 = vadd.xlane.f32.xlu1 %v1424_v48  ;;  %v6266_v23 = vpop.permute.xlu1 %3116  ;;  %v7393_v31 = vld [vmem:[#allocation41_spill] sm:$0xff] }
 0x1fe   : > { %v1671_v63 = vadd.f32 %v1669_v1, %v1667_v56  ;;  %v2840_v7 = vrot.slane %v6175_v14, %v5162_v59  ;;  %v2844_v5 = vrot.slane %v6175_v14, %v5201_v30  ;;  %v7391_v57 = vrot.slane %v5392_v62, %v5567_v13  ;;  %v6271_v1 = vpop.permute.xlu0 %3160 }
 0x1ff   : > { %v1672_v46 = vadd.f32 %v1670_v3, %v1668_v10  ;;  %v6264_v6 = vmul.f32 %v6175_v14, %v7392_v32  ;;  %v2304_v50 = vmul.f32 %v2300_v51, %v2202_v40  ;;  %v6268_v33 = vadd.f32 %v2626_v17, %v2492_v34  ;;  %v7402_v10 = vld [vmem:[#allocation39_spill] sm:$0xff] }
 0x200   : > { %v2169_v19 = vmul.f32 %v7391_v57, %v6228_v8  ;;  %v1755_v39 = vmul.f32 %v1671_v63, %v7393_v31  ;;  %v1994_v26 = vmul.f32 %v6090_v16, %v7394_v12  ;;  %v6277_v20 = vadd.f32 %v2627_v47, %v2493_v29  ;;  %v7404_v47 = vld [vmem:[#allocation25_spill] sm:$0xff] }
 0x201   : > { %v1756_v61 = vmul.f32 %v1672_v46, %v7395_v27  ;;  %v7396_v51 = vrot.slane %v5392_v62, %v5582_v35  ;;  %v2523_v3 = vrot.slane %v6204_v24, %v5162_v59  ;;  %v7398_v16 = vrot.slane %v7397_v38, %v5162_v59  ;;  %v7400_v62 = vld [vmem:[#allocation59_spill] sm:$0xff]  ;;  %v3184_v12 = vpop.permute.xlu1 %3183  ;;  %v7409_v27 = vld [vmem:[#allocation58_spill] sm:$0xff] }
 0x202   : > { %v6275_v37 = vadd.f32 %v2303_v9, %v2169_v19  ;;  %v1757_v41 = vsel %vm1106_vm3, %v1755_v39, 0.0  ;;  %v2951_v40 = vmul.f32 %v6015_v42, %v2840_v7  ;;  %v2952_v56 = vmul.f32 %v7399_v52, %v2844_v5  ;;  %v7401_v9 = vld [vmem:[#allocation81_spill] sm:$0xff]  ;;  %v2880_v42 = vpop.permute.xlu0 %2879  ;;  %v7412_v52 = vld [vmem:[#allocation60_spill] sm:$0xff] }
 0x203   : > { %v2170_v14 = vmul.f32 %v7396_v51, %v6252_v43  ;;  %v1740_v34 = vmul.f32 %v7398_v16, %v6087_v0  ;;  %1758 = vadd.xlane.f32.xlu0 %v1757_v41  ;;  %v1760_v25 = vsel %vm1106_vm3, %v1756_v61, 0.0  ;;  %v1739_v29 = vmul.f32 %v7400_v62, %v6078_v15  ;;  %v7406_v15 = vld [vmem:[#allocation37_spill] sm:$0xff] }
 0x204   : > { %v2319_v48 = vmul.f32 %v6124_v58, %v7401_v9  ;;  %v7403_v17 = vrot.slane %v7402_v10, %v5567_v13  ;;  %1761 = vadd.xlane.f32.xlu1 %v1760_v25  ;;  %v1992_v7 = vmul.f32 %v7404_v47, %v1671_v63  ;;  %v7405_v5 = vrot.slane %v7402_v10, %v5582_v35  ;;  %v7411_v41 = vld [vmem:[#allocation85_spill] sm:$0xff]  ;;  %v7417_v47 = vld [vmem:[#allocation46_spill] sm:$0xff] }
 0x205   : > { %v6298_v60 = vadd.f32 %v2304_v50, %v2170_v14  ;;  %v7407_v58 = vrot.slane %v7406_v15, %v5567_v13  ;;  %v2527_v32 = vrot.slane %v6204_v24, %v5201_v30  ;;  %v7408_v50 = vld [vmem:[#allocation27_spill] sm:$0xff]  ;;  %v2628_v39 = vmul.f32 %v6173_v55, %v2523_v3 }
 0x206   : > { %v2817_v0 = vmul.f32 %v7403_v17, %v6268_v33  ;;  %v2818_v57 = vmul.f32 %v7405_v5, %v6277_v20  ;;  %v1993_v31 = vmul.f32 %v7408_v50, %v1672_v46  ;;  %v1746_v63 = vsel %vm1091_vm4, %v1740_v34, 0.0  ;;  %v7416_v17 = vld [vmem:[#allocation44_spill] sm:$0xff] }
 0x207   : > { %v2494_v19 = vmul.f32 %v7407_v58, %v6275_v37  ;;  %v7410_v61 = vrot.slane %v7409_v27, %v5162_v59  ;;  %v1996_v14 = vadd.f32 %v1994_v26, %v1992_v7  ;;  %v2320_v38 = vmul.f32 %v6157_v28, %v7411_v41  ;;  %1747 = vadd.xlane.f32.xlu0 %v1746_v63  ;;  %v6335_v28 = vpop.permute.xlu0 %3124  ;;  %v7418_v5 = vld [vmem:[#allocation24_spill] sm:$0xff] }
 0x208   : > { %v1743_v16 = vsel %vm1091_vm4, %v1739_v29, 0.0  ;;  %v1741_v46 = vmul.f32 %v7412_v52, %v6144_v36  ;;  %v1997_v25 = vadd.f32 %v1995_v4, %v1993_v31  ;;  %v6327_v55 = vadd.f32 %v2951_v40, %v2817_v0  ;;  %v7414_v36 = vld [vmem:[#allocation115_spill] sm:$0xff]  ;;  %v7419_v58 = vld [vmem:[#allocation96_spill] sm:$0xff] }
 0x209   : > { %v1742_v51 = vmul.f32 %v7410_v61, %v6177_v45  ;;  %v3129_v3 = vrot.slane %v6266_v23, %v5567_v13  ;;  %v3133_v34 = vrot.slane %v6266_v23, %v5582_v35  ;;  %v7413_v45 = vld [vmem:[#allocation93_spill] sm:$0xff]  ;;  %1744 = vadd.xlane.f32.xlu1 %v1743_v16  ;;  %v6337_v62 = vadd.f32 %v2952_v56, %v2818_v57 }
 0x20a   : > { %v2645_v26 = vmul.f32 %v6204_v24, %v7413_v45  ;;  %v2629_v29 = vmul.f32 %v6184_v22, %v2527_v32  ;;  %v3272_v4 = vmul.f32 %v7414_v36, %v3184_v12  ;;  %v7415_v40 = vrot.slane %v7406_v15, %v5582_v35  ;;  %v7420_v32 = vld [vmem:[#allocation112_spill] sm:$0xff] }
 0x20b   : > { %v6345_v10 = vadd.f32 %v2628_v39, %v2494_v19  ;;  %v3165_v23 = vrot.slane %v6221_v21, %v5162_v59  ;;  %v1752_v24 = vsel %vm1091_vm4, %v1742_v51, 0.0  ;;  %v2080_v0 = vmul.f32 %v1996_v14, %v7416_v17  ;;  %v3191_v39 = vpop.permute.xlu0 %3190  ;;  %v7422_v12 = vld [vmem:[#allocation28_spill] sm:$0xff]  ;;  %v3198_v51 = vpop.permute.xlu1 %3197  ;;  %v7430_v17 = vld [vmem:[#allocation42_spill] sm:$0xff] }
 0x20c   : > { %v2495_v9 = vmul.f32 %v7415_v40, %v6298_v60  ;;  %v2848_v56 = vrot.slane %v6242_v18, %v5162_v59  ;;  %1753 = vadd.xlane.f32.xlu0 %v1752_v24  ;;  %v1749_v22 = vsel %vm1091_vm4, %v1741_v46, 0.0  ;;  %v2081_v7 = vmul.f32 %v1997_v25, %v7417_v47  ;;  %v7423_v46 = vld [vmem:[#allocation62_spill] sm:$0xff]  ;;  %v7428_v40 = vld [vmem:[#allocation116_spill] sm:$0xff] }
 0x20d   : > { %v2317_v57 = vmul.f32 %v7418_v5, %v1996_v14  ;;  %v6357_v15 = vmul.f32 %v3129_v3, %v6327_v55  ;;  %v2970_v19 = vmul.f32 %v6242_v18, %v7419_v58  ;;  %1750 = vadd.xlane.f32.xlu1 %v1749_v22  ;;  %v7421_v50 = vrot.slane %v7420_v32, %v5162_v59  ;;  %v7434_v58 = vld [vmem:[#allocation66_spill] sm:$0xff] }
 0x20e   : > { %v2318_v63 = vmul.f32 %v7422_v12, %v1997_v25  ;;  %v3143_v27 = vmul.f32 %v3133_v34, %v6337_v62  ;;  %v3276_v61 = vmul.f32 %v3272_v4, %v3165_v23  ;;  %v6366_v41 = vadd.f32 %v2629_v29, %v2495_v9  ;;  %v7425_v29 = vld [vmem:[#allocation68_spill] sm:$0xff] }
 0x20f   : > { %v2950_v31 = vmul.f32 %v7421_v50, %v2880_v42  ;;  %v2321_v14 = vadd.f32 %v2319_v48, %v2317_v57  ;;  %v2852_v16 = vrot.slane %v6242_v18, %v5201_v30  ;;  %v2082_v52 = vsel %vm1106_vm3, %v2080_v0, 0.0  ;;  %v7426_v48 = vld [vmem:[#allocation113_spill] sm:$0xff] }
 0x210   : > { %v7424_v3 = vrot.slane %v7423_v46, %v5162_v59  ;;  %v2322_v45 = vadd.f32 %v2320_v38, %v2318_v63  ;;  %v2953_v25 = vmul.f32 %v6197_v54, %v2848_v56  ;;  %2083 = vadd.xlane.f32.xlu0 %v2082_v52  ;;  %v2085_v34 = vsel %vm1106_vm3, %v2081_v7, 0.0  ;;  %v7429_v38 = vld [vmem:[#allocation26_spill] sm:$0xff]  ;;  %v7438_v52 = vld [vmem:[#allocation73_spill] sm:$0xff] }
 0x211   : > { %v2064_v36 = vmul.f32 %v7425_v29, %v6126_v11  ;;  %v7427_v4 = vrot.slane %v7426_v48, %v5162_v59  ;;  %v3274_v9 = vmul.f32 %v7428_v40, %v3198_v51  ;;  %v3173_v23 = vrot.slane %v6271_v1, %v5162_v59  ;;  %2086 = vadd.xlane.f32.xlu1 %v2085_v34  ;;  %v7433_v7 = vld [vmem:[#allocation30_spill] sm:$0xff]  ;;  %v7440_v48 = vld [vmem:[#allocation95_spill] sm:$0xff] }
 0x212   : > { %v2065_v42 = vmul.f32 %v7424_v3, %v6131_v49  ;;  %v2954_v24 = vmul.f32 %v2950_v31, %v2852_v16  ;;  %v3205_v49 = vpop.permute.xlu0 %3204  ;;  %v2642_v54 = vmul.f32 %v7429_v38, %v2321_v14  ;;  %v7431_v0 = vrot.slane %v7430_v17, %v5582_v35  ;;  %v7436_v31 = vld [vmem:[#allocation114_spill] sm:$0xff] }
 0x213   : > { %v3273_v18 = vmul.f32 %v7427_v4, %v3191_v39  ;;  %v7432_v11 = vrot.slane %v7430_v17, %v5567_v13  ;;  %v3169_v47 = vrot.slane %v6221_v21, %v5201_v30  ;;  %v2643_v5 = vmul.f32 %v7433_v7, %v2322_v45 }
 0x214   : > { %v2820_v56 = vmul.f32 %v7431_v0, %v6366_v41  ;;  %v2071_v57 = vsel %vm1091_vm4, %v2065_v42, 0.0  ;;  %v7435_v32 = vrot.slane %v7434_v58, %v5162_v59  ;;  %v7437_v39 = vrot.slane %v7436_v31, %v5162_v59 }
 0x215   : > { %v2819_v22 = vmul.f32 %v7432_v11, %v6345_v10  ;;  %v6406_v63 = vadd.f32 %v6232_v2, %v2642_v54  ;;  %2072 = vadd.xlane.f32.xlu0 %v2071_v57  ;;  %v2068_v51 = vsel %vm1091_vm4, %v2064_v36, 0.0  ;;  %v3277_v16 = vmul.f32 %v3273_v18, %v3169_v47  ;;  %v7439_v2 = vld [vmem:[#allocation29_spill] sm:$0xff]  ;;  %v7445_v11 = vld [vmem:[#allocation35_spill] sm:$0xff] }
 0x216   : > { %v2067_v50 = vmul.f32 %v7435_v32, %v6252_v43  ;;  %v3275_v12 = vmul.f32 %v7437_v39, %v3205_v49  ;;  %v2066_v46 = vmul.f32 %v7438_v52, %v6228_v8  ;;  %v6411_v3 = vadd.f32 %v2645_v26, %v2643_v5  ;;  %2069 = vadd.xlane.f32.xlu1 %v2068_v51  ;;  %v7441_v26 = vld [vmem:[#allocation32_spill] sm:$0xff]  ;;  %v7448_v47 = vld [vmem:[#allocation31_spill] sm:$0xff]  ;;  %v7453_v32 = vld [vmem:[#allocation33_spill] sm:$0xff] }
 0x217   : > { %v6413_v42 = vadd.f32 %v2954_v24, %v2820_v56  ;;  %v3141_v43 = vrot.slane %v6335_v28, %v5582_v35  ;;  %v3177_v34 = vrot.slane %v6271_v1, %v5201_v30  ;;  %v2967_v29 = vmul.f32 %v7439_v2, %v6406_v63  ;;  %v7442_v24 = vld [vmem:[#allocation51_spill] sm:$0xff] }
 0x218   : > { %v3295_v36 = vmul.f32 %v6271_v1, %v7440_v48  ;;  %v6423_v4 = vadd.f32 %v2953_v25, %v2819_v22  ;;  %v3137_v8 = vrot.slane %v6335_v28, %v5567_v13  ;;  %v2968_v18 = vmul.f32 %v7441_v26, %v6411_v3  ;;  %v7443_v1 = vld [vmem:[#allocation63_spill] sm:$0xff]  ;;  %v7444_v13 = vld [vmem:[#allocation88_spill] sm:$0xff] }
 0x219   : > { %v2077_v35 = vsel %vm1091_vm4, %v2067_v50, 0.0  ;;  %v3279_v40 = vmul.f32 %v3275_v12, %v3177_v34  ;;  %v2405_v49 = vmul.f32 %v2321_v14, %v7442_v24  ;;  %v6432_v38 = vadd.f32 %v6264_v6, %v2967_v29  ;;  %v7446_v14 = vld [vmem:[#allocation71_spill] sm:$0xff]  ;;  %v7455_v29 = vld [vmem:[#allocation76_spill] sm:$0xff] }
 0x21a   : > { %2078 = vadd.xlane.f32.xlu0 %v2077_v35  ;;  %v2074_v54 = vsel %vm1091_vm4, %v2066_v46, 0.0  ;;  %v2406_v25 = vmul.f32 %v2322_v45, %v7443_v1  ;;  %v6436_v17 = vadd.f32 %v2970_v19, %v2968_v18  ;;  %v6438_v0 = vadd.f32 %v3277_v16, %v3143_v27  ;;  %v7449_v19 = vld [vmem:[#allocation74_spill] sm:$0xff]  ;;  %v7454_v34 = vld [vmem:[#allocation75_spill] sm:$0xff]  ;;  %v6500_v18 = vld [vmem:[%s4972_s30 + $0xc] sm:$0x3] }
 0x21b   : > { %v3294_v28 = vmul.f32 %v6221_v21, %v7444_v13  ;;  %v3145_v56 = vmul.f32 %v3141_v43, %v6413_v42  ;;  %2075 = vadd.xlane.f32.xlu1 %v2074_v54  ;;  %v7447_v6 = vcombine.high %v7446_v14, %v7446_v14  ;;  %v3292_v7 = vmul.f32 %v7448_v47, %v6432_v38  ;;  %v7451_v21 = vld [vmem:[#allocation57_spill] sm:$0xff]  ;;  %v7457_v35 = vld [vmem:[#allocation15_spill] sm:$0xff] }
 0x21c   : > { %v3144_v45 = vmul.f32 %v3137_v8, %v6423_v4  ;;  %v7450_v27 = vrot.slane %v7449_v19, %v5162_v59  ;;  %v7452_v57 = vrot.slane %v7451_v21, %v7445_v11  ;;  %v3293_v50 = vmul.f32 %v7453_v32, %v6436_v17  ;;  %3421 = vst.msk [vmem:[#allocation2 + $0x8] sm:$0xff] %vm1091_vm4, %v6438_v0  ;;  %v7458_v1 = vld [vmem:[#allocation65_spill] sm:$0xff]  ;;  %v6523_v19 = vld [vmem:[%s4972_s30 + $0xe] sm:$0x3] }
 0x21d   : > { %v2368_v22 = vrot.slane %v7447_v6, %v7445_v11  ;;  %v2407_v31 = vsel %vm1106_vm3, %v2405_v49, 0.0  ;;  %v6463_v39 = vadd.f32 %v3294_v28, %v3292_v7  ;;  %v6466_v12 = vadd.f32 %v3276_v61, %v6357_v15 }
 0x21e   : > { %v2390_v5 = vmul.f32 %v7450_v27, %v6206_v44  ;;  %v2372_v58 = vrot.slane %v7452_v57, %v5162_v59  ;;  %v6468_v51 = vadd.f32 %v3279_v40, %v3145_v56  ;;  %2408 = vadd.xlane.f32.xlu0 %v2407_v31  ;;  %v2410_v44 = vsel %vm1106_vm3, %v2406_v25, 0.0  ;;  %v7460_v27 = vld [vmem:[#allocation16_spill] sm:$0xff] }
 0x21f   : > { %v6472_v52 = vadd.f32 %v3295_v36, %v3293_v50  ;;  %v3278_v46 = vmul.f32 %v3274_v9, %v3173_v23  ;;  %2411 = vadd.xlane.f32.xlu1 %v2410_v44  ;;  %v2384_v43 = vrot.slane %v2368_v22, %v5162_v59  ;;  %v2678_v2 = vrot.slane %v7454_v34, %v7445_v11 }
 0x220   : > { %v2389_v16 = vmul.f32 %v2372_v58, %v6202_v53  ;;  %v2657_v15 = vcombine.high %v7455_v29, %v7455_v29  ;;  %3424 = vst.msk [vmem:[#allocation4] sm:$0x3] %vm1106_vm3, %v6463_v39  ;;  %v7456_v53 = vrot.slane %v7446_v14, %v7445_v11  ;;  %v4875_v23 = vmov 0   ;;  %v7459_v14 = vld [vmem:[#allocation19_spill] sm:$0xff] }
 0x221   : > { %3420 = vst.msk [vmem:[#allocation2] sm:$0xff] %vm1091_vm4, %v6466_v12  ;;  %3423 = vst.msk [vmem:[#allocation2 + $0x18] sm:$0xff] %vm1091_vm4, %v6468_v51  ;;  %v6491_v9 = vadd.f32 %v3278_v46, %v3144_v45  ;;  %4668 = vset.pattern.permute.xlu0 %v4875_v23  ;;  %4667 = vset.pattern.permute.xlu1 %v4875_v23  ;;  %v2396_v48 = vsel %vm1091_vm4, %v2390_v5, 0.0  ;;  %v2392_v36 = vmul.f32 %v2384_v43, %v6298_v60  ;;  %v7461_v57 = vmov 0.0  }
 0x222   : > { %v2380_v61 = vrot.slane %v7456_v53, %v5162_v59  ;;  %3425 = vst.msk [vmem:[#allocation4 + $0x2] sm:$0x3] %vm1106_vm3, %v6472_v52  ;;  %2397 = vadd.xlane.f32.xlu0 %v2396_v48  ;;  %v2393_v8 = vsel %vm1091_vm4, %v2389_v16, 0.0  ;;  %v555_v40 = vcombine.low %v6500_v18, %v7457_v35  ;;  %v2671_v24 = vrot.slane %v2657_v15, %v7445_v11 }
 0x223   : > { %3422 = vst.msk [vmem:[#allocation2 + $0x10] sm:$0xff] %vm1091_vm4, %v6491_v9  ;;  %2394 = vadd.xlane.f32.xlu1 %v2393_v8  ;;  %v2679_v49 = vcombine.high %v2678_v2, %v2678_v2  ;;  %v2664_v60 = vrot.slane %v7455_v29, %v7445_v11  ;;  %v2402_v54 = vsel %vm1091_vm4, %v2392_v36, 0.0  ;;  %v2731_v13 = vmul.f32 %v6411_v3, %v7454_v34 }
 0x224   : > { %v2391_v26 = vmul.f32 %v2380_v61, %v6275_v37  ;;  %v2730_v37 = vmul.f32 %v6406_v63, %v7458_v1  ;;  %v2701_v28 = vrot.slane %v2671_v24, %v5162_v59  ;;  %v562_v6 = vrot.slane %v555_v40, %v7459_v14  ;;  %4615 = vmatprep.mubr.msk.bf16.mxu0 %vm4881_vm6, %v7461_v57 }
 0x225   : > { %v2693_v56 = vrot.slane %v2679_v49, %v7445_v11  ;;  %v2697_v22 = vrot.slane %v2664_v60, %v5162_v59  ;;  %v2686_v47 = vrot.slane %v2678_v2, %v7445_v11  ;;  %v2735_v45 = vsel %vm1106_vm3, %v2731_v13, 0.0 }
 0x226   : > { %2403 = vadd.xlane.f32.xlu0 %v2402_v54  ;;  %v2399_v25 = vsel %vm1091_vm4, %v2391_v26, 0.0  ;;  %v2732_v7 = vsel %vm1106_vm3, %v2730_v37, 0.0  ;;  %v2715_v63 = vmul.f32 %v2701_v28, %v6277_v20  ;;  %v565_v5 = vcombine.low %v6523_v19, %v7460_v27 }
 0x227   : > { %2400 = vadd.xlane.f32.xlu1 %v2399_v25  ;;  %v2714_v3 = vmul.f32 %v2697_v22, %v6268_v33  ;;  %v2709_v21 = vrot.slane %v2693_v56, %v5162_v59  ;;  %v563_v58 = vcombine.high %v562_v6, %v7461_v57  ;;  %v2981_v32 = vrot.slane %v562_v6, %v7445_v11 }
 0x228   : > { %v2705_v50 = vrot.slane %v2686_v47, %v5162_v59  ;;  %v2721_v20 = vsel %vm1091_vm4, %v2715_v63, 0.0  ;;  %v572_v46 = vrot.slane %v565_v5, %v7459_v14  ;;  %v3055_v29 = vmul.f32 %v6432_v38, %v562_v6 }
 0x229   : > { %v2717_v31 = vmul.f32 %v2709_v21, %v6366_v41  ;;  %v2718_v33 = vsel %vm1091_vm4, %v2714_v3, 0.0  ;;  %v3003_v16 = vrot.slane %v563_v58, %v7445_v11  ;;  %v2982_v43 = vcombine.high %v2981_v32, %v2981_v32 }
 0x22a   : > { %2733 = vadd.xlane.f32.xlu0 %v2732_v7  ;;  %v2716_v44 = vmul.f32 %v2705_v50, %v6345_v10  ;;  %v2989_v34 = vrot.slane %v2981_v32, %v7445_v11  ;;  %v3056_v15 = vmul.f32 %v6436_v17, %v563_v58  ;;  %v573_v53 = vcombine.high %v572_v46, %v7461_v57 }
 0x22b   : > { %2736 = vadd.xlane.f32.xlu1 %v2735_v45  ;;  %v2727_v2 = vsel %vm1091_vm4, %v2717_v31, 0.0  ;;  %v2996_v10 = vrot.slane %v2982_v43, %v7445_v11  ;;  %v3004_v61 = vcombine.high %v3003_v16, %v3003_v16  ;;  %v3306_v23 = vrot.slane %v572_v46, %v7445_v11  ;;  %v7462_v31 = vld [vmem:[#allocation10_spill] sm:$0xff]  ;;  %v7466_v43 = vld [vmem:[#allocation13_spill] sm:$0xff] }
 0x22c   : > { %v2724_v41 = vsel %vm1091_vm4, %v2716_v44, 0.0  ;;  %v3022_v48 = vrot.slane %v2989_v34, %v5162_v59  ;;  %v3057_v36 = vsel %vm1106_vm3, %v3055_v29, 0.0  ;;  %v3380_v8 = vmul.f32 %v6463_v39, %v572_v46  ;;  %v6594_v44 = vld [vmem:[%s4972_s30 + $0x2] sm:$0x3]  ;;  %v6601_v46 = vld [vmem:[%s4972_s30 + $0x4] sm:$0x3] }
 0x22d   : > { %v3060_v38 = vsel %vm1106_vm3, %v3056_v15, 0.0  ;;  %v3026_v17 = vrot.slane %v2996_v10, %v5162_v59  ;;  %v3328_v40 = vrot.slane %v573_v53, %v7445_v11  ;;  %v3018_v24 = vrot.slane %v3004_v61, %v7445_v11  ;;  %v6608_v34 = vld [vmem:[%s4972_s30 + $0x6] sm:$0x3]  ;;  %v6615_v29 = vld [vmem:[%s4972_s30 + $0x8] sm:$0x3] }
 0x22e   : > { %2722 = vadd.xlane.f32.xlu0 %v2721_v20  ;;  %v3039_v26 = vmul.f32 %v3022_v48, %v6327_v55  ;;  %v3307_v49 = vcombine.high %v3306_v23, %v3306_v23  ;;  %v3011_v60 = vrot.slane %v3003_v16, %v7445_v11  ;;  %v3382_v54 = vsel %vm1106_vm3, %v3380_v8, 0.0  ;;  %v7465_v16 = vld [vmem:[#allocation12_spill] sm:$0xff] }
 0x22f   : > { %2719 = vadd.xlane.f32.xlu1 %v2718_v33  ;;  %v3040_v1 = vmul.f32 %v3026_v17, %v6337_v62  ;;  %v3381_v37 = vmul.f32 %v6472_v52, %v573_v53  ;;  %v3034_v55 = vrot.slane %v3018_v24, %v5162_v59  ;;  %v3329_v13 = vcombine.high %v3328_v40, %v3328_v40  ;;  %v6587_v33 = vld [vmem:[%s4972_s30] sm:$0x3] }
 0x230   : > { %v3043_v39 = vsel %vm1091_vm4, %v3039_v26, 0.0  ;;  %v3321_v25 = vrot.slane %v3307_v49, %v7445_v11  ;;  %v3030_v28 = vrot.slane %v3011_v60, %v5162_v59  ;;  %v3314_v56 = vrot.slane %v3306_v23, %v7445_v11  ;;  %v6622_v23 = vld [vmem:[%s4972_s30 + $0xa] sm:$0x3] }
 0x231   : > { %v3046_v6 = vsel %vm1091_vm4, %v3040_v1, 0.0  ;;  %v3042_v22 = vmul.f32 %v3034_v55, %v6413_v42  ;;  %v3385_v62 = vsel %vm1106_vm3, %v3381_v37, 0.0  ;;  %v3343_v7 = vrot.slane %v3329_v13, %v7445_v11 }
 0x232   : > { %2728 = vadd.xlane.f32.xlu0 %v2727_v2  ;;  %v3041_v47 = vmul.f32 %v3030_v28, %v6423_v4  ;;  %v3351_v52 = vrot.slane %v3321_v25, %v5162_v59  ;;  %v3347_v63 = vrot.slane %v3314_v56, %v5162_v59  ;;  %v3336_v45 = vrot.slane %v3328_v40, %v7445_v11  ;;  %v7467_v2 = vld [vmem:[#allocation14_spill] sm:$0xff] }
 0x233   : > { %2725 = vadd.xlane.f32.xlu1 %v2724_v41  ;;  %v3052_v3 = vsel %vm1091_vm4, %v3042_v22, 0.0  ;;  %v3359_v4 = vrot.slane %v3343_v7, %v5162_v59 }
 0x234   : > { %v3365_v5 = vmul.f32 %v3351_v52, %v6438_v0  ;;  %v3049_v42 = vsel %vm1091_vm4, %v3041_v47, 0.0  ;;  %v3364_v21 = vmul.f32 %v3347_v63, %v6466_v12  ;;  %v3355_v58 = vrot.slane %v3336_v45, %v5162_v59 }
 0x235   : > { %v3367_v11 = vmul.f32 %v3359_v4, %v6468_v51  ;;  %v7463_v51 = vld [vmem:[#allocation9_spill] sm:$0xff] }
 0x236   : > { %3058 = vadd.xlane.f32.xlu0 %v3057_v36  ;;  %v3371_v32 = vsel %vm1091_vm4, %v3365_v5, 0.0  ;;  %v3368_v50 = vsel %vm1091_vm4, %v3364_v21, 0.0  ;;  %v3366_v0 = vmul.f32 %v3355_v58, %v6491_v9  ;;  %v7464_v9 = vld [vmem:[#allocation11_spill] sm:$0xff] }
 0x237   : > { %3061 = vadd.xlane.f32.xlu1 %v3060_v38  ;;  %v3377_v12 = vsel %vm1091_vm4, %v3367_v11, 0.0 }
 0x238   : > { %v3374_v20 = vsel %vm1091_vm4, %v3366_v0, 0.0 }
 0x23a   : > { %3383 = vadd.xlane.f32.xlu0 %v3382_v54 }
 0x23b   : > { %3044 = vadd.xlane.f32.xlu1 %v3043_v39 }
 0x23e   : > { %3047 = vadd.xlane.f32.xlu0 %v3046_v6 }
 0x23f   : > { %3386 = vadd.xlane.f32.xlu1 %v3385_v62 }
 0x242   : > { %3053 = vadd.xlane.f32.xlu0 %v3052_v3 }
 0x243   : > { %3050 = vadd.xlane.f32.xlu1 %v3049_v42 }
 0x246   : > { %3372 = vadd.xlane.f32.xlu0 %v3371_v32 }
 0x247   : > { %3369 = vadd.xlane.f32.xlu1 %v3368_v50 }
 0x24a   : > { %3378 = vadd.xlane.f32.xlu0 %v3377_v12 }
 0x24b   : > { %3375 = vadd.xlane.f32.xlu1 %v3374_v20 }
 0x25c   : > { %3433 = vrot.lane.b32.xlu1 %v7462_v31, %s4876_s25 }
 0x260   : > { %3437 = vrot.lane.b32.xlu1 %v7463_v51, %s4876_s25  ;;  %3431 = vrot.lane.b32.xlu0 %v6587_v33, %s4876_s25 }
 0x264   : > { %3441 = vrot.lane.b32.xlu1 %v7464_v9, %s4876_s25  ;;  %3435 = vrot.lane.b32.xlu0 %v6594_v44, %s4876_s25 }
 0x267   : > { %v1112_v41 = vpop.xlane.xlu0 %1111 }
 0x268   : > { %3445 = vrot.lane.b32.xlu1 %v7465_v16, %s4876_s25  ;;  %3439 = vrot.lane.b32.xlu0 %v6601_v46, %s4876_s25  ;;  %v1114_v15 = vand.u32 2147483647, %v1112_v41 }
 0x26a   : > { %v1109_v10 = vpop.xlane.xlu1 %1108  ;;  %v1116_v53 = vmax.f32 %v1114_v15, 1.0 }
 0x26b   : > { %v1113_v61 = vand.u32 2147483647, %v1109_v10 }
 0x26c   : > { %3449 = vrot.lane.b32.xlu1 %v7466_v43, %s4876_s25  ;;  %3443 = vrot.lane.b32.xlu0 %v6608_v34, %s4876_s25  ;;  %4702 = vrcp.f32 %v1116_v53 }
 0x26d   : > { %v1115_v48 = vmax.f32 %v1113_v61, 1.0 }
 0x26e   : > { %v1097_v36 = vpop.xlane.xlu0 %1096 }
 0x26f   : > { %v1094_v8 = vpop.xlane.xlu1 %1093  ;;  %4704 = vrcp.f32 %v1115_v48 }
 0x270   : > { %3453 = vrot.lane.b32.xlu1 %v7467_v2, %s4876_s25  ;;  %3447 = vrot.lane.b32.xlu0 %v6615_v29, %s4876_s25 }
 0x273   : > { %v1100_v26 = vpop.xlane.xlu1 %1099 }
 0x274   : > { %3457 = vrot.lane.b32.xlu1 %v7457_v35, %s4876_s25  ;;  %3451 = vrot.lane.b32.xlu0 %v6622_v23, %s4876_s25  ;;  %v1103_v38 = vpop.xlane.xlu0 %1102 }
 0x278   : > { %3455 = vrot.lane.b32.xlu0 %v6500_v18, %s4876_s25  ;;  %v1434_v35 = vpop.xlane.xlu0 %1433 }
 0x279   : > { %v1438_v17 = vand.u32 2147483647, %v1434_v35  ;;  %v4703_v54 = vpop.eup %4702 }
 0x27a   : > { %v1132_v28 = vrot.slane %v4703_v54, %v5162_v59  ;;  %v1136_v6 = vrot.slane %v4703_v54, %v5201_v30 }
 0x27b   : > { %v1440_v40 = vmax.f32 %v1438_v17, 1.0 }
 0x27c   : > { %3459 = vrot.lane.b32.xlu0 %v6523_v19, %s4876_s25  ;;  %v1437_v24 = vpop.xlane.xlu1 %1436  ;;  %v4705_v1 = vpop.eup %4704  ;;  %v1143_v22 = vmul.f32 %v1132_v28, %v1100_v26  ;;  %v1144_v47 = vmul.f32 %v1136_v6, %v1103_v38 }
 0x27d   : > { %v1439_v49 = vand.u32 2147483647, %v1437_v24  ;;  %4706 = vrcp.f32 %v1440_v40  ;;  %v1128_v37 = vrot.slane %v4705_v1, %v5201_v30  ;;  %v1124_v55 = vrot.slane %v4705_v1, %v5162_v59 }
 0x27e   : > { %v1423_v60 = vpop.xlane.xlu0 %1422 }
 0x27f   : > { %v1441_v39 = vmax.f32 %v1439_v49, 1.0  ;;  %v1142_v25 = vmul.f32 %v1128_v37, %v1097_v36  ;;  %v1141_v13 = vmul.f32 %v1124_v55, %v1094_v8 }
 0x281   : > { %v1420_v18 = vpop.xlane.xlu1 %1419  ;;  %4708 = vrcp.f32 %v1441_v39  ;;  %3587 = vperm.xlu0 %4668, %v1142_v25   ;;  %3584 = vperm.xlu1 %4667, %v1141_v13  }
 0x283   : > { %v1429_v19 = vpop.xlane.xlu0 %1428 }
 0x285   : > { %3590 = vperm.xlu1 %4667, %v1143_v22  }
 0x286   : > { %v1426_v56 = vpop.xlane.xlu1 %1425 }
 0x289   : > { %3593 = vperm.xlu1 %4667, %v1144_v47  }
 0x28a   : > { %v4707_v63 = vpop.eup %4706 }
 0x28b   : > { %v1449_v3 = vrot.slane %v4707_v63, %v5162_v59  ;;  %v1453_v4 = vrot.slane %v4707_v63, %v5201_v30 }
 0x28c   : > { %v1759_v62 = vpop.xlane.xlu0 %1758 }
 0x28d   : > { %v1763_v52 = vand.u32 2147483647, %v1759_v62  ;;  %v1762_v7 = vpop.xlane.xlu1 %1761  ;;  %v1466_v58 = vmul.f32 %v1449_v3, %v1420_v18  ;;  %v1467_v0 = vmul.f32 %v1453_v4, %v1423_v60 }
 0x28e   : > { %v1764_v45 = vand.u32 2147483647, %v1762_v7  ;;  %v4709_v11 = vpop.eup %4708 }
 0x28f   : > { %v1765_v5 = vmax.f32 %v1763_v52, 1.0  ;;  %3596 = vperm.xlu1 %4667, %v1466_v58   ;;  %v1457_v12 = vrot.slane %v4709_v11, %v5162_v59  ;;  %v1461_v51 = vrot.slane %v4709_v11, %v5201_v30 }
 0x290   : > { %v1766_v42 = vmax.f32 %v1764_v45, 1.0  ;;  %v1748_v21 = vpop.xlane.xlu0 %1747 }
 0x291   : > { %4710 = vrcp.f32 %v1765_v5  ;;  %v1468_v9 = vmul.f32 %v1457_v12, %v1426_v56  ;;  %v1469_v53 = vmul.f32 %v1461_v51, %v1429_v19 }
 0x292   : > { %v1745_v32 = vpop.xlane.xlu1 %1744  ;;  %4712 = vrcp.f32 %v1766_v42 }
 0x293   : > { %3599 = vperm.xlu1 %4667, %v1467_v0  }
 0x295   : > { %v1754_v50 = vpop.xlane.xlu0 %1753 }
 0x296   : > { %v1751_v20 = vpop.xlane.xlu1 %1750 }
 0x297   : > { %3602 = vperm.xlu1 %4667, %v1468_v9  }
 0x299   : > { %v2084_v31 = vpop.xlane.xlu0 %2083 }
 0x29a   : > { %v2088_v16 = vand.u32 2147483647, %v2084_v31  ;;  %v2087_v43 = vpop.xlane.xlu1 %2086 }
 0x29b   : > { %v2089_v2 = vand.u32 2147483647, %v2087_v43  ;;  %3605 = vperm.xlu1 %4667, %v1469_v53  }
 0x29c   : > { %v2090_v41 = vmax.f32 %v2088_v16, 1.0 }
 0x29d   : > { %v2091_v15 = vmax.f32 %v2089_v2, 1.0 }
 0x29e   : > { %v2073_v10 = vpop.xlane.xlu0 %2072  ;;  %4714 = vrcp.f32 %v2090_v41  ;;  %v4711_v48 = vpop.eup %4710 }
 0x29f   : > { %v2070_v61 = vpop.xlane.xlu1 %2069  ;;  %4716 = vrcp.f32 %v2091_v15  ;;  %v4713_v36 = vpop.eup %4712  ;;  %v1774_v8 = vrot.slane %v4711_v48, %v5162_v59  ;;  %v1778_v35 = vrot.slane %v4711_v48, %v5201_v30 }
 0x2a0   : > { %v1782_v38 = vrot.slane %v4713_v36, %v5162_v59  ;;  %v1786_v54 = vrot.slane %v4713_v36, %v5201_v30 }
 0x2a1   : > { %v1791_v17 = vmul.f32 %v1774_v8, %v1745_v32  ;;  %v1792_v60 = vmul.f32 %v1778_v35, %v1748_v21 }
 0x2a2   : > { %v1793_v24 = vmul.f32 %v1782_v38, %v1751_v20  ;;  %v1794_v13 = vmul.f32 %v1786_v54, %v1754_v50 }
 0x2a3   : > { %v2079_v26 = vpop.xlane.xlu0 %2078  ;;  %3608 = vperm.xlu1 %4667, %v1791_v17  }
 0x2a4   : > { %v2076_v40 = vpop.xlane.xlu1 %2075  ;;  %3614 = vperm.xlu0 %4668, %v1793_v24  }
 0x2a7   : > { %v2409_v49 = vpop.xlane.xlu0 %2408  ;;  %3611 = vperm.xlu1 %4667, %v1792_v60  }
 0x2a8   : > { %v2413_v1 = vand.u32 2147483647, %v2409_v49  ;;  %v2412_v39 = vpop.xlane.xlu1 %2411 }
 0x2a9   : > { %v2414_v37 = vand.u32 2147483647, %v2412_v39 }
 0x2aa   : > { %v2415_v55 = vmax.f32 %v2413_v1, 1.0 }
 0x2ab   : > { %v2416_v18 = vmax.f32 %v2414_v37, 1.0  ;;  %v2398_v25 = vpop.xlane.xlu0 %2397  ;;  %v4715_v19 = vpop.eup %4714  ;;  %3617 = vperm.xlu1 %4667, %v1794_v13  }
 0x2ac   : > { %4718 = vrcp.f32 %v2415_v55  ;;  %v2395_v28 = vpop.xlane.xlu1 %2394  ;;  %v4717_v56 = vpop.eup %4716  ;;  %v2103_v6 = vrot.slane %v4715_v19, %v5201_v30  ;;  %v2099_v22 = vrot.slane %v4715_v19, %v5162_v59 }
 0x2ad   : > { %4720 = vrcp.f32 %v2416_v18  ;;  %v2111_v7 = vrot.slane %v4717_v56, %v5201_v30  ;;  %v2107_v63 = vrot.slane %v4717_v56, %v5162_v59 }
 0x2ae   : > { %v2117_v47 = vmul.f32 %v2103_v6, %v2073_v10  ;;  %v2116_v52 = vmul.f32 %v2099_v22, %v2070_v61 }
 0x2af   : > { %v2404_v62 = vpop.xlane.xlu0 %2403  ;;  %v2119_v5 = vmul.f32 %v2111_v7, %v2079_v26  ;;  %v2118_v42 = vmul.f32 %v2107_v63, %v2076_v40 }
 0x2b0   : > { %v2401_v45 = vpop.xlane.xlu1 %2400  ;;  %3620 = vperm.xlu0 %4668, %v2116_v52   ;;  %3623 = vperm.xlu1 %4667, %v2117_v47  }
 0x2b3   : > { %v2734_v3 = vpop.xlane.xlu0 %2733 }
 0x2b4   : > { %v2738_v21 = vand.u32 2147483647, %v2734_v3  ;;  %v2737_v4 = vpop.xlane.xlu1 %2736  ;;  %3626 = vperm.xlu0 %4668, %v2118_v42   ;;  %3629 = vperm.xlu1 %4667, %v2119_v5  }
 0x2b5   : > { %v2739_v58 = vand.u32 2147483647, %v2737_v4 }
 0x2b6   : > { %v2740_v32 = vmax.f32 %v2738_v21, 1.0 }
 0x2b7   : > { %v2741_v11 = vmax.f32 %v2739_v58, 1.0  ;;  %v2723_v50 = vpop.xlane.xlu0 %2722 }
 0x2b8   : > { %4722 = vrcp.f32 %v2740_v32  ;;  %v2720_v0 = vpop.xlane.xlu1 %2719 }
 0x2b9   : > { %v4719_v12 = vpop.eup %4718  ;;  %4724 = vrcp.f32 %v2741_v11 }
 0x2ba   : > { %v4721_v20 = vpop.eup %4720  ;;  %v2428_v31 = vrot.slane %v4719_v12, %v5201_v30  ;;  %v2424_v51 = vrot.slane %v4719_v12, %v5162_v59 }
 0x2bb   : > { %v2729_v9 = vpop.xlane.xlu0 %2728  ;;  %v2436_v2 = vrot.slane %v4721_v20, %v5201_v30  ;;  %v2432_v41 = vrot.slane %v4721_v20, %v5162_v59 }
 0x2bc   : > { %v2442_v16 = vmul.f32 %v2428_v31, %v2398_v25  ;;  %v2441_v43 = vmul.f32 %v2424_v51, %v2395_v28  ;;  %v2726_v15 = vpop.xlane.xlu1 %2725 }
 0x2bd   : > { %v2444_v53 = vmul.f32 %v2436_v2, %v2404_v62  ;;  %v2443_v61 = vmul.f32 %v2432_v41, %v2401_v45 }
 0x2be   : > { %3632 = vperm.xlu0 %4668, %v2441_v43   ;;  %3635 = vperm.xlu1 %4667, %v2442_v16  }
 0x2bf   : > { %v3059_v10 = vpop.xlane.xlu0 %3058 }
 0x2c0   : > { %v3063_v48 = vand.u32 2147483647, %v3059_v10  ;;  %v3062_v36 = vpop.xlane.xlu1 %3061 }
 0x2c1   : > { %v3064_v8 = vand.u32 2147483647, %v3062_v36 }
 0x2c2   : > { %v3065_v38 = vmax.f32 %v3063_v48, 1.0  ;;  %3638 = vperm.xlu0 %4668, %v2443_v61   ;;  %3641 = vperm.xlu1 %4667, %v2444_v53  }
 0x2c3   : > { %v3066_v26 = vmax.f32 %v3064_v8, 1.0  ;;  %v3384_v35 = vpop.xlane.xlu0 %3383 }
 0x2c4   : > { %4726 = vrcp.f32 %v3065_v38  ;;  %v3388_v17 = vand.u32 2147483647, %v3384_v35  ;;  %v3045_v40 = vpop.xlane.xlu1 %3044 }
 0x2c5   : > { %v4723_v24 = vpop.eup %4722  ;;  %4728 = vrcp.f32 %v3066_v26 }
 0x2c6   : > { %v4725_v49 = vpop.eup %4724  ;;  %v2753_v60 = vrot.slane %v4723_v24, %v5201_v30  ;;  %v2749_v54 = vrot.slane %v4723_v24, %v5162_v59  ;;  %v3390_v1 = vmax.f32 %v3388_v17, 1.0 }
 0x2c7   : > { %v2761_v39 = vrot.slane %v4725_v49, %v5201_v30  ;;  %v3048_v37 = vpop.xlane.xlu0 %3047  ;;  %v2757_v25 = vrot.slane %v4725_v49, %v5162_v59 }
 0x2c8   : > { %v2767_v55 = vmul.f32 %v2753_v60, %v2723_v50  ;;  %v2766_v18 = vmul.f32 %v2749_v54, %v2720_v0  ;;  %4730 = vrcp.f32 %v3390_v1  ;;  %v3387_v13 = vpop.xlane.xlu1 %3386  ;;  %v7469_v60 = vld [vmem:[#allocation17_spill] sm:$0xff] }
 0x2c9   : > { %v3389_v28 = vand.u32 2147483647, %v3387_v13  ;;  %v2769_v6 = vmul.f32 %v2761_v39, %v2729_v9  ;;  %v2768_v22 = vmul.f32 %v2757_v25, %v2726_v15 }
 0x2ca   : > { %3647 = vperm.xlu1 %4667, %v2767_v55   ;;  %3644 = vperm.xlu0 %4668, %v2766_v18  }
 0x2cb   : > { %v3391_v19 = vmax.f32 %v3389_v28, 1.0  ;;  %v3054_v56 = vpop.xlane.xlu0 %3053 }
 0x2cc   : > { %v3051_v62 = vpop.xlane.xlu1 %3050 }
 0x2cd   : > { %4732 = vrcp.f32 %v3391_v19 }
 0x2ce   : > { %3653 = vperm.xlu1 %4667, %v2769_v6   ;;  %3650 = vperm.xlu0 %4668, %v2768_v22  }
 0x2cf   : > { %v3373_v47 = vpop.xlane.xlu0 %3372 }
 0x2d0   : > { %v3370_v7 = vpop.xlane.xlu1 %3369 }
 0x2d1   : > { %v4727_v52 = vpop.eup %4726 }
 0x2d2   : > { %v4729_v63 = vpop.eup %4728  ;;  %v3074_v45 = vrot.slane %v4727_v52, %v5162_v59  ;;  %v3078_v3 = vrot.slane %v4727_v52, %v5201_v30 }
 0x2d3   : > { %v3379_v5 = vpop.xlane.xlu0 %3378  ;;  %v3086_v4 = vrot.slane %v4729_v63, %v5201_v30  ;;  %v3082_v58 = vrot.slane %v4729_v63, %v5162_v59 }
 0x2d4   : > { %v3091_v42 = vmul.f32 %v3074_v45, %v3045_v40  ;;  %v3092_v21 = vmul.f32 %v3078_v3, %v3048_v37  ;;  %v3376_v11 = vpop.xlane.xlu1 %3375  ;;  %v7468_v40 = vlaneseq }
 0x2d5   : > { %v4731_v32 = vpop.eup %4730  ;;  %v3094_v0 = vmul.f32 %v3086_v4, %v3054_v56  ;;  %v3093_v12 = vmul.f32 %v3082_v58, %v3051_v62 }
 0x2d6   : > { %3659 = vperm.xlu1 %4667, %v3092_v21   ;;  %3656 = vperm.xlu0 %4668, %v3091_v42   ;;  %v3403_v20 = vrot.slane %v4731_v32, %v5201_v30  ;;  %v3399_v31 = vrot.slane %v4731_v32, %v5162_v59  ;;  %v3680_v24 = vand.u32 127, %v7468_v40 }
 0x2d7   : > { %v3432_v50 = vpop.permute.xlu0 %3431 }
 0x2d8   : > { %v3417_v9 = vmul.f32 %v3403_v20, %v3373_v47  ;;  %v3416_v16 = vmul.f32 %v3399_v31, %v3370_v7  ;;  %v3434_v41 = vpop.permute.xlu1 %3433  ;;  %v6684_v54 = vsub.s32 %v3680_v24, %v7469_v60 }
 0x2d9   : > { %v3465_v1 = vcombine.low %v3432_v50, %v3434_v41 }
 0x2da   : > { %v4733_v51 = vpop.eup %4732  ;;  %3665 = vperm.xlu1 %4667, %v3094_v0   ;;  %3662 = vperm.xlu0 %4668, %v3093_v12  }
 0x2db   : > { %v3411_v43 = vrot.slane %v4733_v51, %v5201_v30  ;;  %v3407_v2 = vrot.slane %v4733_v51, %v5162_v59  ;;  %v3436_v15 = vpop.permute.xlu0 %3435  ;;  %v3472_v25 = vrot.slane %v3465_v1, %v7459_v14 }
 0x2dc   : > { %v3438_v61 = vpop.permute.xlu1 %3437 }
 0x2dd   : > { %v3419_v10 = vmul.f32 %v3411_v43, %v3379_v5  ;;  %v3418_v53 = vmul.f32 %v3407_v2, %v3376_v11  ;;  %v3473_v47 = vcombine.high %v3472_v25, %v7461_v57  ;;  %v3476_v45 = vcombine.low %v3436_v15, %v3438_v61 }
 0x2de   : > { %3671 = vperm.xlu1 %4667, %v3417_v9   ;;  %3668 = vperm.xlu0 %4668, %v3416_v16  }
 0x2df   : > { %v3440_v48 = vpop.permute.xlu0 %3439  ;;  %v3483_v4 = vrot.slane %v3476_v45, %v7459_v14 }
 0x2e0   : > { %v3442_v36 = vpop.permute.xlu1 %3441 }
 0x2e1   : > { %v3484_v31 = vcombine.high %v3483_v4, %v7461_v57  ;;  %v3487_v43 = vcombine.low %v3440_v48, %v3442_v36 }
 0x2e2   : > { %3677 = vperm.xlu1 %4667, %v3419_v10   ;;  %3674 = vperm.xlu0 %4668, %v3418_v53  }
 0x2e3   : > { %v6664_v8 = vpop.permute.xlu0 %3443  ;;  %v3494_v53 = vrot.slane %v3487_v43, %v7459_v14 }
 0x2e4   : > { %v6666_v38 = vpop.permute.xlu1 %3445 }
 0x2e5   : > { %v3498_v36 = vcombine.low %v6664_v8, %v6666_v38 }
 0x2e6   : > { %3461 = vrot.lane.b32.xlu1 %v7460_v27, %s4876_s25  ;;  %s4778_s25 = scalar_lea.vmem %s4476_s24, 64 }
 0x2e7   : > { %v6668_v30 = vpop.permute.xlu0 %3447  ;;  %p4779_p6 = scmp.ne.s32.totalorder %s4476_s24, %s4778_s25  ;;  %p4786_p10 = scmp.lt.s32.totalorder %s4778_s25, %s4778_s25 }
 0x2e8   : > { %v6670_v59 = vpop.permute.xlu1 %3449 }
 0x2e9   : > { %p4780_p7 = pnand %p4779_p6, %p4631_p5  ;;  %p4787_p11 = por %p4786_p10, %p4785_p9 }
 0x2eb   : > { %v6672_v26 = vpop.permute.xlu0 %3451  ;;  %p4781_p8 = pneg %p4780_p7 }
 0x2ec   : > { %v6674_v35 = vpop.permute.xlu1 %3453 }
 0x2ed   : > { %p4788_p12 = pnand %p4787_p11, %p4781_p8 }
 0x2ef   : > { %v6676_v17 = vpop.permute.xlu0 %3455 }
 0x2f0   : > { %v6681_v27 = vpop.permute.xlu1 %3457 }
 0x2f3   : > { %v6679_v49 = vpop.permute.xlu0 %3459 }
 0x2fc   : > { %v3588_v39 = vpop.permute.xlu0 %3587  ;;  %v3585_v37 = vpop.permute.xlu1 %3584 }
 0x2fd   : > { %v3688_v55 = vrot.slane %v3588_v39, %v6684_v54  ;;  %v3684_v18 = vrot.slane %v3585_v37, %v6684_v54 }
 0x2ff   : > { %v3810_v13 = vsel %vm3809_vm5, %v3688_v55, %v3684_v18  ;;  %v3495_v55 = vcombine.high %v3494_v53, %v7461_v57 }
 0x300   : > { %v3591_v28 = vpop.permute.xlu1 %3590  ;;  %v6690_v19 = vmul.f32 %v3810_v13, %v3472_v25 }
 0x301   : > { %v3692_v22 = vrot.slane %v3591_v28, %v6684_v54 }
 0x302   : > { %v3858_v56 = vsel %vm1106_vm3, %v6690_v19, 0.0 }
 0x303   : > { %3859 = vadd.xlane.f32.xlu0 %v3858_v56 }
 0x304   : > { %v3594_v6 = vpop.permute.xlu1 %3593 }
 0x305   : > { %v3696_v62 = vrot.slane %v3594_v6, %v6684_v54 }
 0x307   : > { %v3811_v52 = vsel %vm3809_vm5, %v3696_v62, %v3692_v22  ;;  %v3505_v22 = vrot.slane %v3498_v36, %v7459_v14 }
 0x308   : > { %v6698_v63 = vmul.f32 %v3811_v52, %v3473_v47 }
 0x30a   : > { %v3597_v7 = vpop.permute.xlu1 %3596  ;;  %v3861_v3 = vsel %vm1106_vm3, %v6698_v63, 0.0 }
 0x30b   : > { %3862 = vadd.xlane.f32.xlu1 %v3861_v3  ;;  %v3700_v42 = vrot.slane %v3597_v7, %v6684_v54 }
 0x30e   : > { %v3600_v5 = vpop.permute.xlu1 %3599 }
 0x30f   : > { %v3704_v21 = vrot.slane %v3600_v5, %v6684_v54  ;;  %v3506_v5 = vcombine.high %v3505_v22, %v7461_v57 }
 0x311   : > { %v3812_v58 = vsel %vm3809_vm5, %v3704_v21, %v3700_v42 }
 0x312   : > { %v3603_v32 = vpop.permute.xlu1 %3602  ;;  %v6706_v11 = vmul.f32 %v3812_v58, %v3483_v4  ;;  %v3509_v4 = vcombine.low %v6668_v30, %v6670_v59 }
 0x313   : > { %v3708_v12 = vrot.slane %v3603_v32, %v6684_v54 }
 0x314   : > { %v3864_v50 = vsel %vm1106_vm3, %v6706_v11, 0.0 }
 0x315   : > { %3865 = vadd.xlane.f32.xlu0 %v3864_v50 }
 0x316   : > { %v3606_v0 = vpop.permute.xlu1 %3605 }
 0x317   : > { %v3712_v20 = vrot.slane %v3606_v0, %v6684_v54 }
 0x319   : > { %v3813_v51 = vsel %vm3809_vm5, %v3712_v20, %v3708_v12  ;;  %v3516_v20 = vrot.slane %v3509_v4, %v7459_v14 }
 0x31a   : > { %v6714_v16 = vmul.f32 %v3813_v51, %v3484_v31 }
 0x31c   : > { %v3867_v2 = vsel %vm1106_vm3, %v6714_v16, 0.0 }
 0x31d   : > { %3868 = vadd.xlane.f32.xlu0 %v3867_v2 }
 0x31e   : > { %v3609_v9 = vpop.permute.xlu1 %3608 }
 0x31f   : > { %v3716_v15 = vrot.slane %v3609_v9, %v6684_v54  ;;  %v3615_v61 = vpop.permute.xlu0 %3614 }
 0x320   : > { %v3724_v39 = vrot.slane %v3615_v61, %v6684_v54 }
 0x322   : > { %v3612_v41 = vpop.permute.xlu1 %3611 }
 0x323   : > { %v3720_v10 = vrot.slane %v3612_v41, %v6684_v54  ;;  %v3517_v41 = vcombine.high %v3516_v20, %v7461_v57 }
 0x325   : > { %v3814_v40 = vsel %vm3809_vm5, %v3720_v10, %v3716_v15 }
 0x326   : > { %v3618_v24 = vpop.permute.xlu1 %3617  ;;  %v6722_v1 = vmul.f32 %v3814_v40, %v3494_v53  ;;  %v3520_v53 = vcombine.low %v6672_v26, %v6674_v35 }
 0x327   : > { %v3728_v48 = vrot.slane %v3618_v24, %v6684_v54 }
 0x328   : > { %v3870_v37 = vsel %vm1106_vm3, %v6722_v1, 0.0  ;;  %v3527_v36 = vrot.slane %v3520_v53, %v7459_v14 }
 0x329   : > { %3871 = vadd.xlane.f32.xlu0 %v3870_v37  ;;  %v3815_v18 = vsel %vm3809_vm5, %v3728_v48, %v3724_v39 }
 0x32a   : > { %v6732_v28 = vmul.f32 %v3815_v18, %v3495_v55 }
 0x32b   : > { %v3621_v25 = vpop.permute.xlu0 %3620  ;;  %v3624_v13 = vpop.permute.xlu1 %3623 }
 0x32c   : > { %v3732_v56 = vrot.slane %v3621_v25, %v6684_v54  ;;  %v3736_v6 = vrot.slane %v3624_v13, %v6684_v54  ;;  %v3873_v8 = vsel %vm1106_vm3, %v6732_v28, 0.0 }
 0x32d   : > { %3874 = vadd.xlane.f32.xlu1 %v3873_v8  ;;  %v3531_v8 = vcombine.low %v6676_v17, %v6681_v27 }
 0x32e   : > { %v3816_v38 = vsel %vm3809_vm5, %v3736_v6, %v3732_v56  ;;  %v3528_v56 = vcombine.high %v3527_v36, %v7461_v57 }
 0x32f   : > { %v3627_v62 = vpop.permute.xlu0 %3626  ;;  %v3630_v47 = vpop.permute.xlu1 %3629  ;;  %v6740_v52 = vmul.f32 %v3816_v38, %v3505_v22 }
 0x330   : > { %v3740_v7 = vrot.slane %v3627_v62, %v6684_v54  ;;  %v3744_v45 = vrot.slane %v3630_v47, %v6684_v54 }
 0x331   : > { %v3876_v3 = vsel %vm1106_vm3, %v6740_v52, 0.0 }
 0x332   : > { %3877 = vadd.xlane.f32.xlu0 %v3876_v3  ;;  %v3817_v42 = vsel %vm3809_vm5, %v3744_v45, %v3740_v7  ;;  %v3538_v3 = vrot.slane %v3531_v8, %v7459_v14 }
 0x333   : > { %v6748_v21 = vmul.f32 %v3817_v42, %v3506_v5 }
 0x335   : > { %v3879_v58 = vsel %vm1106_vm3, %v6748_v21, 0.0 }
 0x336   : > { %3880 = vadd.xlane.f32.xlu1 %v3879_v58 }
 0x339   : > { %v3633_v32 = vpop.permute.xlu0 %3632  ;;  %v3636_v50 = vpop.permute.xlu1 %3635 }
 0x33a   : > { %v3748_v0 = vrot.slane %v3633_v32, %v6684_v54  ;;  %v3752_v12 = vrot.slane %v3636_v50, %v6684_v54  ;;  %v3539_v50 = vcombine.high %v3538_v3, %v7461_v57 }
 0x33c   : > { %v3818_v31 = vsel %vm3809_vm5, %v3752_v12, %v3748_v0 }
 0x33d   : > { %v3639_v51 = vpop.permute.xlu0 %3638  ;;  %v3642_v9 = vpop.permute.xlu1 %3641  ;;  %v6758_v43 = vmul.f32 %v3818_v31, %v3516_v20 }
 0x33e   : > { %v3756_v30 = vrot.slane %v3639_v51, %v6684_v54  ;;  %v3760_v59 = vrot.slane %v3642_v9, %v6684_v54 }
 0x33f   : > { %v3882_v2 = vsel %vm1106_vm3, %v6758_v43, 0.0 }
 0x340   : > { %3883 = vadd.xlane.f32.xlu0 %v3882_v2  ;;  %v3819_v15 = vsel %vm3809_vm5, %v3760_v59, %v3756_v30 }
 0x341   : > { %v6766_v10 = vmul.f32 %v3819_v15, %v3517_v41 }
 0x343   : > { %v3885_v61 = vsel %vm1106_vm3, %v6766_v10, 0.0 }
 0x344   : > { %3886 = vadd.xlane.f32.xlu1 %v3885_v61 }
 0x345   : > { %v3645_v40 = vpop.permute.xlu0 %3644  ;;  %v3648_v24 = vpop.permute.xlu1 %3647 }
 0x346   : > { %v3764_v39 = vrot.slane %v3645_v40, %v6684_v54  ;;  %v3768_v48 = vrot.slane %v3648_v24, %v6684_v54 }
 0x348   : > { %v3820_v37 = vsel %vm3809_vm5, %v3768_v48, %v3764_v39 }
 0x349   : > { %v3651_v55 = vpop.permute.xlu0 %3650  ;;  %v3654_v18 = vpop.permute.xlu1 %3653  ;;  %v6776_v25 = vmul.f32 %v3820_v37, %v3527_v36 }
 0x34a   : > { %v3772_v26 = vrot.slane %v3651_v55, %v6684_v54  ;;  %v3776_v35 = vrot.slane %v3654_v18, %v6684_v54 }
 0x34b   : > { %v3888_v13 = vsel %vm1106_vm3, %v6776_v25, 0.0 }
 0x34c   : > { %3889 = vadd.xlane.f32.xlu0 %v3888_v13  ;;  %v3821_v6 = vsel %vm3809_vm5, %v3776_v35, %v3772_v26 }
 0x34d   : > { %v6784_v22 = vmul.f32 %v3821_v6, %v3528_v56 }
 0x34f   : > { %v3891_v38 = vsel %vm1106_vm3, %v6784_v22, 0.0 }
 0x350   : > { %3892 = vadd.xlane.f32.xlu1 %v3891_v38 }
 0x351   : > { %v3657_v62 = vpop.permute.xlu0 %3656  ;;  %v3660_v47 = vpop.permute.xlu1 %3659 }
 0x352   : > { %v3780_v7 = vrot.slane %v3657_v62, %v6684_v54  ;;  %v3784_v45 = vrot.slane %v3660_v47, %v6684_v54 }
 0x354   : > { %v3822_v5 = vsel %vm3809_vm5, %v3784_v45, %v3780_v7 }
 0x355   : > { %v3663_v42 = vpop.permute.xlu0 %3662  ;;  %v3666_v4 = vpop.permute.xlu1 %3665  ;;  %v6794_v58 = vmul.f32 %v3822_v5, %v3538_v3 }
 0x356   : > { %v3788_v17 = vrot.slane %v3663_v42, %v6684_v54  ;;  %v3792_v27 = vrot.slane %v3666_v4, %v6684_v54 }
 0x357   : > { %v3894_v32 = vsel %vm1106_vm3, %v6794_v58, 0.0 }
 0x358   : > { %3895 = vadd.xlane.f32.xlu0 %v3894_v32  ;;  %v3823_v0 = vsel %vm3809_vm5, %v3792_v27, %v3788_v17 }
 0x359   : > { %v3672_v12 = vpop.permute.xlu1 %3671  ;;  %v6802_v20 = vmul.f32 %v3823_v0, %v3539_v50  ;;  %v3669_v31 = vpop.permute.xlu0 %3668 }
 0x35a   : > { %v3796_v59 = vrot.slane %v3669_v31, %v6684_v54  ;;  %v3800_v2 = vrot.slane %v3672_v12, %v6684_v54 }
 0x35b   : > { %v3897_v51 = vsel %vm1106_vm3, %v6802_v20, 0.0 }
 0x35c   : > { %3898 = vadd.xlane.f32.xlu1 %v3897_v51  ;;  %v3824_v24 = vsel %vm3809_vm5, %v3800_v2, %v3796_v59 }
 0x35d   : > { %v3678_v9 = vpop.permute.xlu1 %3677  ;;  %v3675_v30 = vpop.permute.xlu0 %3674 }
 0x35e   : > { %v3804_v53 = vrot.slane %v3675_v30, %v6684_v54  ;;  %v3808_v61 = vrot.slane %v3678_v9, %v6684_v54 }
 0x360   : > { %v3825_v36 = vsel %vm3809_vm5, %v3808_v61, %v3804_v53 }
 0x361   : > { %v3462_v41 = vpop.permute.xlu1 %3461 }
 0x362   : > { %v3542_v15 = vcombine.low %v6679_v49, %v3462_v41 }
 0x364   : > { %v3549_v40 = vrot.slane %v3542_v15, %v7459_v14 }
 0x366   : > { %v3550_v39 = vcombine.high %v3549_v40, %v7461_v57  ;;  %v6814_v48 = vmul.f32 %v3824_v24, %v3549_v40 }
 0x368   : > { %v3900_v37 = vsel %vm1106_vm3, %v6814_v48, 0.0  ;;  %v6819_v55 = vmul.f32 %v3825_v36, %v3550_v39 }
 0x369   : > { %3901 = vadd.xlane.f32.xlu0 %v3900_v37 }
 0x36a   : > { %v3903_v49 = vsel %vm1106_vm3, %v6819_v55, 0.0 }
 0x36b   : > { %3904 = vadd.xlane.f32.xlu1 %v3903_v49 }
 0x38c   : > { %v3860_v54 = vpop.xlane.xlu0 %3859 }
 0x38d   : > { %v3907_v18 = vmul.f32 0.125, %v3860_v54 }
 0x38f   : > { %v6824_v26 = vsub.f32 %v6690_v19, %v3907_v18 }
 0x391   : > { %v3939_v35 = vmul.f32 %v6824_v26, %v6824_v26 }
 0x393   : > { %v3955_v13 = vsel %vm1106_vm3, %v3939_v35, 0.0 }
 0x394   : > { %3956 = vadd.xlane.f32.xlu0 %v3955_v13  ;;  %v3863_v56 = vpop.xlane.xlu1 %3862 }
 0x395   : > { %v3908_v6 = vmul.f32 0.125, %v3863_v56 }
 0x397   : > { %v6830_v8 = vsub.f32 %v6698_v63, %v3908_v6 }
 0x399   : > { %v3940_v38 = vmul.f32 %v6830_v8, %v6830_v8 }
 0x39b   : > { %v3958_v62 = vsel %vm1106_vm3, %v3940_v38, 0.0 }
 0x39c   : > { %3959 = vadd.xlane.f32.xlu1 %v3958_v62 }
 0x39e   : > { %v3866_v47 = vpop.xlane.xlu0 %3865 }
 0x39f   : > { %v3909_v19 = vmul.f32 0.125, %v3866_v47 }
 0x3a1   : > { %v6836_v7 = vsub.f32 %v6706_v11, %v3909_v19 }
 0x3a3   : > { %v3941_v45 = vmul.f32 %v6836_v7, %v6836_v7 }
 0x3a5   : > { %v3961_v3 = vsel %vm1106_vm3, %v3941_v45, 0.0 }
 0x3a6   : > { %v3869_v5 = vpop.xlane.xlu0 %3868  ;;  %3962 = vadd.xlane.f32.xlu0 %v3961_v3 }
 0x3a7   : > { %v3910_v63 = vmul.f32 0.125, %v3869_v5 }
 0x3a9   : > { %v6842_v42 = vsub.f32 %v6714_v16, %v3910_v63 }
 0x3ab   : > { %v3942_v4 = vmul.f32 %v6842_v42, %v6842_v42 }
 0x3ad   : > { %v3964_v17 = vsel %vm1106_vm3, %v3942_v4, 0.0 }
 0x3ae   : > { %3965 = vadd.xlane.f32.xlu1 %v3964_v17 }
 0x3b2   : > { %v3872_v27 = vpop.xlane.xlu0 %3871 }
 0x3b3   : > { %v3911_v11 = vmul.f32 0.125, %v3872_v27 }
 0x3b5   : > { %v6848_v32 = vsub.f32 %v6722_v1, %v3911_v11 }
 0x3b6   : > { %v3875_v50 = vpop.xlane.xlu1 %3874 }
 0x3b7   : > { %v3912_v0 = vmul.f32 0.125, %v3875_v50  ;;  %v3943_v12 = vmul.f32 %v6848_v32, %v6848_v32 }
 0x3b9   : > { %v6853_v31 = vsub.f32 %v6732_v28, %v3912_v0  ;;  %v3967_v16 = vsel %vm1106_vm3, %v3943_v12, 0.0 }
 0x3ba   : > { %3968 = vadd.xlane.f32.xlu0 %v3967_v16 }
 0x3bb   : > { %v3878_v51 = vpop.xlane.xlu0 %3877  ;;  %v3944_v30 = vmul.f32 %v6853_v31, %v6853_v31 }
 0x3bc   : > { %v3913_v9 = vmul.f32 0.125, %v3878_v51 }
 0x3bd   : > { %v3970_v1 = vsel %vm1106_vm3, %v3944_v30, 0.0 }
 0x3be   : > { %v6859_v59 = vsub.f32 %v6740_v52, %v3913_v9  ;;  %3971 = vadd.xlane.f32.xlu1 %v3970_v1 }
 0x3bf   : > { %v3881_v2 = vpop.xlane.xlu1 %3880 }
 0x3c0   : > { %v3914_v41 = vmul.f32 0.125, %v3881_v2  ;;  %v3945_v28 = vmul.f32 %v6859_v59, %v6859_v59 }
 0x3c2   : > { %v6865_v15 = vsub.f32 %v6748_v21, %v3914_v41  ;;  %v3973_v53 = vsel %vm1106_vm3, %v3945_v28, 0.0 }
 0x3c3   : > { %3974 = vadd.xlane.f32.xlu0 %v3973_v53 }
 0x3c4   : > { %v3946_v61 = vmul.f32 %v6865_v15, %v6865_v15 }
 0x3c6   : > { %v3976_v52 = vsel %vm1106_vm3, %v3946_v61, 0.0 }
 0x3c7   : > { %3977 = vadd.xlane.f32.xlu1 %v3976_v52 }
 0x3c9   : > { %v3884_v40 = vpop.xlane.xlu0 %3883 }
 0x3ca   : > { %v3915_v24 = vmul.f32 0.125, %v3884_v40 }
 0x3cc   : > { %v6872_v39 = vsub.f32 %v6758_v43, %v3915_v24 }
 0x3cd   : > { %v3887_v36 = vpop.xlane.xlu1 %3886 }
 0x3ce   : > { %v3916_v37 = vmul.f32 0.125, %v3887_v36  ;;  %v3947_v21 = vmul.f32 %v6872_v39, %v6872_v39 }
 0x3d0   : > { %v6877_v49 = vsub.f32 %v6766_v10, %v3916_v37  ;;  %v3979_v54 = vsel %vm1106_vm3, %v3947_v21, 0.0 }
 0x3d1   : > { %3980 = vadd.xlane.f32.xlu0 %v3979_v54 }
 0x3d2   : > { %v3948_v18 = vmul.f32 %v6877_v49, %v6877_v49 }
 0x3d4   : > { %v3982_v35 = vsel %vm1106_vm3, %v3948_v18, 0.0 }
 0x3d5   : > { %v3890_v13 = vpop.xlane.xlu0 %3889  ;;  %3983 = vadd.xlane.f32.xlu1 %v3982_v35 }
 0x3d6   : > { %v3917_v43 = vmul.f32 0.125, %v3890_v13 }
 0x3d8   : > { %v6884_v56 = vsub.f32 %v6776_v25, %v3917_v43 }
 0x3d9   : > { %v3893_v6 = vpop.xlane.xlu1 %3892 }
 0x3da   : > { %v3918_v38 = vmul.f32 0.125, %v3893_v6  ;;  %v3949_v10 = vmul.f32 %v6884_v56, %v6884_v56 }
 0x3dc   : > { %v6889_v62 = vsub.f32 %v6784_v22, %v3918_v38  ;;  %v3985_v47 = vsel %vm1106_vm3, %v3949_v10, 0.0 }
 0x3dd   : > { %3986 = vadd.xlane.f32.xlu0 %v3985_v47 }
 0x3de   : > { %v3950_v19 = vmul.f32 %v6889_v62, %v6889_v62 }
 0x3e0   : > { %v3988_v45 = vsel %vm1106_vm3, %v3950_v19, 0.0 }
 0x3e1   : > { %v3896_v3 = vpop.xlane.xlu0 %3895  ;;  %3989 = vadd.xlane.f32.xlu1 %v3988_v45 }
 0x3e2   : > { %v3919_v25 = vmul.f32 0.125, %v3896_v3 }
 0x3e4   : > { %v6896_v5 = vsub.f32 %v6794_v58, %v3919_v25 }
 0x3e5   : > { %v3899_v63 = vpop.xlane.xlu1 %3898 }
 0x3e6   : > { %v3920_v4 = vmul.f32 0.125, %v3899_v63  ;;  %v3951_v22 = vmul.f32 %v6896_v5, %v6896_v5 }
 0x3e8   : > { %v6901_v17 = vsub.f32 %v6802_v20, %v3920_v4  ;;  %v3991_v27 = vsel %vm1106_vm3, %v3951_v22, 0.0 }
 0x3e9   : > { %3992 = vadd.xlane.f32.xlu0 %v3991_v27 }
 0x3ea   : > { %v3952_v11 = vmul.f32 %v6901_v17, %v6901_v17 }
 0x3ec   : > { %v3994_v50 = vsel %vm1106_vm3, %v3952_v11, 0.0 }
 0x3ed   : > { %3995 = vadd.xlane.f32.xlu1 %v3994_v50 }
 0x3f2   : > { %v3902_v0 = vpop.xlane.xlu0 %3901 }
 0x3f3   : > { %v3921_v58 = vmul.f32 0.125, %v3902_v0 }
 0x3f4   : > { %v3905_v12 = vpop.xlane.xlu1 %3904 }
 0x3f5   : > { %v6908_v16 = vsub.f32 %v6814_v48, %v3921_v58  ;;  %v3922_v51 = vmul.f32 0.125, %v3905_v12  ;;  %v6926_v48 = vld [vmem:[%s4972_s30 + $0xe] sm:$0x3] }
 0x3f7   : > { %v6911_v20 = vsub.f32 %v6819_v55, %v3922_v51  ;;  %v3953_v9 = vmul.f32 %v6908_v16, %v6908_v16  ;;  %v6930_v55 = vld [vmem:[%s4972_s30 + $0xc] sm:$0x3] }
 0x3f9   : > { %v3997_v30 = vsel %vm1106_vm3, %v3953_v9, 0.0  ;;  %v3954_v1 = vmul.f32 %v6911_v20, %v6911_v20 }
 0x3fa   : > { %3998 = vadd.xlane.f32.xlu0 %v3997_v30 }
 0x3fb   : > { %v4000_v2 = vsel %vm1106_vm3, %v3954_v1, 0.0 }
 0x3fc   : > { %4001 = vadd.xlane.f32.xlu1 %v4000_v2 }
 0x40d   : > { %4211 = vrot.lane.b32.xlu1 %v6594_v44, %s4877_s26 }
 0x410   : > { %4209 = vrot.lane.b32.xlu0 %v6587_v33, %s4877_s26 }
 0x411   : > { %4215 = vrot.lane.b32.xlu1 %v6608_v34, %s4877_s26 }
 0x414   : > { %4213 = vrot.lane.b32.xlu0 %v6601_v46, %s4877_s26 }
 0x415   : > { %4219 = vrot.lane.b32.xlu1 %v6622_v23, %s4877_s26 }
 0x418   : > { %4217 = vrot.lane.b32.xlu0 %v6615_v29, %s4877_s26 }
 0x419   : > { %4223 = vrot.lane.b32.xlu1 %v6926_v48, %s4877_s26 }
 0x41c   : > { %4221 = vrot.lane.b32.xlu0 %v6930_v55, %s4877_s26 }
 0x41d   : > { %4243 = vrot.lane.b32.xlu1 %v6594_v44, %s4878_s28  ;;  %v3957_v29 = vpop.xlane.xlu0 %3956 }
 0x41e   : > { %v4003_v23 = vmul.f32 0.125, %v3957_v29 }
 0x420   : > { %4241 = vrot.lane.b32.xlu0 %v6587_v33, %s4878_s28  ;;  %v4019_v41 = vadd.f32 1e-05, %v4003_v23 }
 0x421   : > { %4247 = vrot.lane.b32.xlu1 %v6608_v34, %s4878_s28 }
 0x422   : > { %4734 = vrsqrt.f32 %v4019_v41 }
 0x424   : > { %4245 = vrot.lane.b32.xlu0 %v6601_v46, %s4878_s28 }
 0x425   : > { %v3960_v28 = vpop.xlane.xlu1 %3959 }
 0x426   : > { %v4004_v53 = vmul.f32 0.125, %v3960_v28 }
 0x428   : > { %v4020_v61 = vadd.f32 1e-05, %v4004_v53 }
 0x42a   : > { %4736 = vrsqrt.f32 %v4020_v61 }
 0x42f   : > { %v3963_v52 = vpop.xlane.xlu0 %3962  ;;  %v4735_v24 = vpop.eup %4734 }
 0x430   : > { %v4005_v40 = vmul.f32 0.125, %v3963_v52  ;;  %v4051_v21 = vmul.f32 %v4735_v24, %v6824_v26 }
 0x432   : > { %v4021_v44 = vadd.f32 1e-05, %v4005_v40 }
 0x434   : > { %4738 = vrsqrt.f32 %v4021_v44 }
 0x437   : > { %v3966_v36 = vpop.xlane.xlu1 %3965  ;;  %v4737_v37 = vpop.eup %4736 }
 0x438   : > { %v4006_v33 = vmul.f32 0.125, %v3966_v36  ;;  %v4052_v46 = vmul.f32 %v4737_v37, %v6830_v8 }
 0x43a   : > { %v4022_v34 = vadd.f32 1e-05, %v4006_v33  ;;  %v4053_v54 = vcombine.low %v4051_v21, %v4052_v46 }
 0x43c   : > { %4740 = vrsqrt.f32 %v4022_v34  ;;  %v6944_v18 = vrot.slane %v4053_v54, %v7459_v14 }
 0x43e   : > { %v4061_v43 = vcombine.high %v6944_v18, %v7461_v57 }
 0x440   : > { %4147 = vrot.lane.b32.xlu0 %v4061_v43, %s4879_s29 }
 0x441   : > { %v4739_v47 = vpop.eup %4738 }
 0x442   : > { %v4062_v25 = vmul.f32 %v4739_v47, %v6836_v7 }
 0x443   : > { %v3969_v35 = vpop.xlane.xlu0 %3968 }
 0x444   : > { %v4007_v13 = vmul.f32 0.125, %v3969_v35 }
 0x446   : > { %v4023_v6 = vadd.f32 1e-05, %v4007_v13 }
 0x447   : > { %v3972_v38 = vpop.xlane.xlu1 %3971 }
 0x448   : > { %v4008_v10 = vmul.f32 0.125, %v3972_v38  ;;  %4742 = vrsqrt.f32 %v4023_v6 }
 0x449   : > { %v4741_v45 = vpop.eup %4740 }
 0x44a   : > { %v4024_v26 = vadd.f32 1e-05, %v4008_v10  ;;  %v4063_v63 = vmul.f32 %v4741_v45, %v6842_v42 }
 0x44c   : > { %v3975_v8 = vpop.xlane.xlu0 %3974  ;;  %4744 = vrsqrt.f32 %v4024_v26  ;;  %v4064_v27 = vcombine.low %v4062_v25, %v4063_v63 }
 0x44d   : > { %v4009_v19 = vmul.f32 0.125, %v3975_v8 }
 0x44e   : > { %v6952_v50 = vrot.slane %v4064_v27, %v7459_v14 }
 0x44f   : > { %v4025_v3 = vadd.f32 1e-05, %v4009_v19 }
 0x450   : > { %v3978_v4 = vpop.xlane.xlu1 %3977  ;;  %v4072_v0 = vcombine.high %v6952_v50, %v7461_v57 }
 0x451   : > { %v4010_v22 = vmul.f32 0.125, %v3978_v4  ;;  %4746 = vrsqrt.f32 %v4025_v3 }
 0x452   : > { %4149 = vrot.lane.b32.xlu1 %v4072_v0, %s4879_s29 }
 0x453   : > { %v4026_v11 = vadd.f32 1e-05, %v4010_v22 }
 0x455   : > { %4748 = vrsqrt.f32 %v4026_v11  ;;  %v4743_v58 = vpop.eup %4742 }
 0x456   : > { %v4073_v42 = vmul.f32 %v4743_v58, %v6848_v32 }
 0x459   : > { %v4745_v7 = vpop.eup %4744 }
 0x45a   : > { %v3981_v12 = vpop.xlane.xlu0 %3980  ;;  %v4074_v30 = vmul.f32 %v4745_v7, %v6853_v31 }
 0x45b   : > { %v4011_v51 = vmul.f32 0.125, %v3981_v12 }
 0x45c   : > { %v4075_v29 = vcombine.low %v4073_v42, %v4074_v30 }
 0x45d   : > { %v4027_v9 = vadd.f32 1e-05, %v4011_v51 }
 0x45e   : > { %v3984_v1 = vpop.xlane.xlu1 %3983  ;;  %v6960_v41 = vrot.slane %v4075_v29, %v7459_v14  ;;  %v4747_v28 = vpop.eup %4746 }
 0x45f   : > { %v4012_v2 = vmul.f32 0.125, %v3984_v1  ;;  %4750 = vrsqrt.f32 %v4027_v9  ;;  %v4084_v32 = vmul.f32 %v4747_v28, %v6859_v59  ;;  %v4776_v1 = vld [vmem:[%s4972_s30 + $0x8] sm:$0x3]  ;;  %v7470_v28 = vld [vmem:[#allocation18_spill] sm:$0xff] }
 0x460   : > { %v4083_v53 = vcombine.high %v6960_v41, %v7461_v57 }
 0x461   : > { %v4028_v23 = vadd.f32 1e-05, %v4012_v2 }
 0x462   : > { %v4749_v61 = vpop.eup %4748  ;;  %4151 = vrot.lane.b32.xlu1 %v4083_v53, %s4879_s29 }
 0x463   : > { %4752 = vrsqrt.f32 %v4028_v23  ;;  %v4085_v31 = vmul.f32 %v4749_v61, %v6865_v15 }
 0x465   : > { %v4086_v44 = vcombine.low %v4084_v32, %v4085_v31 }
 0x466   : > { %v3987_v52 = vpop.xlane.xlu0 %3986 }
 0x467   : > { %v4013_v40 = vmul.f32 0.125, %v3987_v52  ;;  %v6968_v36 = vrot.slane %v4086_v44, %v7459_v14 }
 0x469   : > { %v4029_v24 = vadd.f32 1e-05, %v4013_v40  ;;  %v4094_v34 = vcombine.high %v6968_v36, %v7461_v57 }
 0x46a   : > { %v3990_v33 = vpop.xlane.xlu1 %3989 }
 0x46b   : > { %v4014_v37 = vmul.f32 0.125, %v3990_v33  ;;  %4754 = vrsqrt.f32 %v4029_v24  ;;  %4153 = vrot.lane.b32.xlu1 %v4094_v34, %s4879_s29 }
 0x46c   : > { %v4751_v46 = vpop.eup %4750 }
 0x46d   : > { %v4030_v21 = vadd.f32 1e-05, %v4014_v37  ;;  %v4095_v15 = vmul.f32 %v4751_v46, %v6872_v39 }
 0x46f   : > { %4756 = vrsqrt.f32 %v4030_v21 }
 0x470   : > { %v4753_v59 = vpop.eup %4752 }
 0x471   : > { %v4096_v54 = vmul.f32 %v4753_v59, %v6877_v49 }
 0x472   : > { %v3993_v35 = vpop.xlane.xlu0 %3992 }
 0x473   : > { %v4015_v13 = vmul.f32 0.125, %v3993_v35  ;;  %v4097_v43 = vcombine.low %v4095_v15, %v4096_v54 }
 0x475   : > { %v4031_v6 = vadd.f32 1e-05, %v4015_v13  ;;  %v6976_v38 = vrot.slane %v4097_v43, %v7459_v14 }
 0x476   : > { %v3996_v10 = vpop.xlane.xlu1 %3995 }
 0x477   : > { %v4016_v26 = vmul.f32 0.125, %v3996_v10  ;;  %v4105_v47 = vcombine.high %v6976_v38, %v7461_v57  ;;  %4758 = vrsqrt.f32 %v4031_v6  ;;  %v4598_v6 = vld [vmem:[%s7114_s5] ss:$0 sm:$0xff] }
 0x478   : > { %v4755_v19 = vpop.eup %4754 }
 0x479   : > { %v4032_v8 = vadd.f32 1e-05, %v4016_v26  ;;  %4155 = vrot.lane.b32.xlu0 %v4105_v47, %s4879_s29  ;;  %v4106_v49 = vmul.f32 %v4755_v19, %v6884_v56 }
 0x47b   : > { %4760 = vrsqrt.f32 %v4032_v8 }
 0x47c   : > { %v4757_v39 = vpop.eup %4756 }
 0x47d   : > { %v4107_v45 = vmul.f32 %v4757_v39, %v6889_v62 }
 0x47f   : > { %v4108_v3 = vcombine.low %v4106_v49, %v4107_v45 }
 0x481   : > { %v6984_v25 = vrot.slane %v4108_v3, %v7459_v14 }
 0x483   : > { %v3999_v63 = vpop.xlane.xlu0 %3998  ;;  %v4116_v4 = vcombine.high %v6984_v25, %v7461_v57 }
 0x484   : > { %v4017_v22 = vmul.f32 0.125, %v3999_v63  ;;  %v4759_v11 = vpop.eup %4758 }
 0x485   : > { %4157 = vrot.lane.b32.xlu1 %v4116_v4, %s4879_s29  ;;  %v4002_v27 = vpop.xlane.xlu1 %4001  ;;  %v4117_v62 = vmul.f32 %v4759_v11, %v6896_v5 }
 0x486   : > { %v4033_v0 = vadd.f32 1e-05, %v4017_v22  ;;  %v4018_v58 = vmul.f32 0.125, %v4002_v27 }
 0x488   : > { %v4761_v12 = vpop.eup %4760  ;;  %4762 = vrsqrt.f32 %v4033_v0  ;;  %v4034_v56 = vadd.f32 1e-05, %v4018_v58 }
 0x489   : > { %v4118_v51 = vmul.f32 %v4761_v12, %v6901_v17 }
 0x48a   : > { %4764 = vrsqrt.f32 %v4034_v56 }
 0x48b   : > { %v4119_v7 = vcombine.low %v4117_v62, %v4118_v51  ;;  %v4882_v62 = vmov 1983009808  }
 0x48c   : > { %v4284_v51 = vunpack.c.l.s4 %v4882_v62 }
 0x48d   : > { %v4126_v9 = vrot.slane %v4119_v7, %v7459_v14 }
 0x48f   : > { %v4127_v42 = vcombine.high %v4126_v9, %v7461_v57 }
 0x491   : > { %4159 = vrot.lane.b32.xlu0 %v4127_v42, %s4879_s29 }
 0x495   : > { %v4763_v30 = vpop.eup %4762  ;;  %4249 = vrot.lane.b32.xlu0 %v4776_v1, %s4878_s28 }
 0x496   : > { %v4128_v29 = vmul.f32 %v4763_v30, %v6908_v16  ;;  %v4669_v16 = vld [vmem:[%s7116_s7] sm:$0xff]  }
 0x497   : > { %v4765_v2 = vpop.eup %4764  ;;  %4614 = vmatpush3.bf16.msra.mxu0 %v4669_v16 }
 0x498   : > { %v4129_v5 = vmul.f32 %v4765_v2, %v6911_v20  ;;  %v4777_v20 = vld [vmem:[%s4972_s30 + $0xa] sm:$0x3] }
 0x499   : > { %4253 = vrot.lane.b32.xlu0 %v6930_v55, %s4878_s28  ;;  %v4212_v55 = vpop.permute.xlu1 %4211 }
 0x49a   : > { %v4130_v17 = vcombine.low %v4128_v29, %v4129_v5 }
 0x49c   : > { %v7001_v23 = vrot.slane %v4130_v17, %v7459_v14  ;;  %v4210_v14 = vpop.permute.xlu0 %4209  ;;  %v4285_v17 = vunpack.c.0.s8 %v4284_v51 }
 0x49d   : > { %3426 = vrot.lane.b32.xlu0 %v7470_v28, %s4880_s13  ;;  %v4216_v32 = vpop.permute.xlu1 %4215 }
 0x49e   : > { %v4138_v53 = vcombine.high %v7001_v23, %v7461_v57 }
 0x4a0   : > { %4161 = vrot.lane.b32.xlu1 %v4138_v53, %s4879_s29  ;;  %v4214_v61 = vpop.permute.xlu0 %4213 }
 0x4a1   : > { %v4220_v52 = vpop.permute.xlu1 %4219 }
 0x4a4   : > { %4251 = vrot.lane.b32.xlu1 %v4777_v20, %s4878_s28  ;;  %v4218_v31 = vpop.permute.xlu0 %4217 }
 0x4a5   : > { %v4224_v44 = vpop.permute.xlu1 %4223 }
 0x4a8   : > { %4255 = vrot.lane.b32.xlu1 %v6926_v48, %s4878_s28  ;;  %v4222_v40 = vpop.permute.xlu0 %4221 }
 0x4a9   : > { %v4244_v33 = vpop.permute.xlu1 %4243 }
 0x4ac   : > { %v4242_v24 = vpop.permute.xlu0 %4241 }
 0x4ad   : > { %v4248_v34 = vpop.permute.xlu1 %4247 }
 0x4b0   : > { %v4246_v37 = vpop.permute.xlu0 %4245 }
 0x4b4   : > { %v4148_v57 = vpop.permute.xlu0 %4147 }
 0x4b5   : > { %v4171_v47 = vsel %vm1091_vm4, %v6944_v18, %v4148_v57 }
 0x4c4   : > { %v4150_v21 = vpop.permute.xlu1 %4149 }
 0x4c5   : > { %v4172_v35 = vsel %vm1091_vm4, %v6952_v50, %v4150_v21  ;;  %v4599_v50 = vld [vmem:[%s7115_s6] ss:$0 sm:$0xff] }
 0x4c6   : > { %v4187_v8 = vmul.f32 %v4598_v6, %v4172_v35 }
 0x4c8   : > { %v4202_v18 = vadd.f32 %v4599_v50, %v4187_v8 }
 0x4ca   : > { %v4234_v12 = vadd.f32 %v4212_v55, %v4202_v18 }
 0x4cc   : > { %v4266_v5 = vmul.f32 %v4244_v33, %v4234_v12 }
 0x4d4   : > { %v4152_v46 = vpop.permute.xlu1 %4151 }
 0x4d5   : > { %v4173_v10 = vsel %vm1091_vm4, %v6960_v41, %v4152_v46  ;;  %v4186_v41 = vmul.f32 %v4598_v6, %v4171_v47 }
 0x4d6   : > { %v4188_v19 = vmul.f32 %v4598_v6, %v4173_v10 }
 0x4d7   : > { %v4201_v11 = vadd.f32 %v4599_v50, %v4186_v41 }
 0x4d8   : > { %v4203_v4 = vadd.f32 %v4599_v50, %v4188_v19 }
 0x4d9   : > { %v4233_v1 = vadd.f32 %v4210_v14, %v4201_v11 }
 0x4db   : > { %v4265_v21 = vmul.f32 %v4242_v24, %v4233_v1 }
 0x4dd   : > { %v4154_v15 = vpop.permute.xlu1 %4153  ;;  %v4281_v14 = vcombine.low %v4265_v21, %v4266_v5 }
 0x4de   : > { %v4174_v48 = vsel %vm1091_vm4, %v6968_v36, %v4154_v15 }
 0x4df   : > { %v4189_v26 = vmul.f32 %v4598_v6, %v4174_v48 }
 0x4e1   : > { %v4204_v3 = vadd.f32 %v4599_v50, %v4189_v26 }
 0x4e3   : > { %v4236_v0 = vadd.f32 %v4216_v32, %v4204_v3 }
 0x4e5   : > { %v4268_v2 = vmul.f32 %v4248_v34, %v4236_v0 }
 0x4eb   : > { %v4156_v59 = vpop.permute.xlu0 %4155 }
 0x4ec   : > { %v4175_v49 = vsel %vm1091_vm4, %v6976_v38, %v4156_v59  ;;  %v4235_v38 = vadd.f32 %v4214_v61, %v4203_v4  ;;  %v7037_v59 = vsub.s32 %v4285_v17, %v7469_v60 }
 0x4ed   : > { %v4190_v22 = vmul.f32 %v4598_v6, %v4175_v49 }
 0x4ee   : > { %v4267_v16 = vmul.f32 %v4246_v37, %v4235_v38 }
 0x4ef   : > { %v4205_v7 = vadd.f32 %v4599_v50, %v4190_v22 }
 0x4f0   : > { %v4282_v61 = vcombine.low %v4267_v16, %v4268_v2 }
 0x4f1   : > { %v4237_v20 = vadd.f32 %v4218_v31, %v4205_v7 }
 0x4f2   : > { %v4296_v37 = vrot.slane %v4282_v61, %v7037_v59 }
 0x4f7   : > { %v4158_v13 = vpop.permute.xlu1 %4157 }
 0x4f8   : > { %v4176_v36 = vsel %vm1091_vm4, %v6984_v25, %v4158_v13 }
 0x4f9   : > { %v4191_v63 = vmul.f32 %v4598_v6, %v4176_v36 }
 0x4fb   : > { %v4206_v58 = vadd.f32 %v4599_v50, %v4191_v63 }
 0x4fd   : > { %v4238_v29 = vadd.f32 %v4220_v52, %v4206_v58 }
 0x503   : > { %v4160_v54 = vpop.permute.xlu0 %4159 }
 0x504   : > { %v4177_v45 = vsel %vm1091_vm4, %v4126_v9, %v4160_v54 }
 0x505   : > { %v4192_v27 = vmul.f32 %v4598_v6, %v4177_v45 }
 0x507   : > { %v4250_v43 = vpop.permute.xlu0 %4249  ;;  %v4207_v9 = vadd.f32 %v4599_v50, %v4192_v27 }
 0x508   : > { %v4269_v46 = vmul.f32 %v4250_v43, %v4237_v20 }
 0x509   : > { %v4239_v55 = vadd.f32 %v4222_v40, %v4207_v9 }
 0x50b   : > { %v4254_v39 = vpop.permute.xlu0 %4253 }
 0x50c   : > { %v4271_v34 = vmul.f32 %v4254_v39, %v4239_v55 }
 0x50f   : > { %v3427_v25 = vpop.permute.xlu0 %3426 }
 0x510   : > { %3430 = vst.msk [vmem:[#allocation6] sm:$0x3] %vm3429_vm7, %v3427_v25 }
 0x512   : > { %v4162_v56 = vpop.permute.xlu1 %4161 }
 0x513   : > { %v4178_v42 = vsel %vm1091_vm4, %v7001_v23, %v4162_v56 }
 0x514   : > { %v4193_v30 = vmul.f32 %v4598_v6, %v4178_v42 }
 0x516   : > { %v4252_v28 = vpop.permute.xlu1 %4251  ;;  %v4208_v53 = vadd.f32 %v4599_v50, %v4193_v30 }
 0x517   : > { %v4270_v32 = vmul.f32 %v4252_v28, %v4238_v29 }
 0x518   : > { %v4240_v57 = vadd.f32 %v4224_v44, %v4208_v53  ;;  %v4289_v44 = vrot.slane %v4281_v14, %v7037_v59 }
 0x519   : > { %v4298_v52 = vcombine.low %v4269_v46, %v4270_v32 }
 0x51a   : > { %v4256_v23 = vpop.permute.xlu1 %4255  ;;  %v4297_v54 = vcombine.low %v4289_v44, %v4296_v37 }
 0x51b   : > { %v4272_v33 = vmul.f32 %v4256_v23, %v4240_v57  ;;  %v4306_v31 = vrot.slane %v4298_v52, %v7037_v59 }
 0x51d   : > { %v4299_v15 = vcombine.low %v4271_v34, %v4272_v33 }
 0x51f   : > { %v4313_v40 = vrot.slane %v4299_v15, %v7037_v59 }
 0x521   : > { %v4314_v24 = vcombine.low %v4306_v31, %v4313_v40 }
 0x523   : > { %v4317_v60 = vpack.c.bf16 %v4314_v24, %v4297_v54 }
 0x525   : > { %4616 = vmatmul.mubr.msk.bf16.vlgmr.msra.gmra.mxu0 %vm4333_vm8, %v4317_v60 }
 0x526   : > { %4791 = shalt.err (!%p4788_p12)
}
 0x527   : > { %s4884_s26 = smov 32   ;;  %s4885_s14 = smov [#allocation2]  }
 0x528   : > { %4622 = dma.vmem_to_hbm [thread:$0]  (%p4631_p5), %s4476_s24, 64, %s7120_s11, [#allocation5], %s4884_s26, %s4884_s26, %s4866_s17  }
 0x529   : > { %s4462_s16 = sshll.u32 %s4885_s14, 4  ;;  %s4463_s16 = int_to_ptr.vmem [resolvable:$true] %s4462_s16 }
 0x52a   : > { %s4802_s30 = scalar_lea.vmem %s4463_s16, 512  ;;  %p4809_p2 = scmp.lt.s32.totalorder %s4463_s16, %s4463_s16 }
 0x52b   : > { %p4803_p13 = scmp.ne.s32.totalorder %s4463_s16, %s4802_s30  ;;  %p4810_p3 = scmp.lt.s32.totalorder %s4802_s30, %s4802_s30 }
 0x52d   : > { %p4804_p0 = pnand %p4803_p13, %p4631_p5  ;;  %p4811_p4 = por %p4810_p3, %p4809_p2 }
 0x52f   : > { %p4805_p1 = pneg %p4804_p0 }
 0x531   : > { %p4812_p6 = pnand %p4811_p4, %p4805_p1 }
 0x533   : > { %4815 = shalt.err (!%p4812_p6)
}
 0x534   : > { %s4886_s18 = smov 128   ;;  %s4887_s17 = smov [#allocation6]  }
 0x535   : > { %4620 = dma.vmem_to_hbm [thread:$0]  (%p4631_p5), %s4463_s16, 512, %s7119_s10, [#allocation3], %s4886_s18, %s4886_s18, %s4879_s29  }
 0x536   : > { %s4489_s23 = sshll.u32 %s4887_s17, 4  ;;  %s4490_s23 = int_to_ptr.vmem [resolvable:$true] %s4489_s23 }
 0x537   : > { %s4826_s24 = scalar_lea.vmem %s4490_s23, 32  ;;  %p4833_p10 = scmp.lt.s32.totalorder %s4490_s23, %s4490_s23 }
 0x538   : > { %p4827_p7 = scmp.ne.s32.totalorder %s4490_s23, %s4826_s24  ;;  %p4834_p11 = scmp.lt.s32.totalorder %s4826_s24, %s4826_s24 }
 0x53a   : > { %p4828_p8 = pnand %p4827_p7, %p4631_p5  ;;  %p4835_p12 = por %p4834_p11, %p4833_p10 }
 0x53c   : > { %p4829_p9 = pneg %p4828_p8 }
 0x53e   : > { %p4836_p13 = pnand %p4835_p12, %p4829_p9 }
 0x540   : > { %4839 = shalt.err (!%p4836_p13)
}
 0x541   : > { %4624 = dma.vmem_to_hbm [thread:$0]  (%p4631_p5), %s4490_s23, 32, %s7121_s12, [#allocation5]   ;;  %v4600_v48 = vld [vmem:[%s7117_s8] ss:$0 sm:$0xff]  ;;  %v4423_v47 = vld [vmem:[%s4967_s27 + $0x2] sm:$0x3] }
 0x542   : > { %v4422_v43 = vld [vmem:[%s4967_s27] sm:$0x3]  ;;  %v4424_v8 = vld [vmem:[%s4967_s27 + $0x4] sm:$0x3]  ;;  %vm4438_vm9 = vcmask 123904  }
 0x543   : > { %v4425_v45 = vld [vmem:[%s4967_s27 + $0x6] sm:$0x3]  ;;  %v4426_v22 = vld [vmem:[%s4967_s27 + $0x8] sm:$0x3]  ;;  %v4428_v25 = vld [vmem:[%s4967_s27 + $0xc] sm:$0x3] }
 0x544   : > { %v4427_v58 = vld [vmem:[%s4967_s27 + $0xa] sm:$0x3]  ;;  %v4429_v56 = vld [vmem:[%s4967_s27 + $0xe] sm:$0x3] }
 0x5e5   : > { %v4371_v35 = vpop.f32.mrf.mxu0 }
 0x5e6   : > { %v4372_v13 = vadd.f32 %v4600_v48, %v4371_v35 }
 0x5e7   : > { %v4617_v6 = vpop.f32.mrf.mxu0 }
 0x5e8   : > { %v4380_v10 = vcombine.high %v4372_v13, %v4372_v13  ;;  %v4387_v26 = vrot.slane %v4372_v13, %v7037_v59 }
 0x5e9   : > { %v4374_v36 = vpop.f32.mrf.mxu0 }
 0x5ea   : > { %v4394_v19 = vrot.slane %v4380_v10, %v7037_v59  ;;  %v4395_v39 = vcombine.high %v4387_v26, %v4387_v26  ;;  %v4430_v50 = vadd.f32 %v4422_v43, %v4387_v26  ;;  %v4375_v49 = vadd.f32 %v4600_v48, %v4374_v36 }
 0x5eb   : > { %v4618_v41 = vpop.f32.mrf.mxu0 }
 0x5ec   : > { %v4396_v3 = vcombine.high %v4394_v19, %v4394_v19  ;;  %v4431_v63 = vadd.f32 %v4423_v47, %v4395_v39  ;;  %v4432_v18 = vadd.f32 %v4424_v8, %v4394_v19  ;;  %4439 = vst.msk [vmem:[%s4977_s15] sm:$0x3] %vm4438_vm9, %v4430_v50  ;;  %v4397_v4 = vcombine.high %v4375_v49, %v4375_v49 }
 0x5ed   : > { %v4404_v27 = vrot.slane %v4375_v49, %v7037_v59 }
 0x5ee   : > { %v4433_v11 = vadd.f32 %v4425_v45, %v4396_v3  ;;  %4440 = vst.msk [vmem:[%s4977_s15 + $0x2] sm:$0x3] %vm4438_vm9, %v4431_v63  ;;  %4441 = vst.msk [vmem:[%s4977_s15 + $0x4] sm:$0x3] %vm4438_vm9, %v4432_v18  ;;  %v4411_v0 = vrot.slane %v4397_v4, %v7037_v59 }
 0x5ef   : > { %v4412_v12 = vcombine.high %v4404_v27, %v4404_v27  ;;  %v4434_v62 = vadd.f32 %v4426_v22, %v4404_v27 }
 0x5f0   : > { %4442 = vst.msk [vmem:[%s4977_s15 + $0x6] sm:$0x3] %vm4438_vm9, %v4433_v11  ;;  %v4413_v51 = vcombine.high %v4411_v0, %v4411_v0  ;;  %v4436_v38 = vadd.f32 %v4428_v25, %v4411_v0 }
 0x5f1   : > { %v4435_v7 = vadd.f32 %v4427_v58, %v4412_v12  ;;  %4443 = vst.msk [vmem:[%s4977_s15 + $0x8] sm:$0x3] %vm4438_vm9, %v4434_v62 }
 0x5f2   : > { %v4437_v9 = vadd.f32 %v4429_v56, %v4413_v51  ;;  %4445 = vst.msk [vmem:[%s4977_s15 + $0xc] sm:$0x3] %vm4438_vm9, %v4436_v38 }
 0x5f3   : > { %4444 = vst.msk [vmem:[%s4977_s15 + $0xa] sm:$0x3] %vm4438_vm9, %v4435_v7 }
 0x5f4   : > { %4446 = vst.msk [vmem:[%s4977_s15 + $0xe] sm:$0x3] %vm4438_vm9, %v4437_v9 }
 0x5f5   : > { %4855 = dma.done.wait (%p4631_p5), [#allocation3], 512  }
 0x5f6   : > { %4857 = vsyncadd (%p4631_p5), [#allocation3], 4294966784 }
 0x5f7   : > { %4859 = dma.done.wait (%p4631_p5), [#allocation5], 96  }
 0x5f8   : > { %4861 = vsyncadd (%p4631_p5), [#allocation5], 4294967200 }
 0x5f9 PF: > { %s25_s21 = sadd.s32 1, %s4864_s21  }
 0x5fa   : > { %p22_p0 = scmp.ge.s32.totalorder %s25_s21, 4  }
 0x5fc   :  { %24 = sbr.rel (!%p22_p0) target bundleno = 2 (0x2), region = 118 }
 0x601   :  { %4518 = vsyncpa [#allocation3], 1 }
 0x602   :  { %4520 = vsyncpa [#allocation3 + $0x1], 1 }
 0x603   :  { %4521 = vsyncpa [#allocation5], 1 }

</bundles_post_ra>
